<compile_context>
chip_gen: v7x
topology: tpu7x:2x2x1
jax: 0.10.0
libtpu: 0.0.40
codegen_flags: <defaults>
</compile_context>

<pallas_src>
import functools

import jax
import jax.numpy as jnp
from jax.experimental import pallas as pl
from jax.experimental.pallas import tpu as pltpu

EPS = 1e-5
LANE = 128


def _round_up(v, m):
    return (v + m - 1) // m * m


def _pad_channels(x, cp):
    c = x.shape[-1]
    if cp == c:
        return x
    return jnp.pad(x, [(0, 0)] * (x.ndim - 1) + [(0, cp - c)])


def _default_vmem_limit():
    """Generation-aware scoped-VMEM cap (v5e/v6e: 128 MiB phys, v7x: 64 MiB)."""
    try:
        cap = int(getattr(pltpu.get_tpu_info(), "vmem_capacity_bytes"))
    except Exception:
        return 32 * 1024 * 1024          # safe everywhere
    if cap >= 100 * 1024 * 1024:
        return 96 * 1024 * 1024          # v5e / v6e
    return 48 * 1024 * 1024              # v7x


# ----------------------------- in-kernel helpers ---------------------------- #

def _conv3x3_instance_norm(tap_fn, w_ref, offs, kc, rows, cp, mask, inv_cnt):
    """Implicit-im2col conv via shifted-row bf16 MXU matmuls + InstanceNorm.

    tap_fn(off) -> bf16 [rows, kc] window; w_ref: bf16 [T*kc, cp].
    InstanceNorm (affine=False) with a two-pass (subtract-mean) variance over
    the valid spatial positions selected by `mask` (shape [rows, 1]).
    """
    acc = jnp.zeros((rows, cp), jnp.float32)
    for t, off in enumerate(offs):                       # static unroll (4 or 9 taps)
        acc = acc + jnp.dot(tap_fn(off), w_ref[pl.ds(t * kc, kc), :],
                            preferred_element_type=jnp.float32)
    masked = jnp.where(mask, acc, 0.0)
    mu = jnp.sum(masked, axis=0, keepdims=True) * inv_cnt
    d = acc - mu
    var = jnp.sum(jnp.where(mask, d * d, 0.0), axis=0, keepdims=True) * inv_cnt
    return d * jax.lax.rsqrt(var + EPS)


def _double_conv_in(x_ref, w1_ref, w2_ref, y1_scr, mask, *, offs1, kc1, rows,
                    wr, inv_cnt, y1_off):
    """conv1 -> IN -> ReLU (kept in VMEM) -> conv2 -> IN, all for one sample."""
    cp = y1_scr.shape[1]

    # conv1 -> InstanceNorm -> ReLU; zero junk columns so they become the halo.
    y1 = _conv3x3_instance_norm(lambda off: x_ref[pl.ds(off, rows), :],
                                w1_ref, offs1, kc1, rows, cp, mask, inv_cnt)
    y1 = jnp.where(mask, jnp.maximum(y1, 0.0), 0.0)

    # Store y1 into the zero-padded flattened layout conv2 consumes (no HBM trip).
    # y1_off is 16-aligned so the interior bf16 store is fully tile-aligned.
    n_scr = y1_scr.shape[0]
    tail = n_scr - (y1_off + rows)
    if (y1_off + rows) % 16 == 0:
        y1_scr[pl.ds(0, y1_off), :] = jnp.zeros((y1_off, cp), y1_scr.dtype)
        y1_scr[pl.ds(y1_off + rows, tail), :] = jnp.zeros((tail, cp), y1_scr.dtype)
    else:
        y1_scr[...] = jnp.zeros_like(y1_scr)
    y1_scr[pl.ds(y1_off, rows), :] = y1.astype(y1_scr.dtype)

    # conv2 (3x3, stride 1) reads shifted rows of the y1 scratch directly.
    offs2 = tuple(y1_off + (ky - 1) * wr + (kx - 1)
                  for ky in range(3) for kx in range(3))
    return _conv3x3_instance_norm(lambda off: y1_scr[pl.ds(off, rows), :],
                                  w2_ref, offs2, cp, rows, cp, mask, inv_cnt)


# ------------------------------- Pallas kernels ----------------------------- #

def _block_shortcut_kernel(x_ref, w1_ref, w2_ref, ws_ref,
                           h_ref, r_ref, s1_ref, s2_ref, y1_scr, *,
                           offs1, kc1, wr, valid_w, valid_h, y1_off,
                           cinp, xs_off, xs_from_rows):
    """Fused conv1+IN+ReLU -> conv2+IN, plus 1x1 shortcut conv and BN partial sums."""
    rows = h_ref.shape[0]
    mask = (jax.lax.broadcasted_iota(jnp.int32, (rows, 1), 0) % wr) < valid_w
    inv_cnt = 1.0 / float(valid_h * valid_w)

    h_ref[...] = _double_conv_in(x_ref, w1_ref, w2_ref, y1_scr, mask,
                                 offs1=offs1, kc1=kc1, rows=rows, wr=wr,
                                 inv_cnt=inv_cnt, y1_off=y1_off)

    # 1x1 stride-s shortcut conv, computed ONCE from the already-resident x block.
    # For stride 2 the (p=1,q=1) space-to-depth channel slice IS the strided input.
    if xs_from_rows:
        xs = x_ref[pl.ds(xs_off, rows), :]
    else:
        xs = x_ref[pl.ds(0, rows), pl.ds(xs_off, cinp)]
    r = jnp.dot(xs, ws_ref[...], preferred_element_type=jnp.float32)
    r_bf = r.astype(r_ref.dtype)
    r_ref[...] = r_bf
    # Per-sample BatchNorm partial sums over (Ho, Wo); junk columns of xs are zero
    # so they contribute nothing.  Stats use the same bf16-rounded r that the
    # epilogue normalizes, keeping them consistent.
    r32 = r_bf.astype(jnp.float32)
    s1_ref[...] = jnp.sum(r32, axis=0, keepdims=True)
    s2_ref[...] = jnp.sum(r32 * r32, axis=0, keepdims=True)


def _block_identity_kernel(x_ref, w1_ref, w2_ref, out_ref, y1_scr, *,
                           offs1, kc1, wr, valid_w, valid_h, y1_off, res_off):
    """Fully fused basic block with identity residual (cin == cout, stride 1)."""
    rows = out_ref.shape[0]
    mask = (jax.lax.broadcasted_iota(jnp.int32, (rows, 1), 0) % wr) < valid_w
    inv_cnt = 1.0 / float(valid_h * valid_w)

    h = _double_conv_in(x_ref, w1_ref, w2_ref, y1_scr, mask,
                        offs1=offs1, kc1=kc1, rows=rows, wr=wr,
                        inv_cnt=inv_cnt, y1_off=y1_off)
    res = x_ref[pl.ds(res_off, rows), :].astype(jnp.float32)
    out_ref[...] = jnp.maximum(h + res, 0.0).astype(out_ref.dtype)


def _bn_add_relu_kernel(h_ref, r_ref, bn_ref, out_ref):
    """out = ReLU(h + (r * scale + shift)) with per-channel BN scale/shift."""
    bn = bn_ref[...]
    scale = bn[0:1, :]
    shift = bn[1:2, :]
    out = h_ref[...] + r_ref[...].astype(jnp.float32) * scale + shift
    out_ref[...] = jnp.maximum(out, 0.0).astype(out_ref.dtype)


# --------------------------------- XLA prep --------------------------------- #

def _prep_conv1_s1(x):
    """3x3 / stride-1 / pad-1 conv as 9 contiguous-row taps on a [H, W+2] junk grid."""
    N, H, W, cp = x.shape
    wr = W + 2
    xp = jnp.pad(x, ((0, 0), (1, 1), (1, 1), (0, 0)))              # [N, H+2, wr, cp]
    rows_out = H * wr
    offs = tuple(ky * wr + kx for ky in range(3) for kx in range(3))
    rows_in = _round_up(max(offs) + rows_out, 8)
    flat = xp.reshape(N, (H + 2) * wr, cp)
    flat = jnp.pad(flat, ((0, 0), (0, rows_in - flat.shape[1]), (0, 0)))
    return flat, offs, rows_out, wr, W, H, cp


def _prep_conv1_s2(x):
    """3x3 / stride-2 / pad-1 conv via 2x2 space-to-depth -> 4 contiguous-row taps.

    Output junk grid is [Ho, Wo+2] so it can be stored straight into the padded
    layout conv2 consumes.  The (p=1,q=1) channel block equals x[:, ::2, ::2, :].
    """
    N, H, W, cp = x.shape
    Ho = (H - 1) // 2 + 1
    Wo = (W - 1) // 2 + 1
    wr = Wo + 2
    hp2 = 2 * (Ho + 1)
    wp2 = 2 * wr
    xp = jnp.pad(x, ((0, 0), (1, hp2 - H - 1), (1, wp2 - W - 1), (0, 0)))
    subs = [xp[:, p::2, q::2, :] for p in (0, 1) for q in (0, 1)]  # [N, Ho+1, wr, cp]
    s2d = jnp.concatenate(subs, axis=-1)                           # [N, Ho+1, wr, 4cp]
    rows_out = Ho * wr
    offs = (0, 1, wr, wr + 1)
    rows_in = _round_up(wr + 1 + rows_out, 8)
    flat = s2d.reshape(N, (Ho + 1) * wr, 4 * cp)
    flat = jnp.pad(flat, ((0, 0), (0, rows_in - flat.shape[1]), (0, 0)))
    return flat, offs, rows_out, wr, Wo, Ho, 4 * cp


def _prep_w3x3(w, cinp, coutp):
    """[3,3,cin,cout] -> tap-stacked [9*cinp, coutp] (zero-padded channels)."""
    wp = jnp.zeros((3, 3, cinp, coutp), jnp.float32)
    wp = wp.at[:, :, :w.shape[2], :w.shape[3]].set(w)
    return wp.reshape(9 * cinp, coutp)


def _prep_w3x3_s2d(w, cinp, coutp):
    """3x3 stride-2 weights re-laid-out as a 2x2 conv over 4*cinp s2d channels."""
    wp = jnp.zeros((3, 3, cinp, coutp), jnp.float32)
    wp = wp.at[:, :, :w.shape[2], :w.shape[3]].set(w)
    blocks = []
    for dy in (0, 1):
        for dx in (0, 1):
            parts = []
            for p in (0, 1):
                for q in (0, 1):
                    ky, kx = 2 * dy + p, 2 * dx + q
                    parts.append(wp[ky, kx] if (ky < 3 and kx < 3)
                                 else jnp.zeros((cinp, coutp), jnp.float32))
            blocks.append(jnp.concatenate(parts, axis=0))          # [4cinp, coutp]
    return jnp.concatenate(blocks, axis=0)                         # [16cinp, coutp]


# ------------------------------ block / layer ------------------------------- #

def resnet_basic_block(x, w1, w2, ws, *, cin, cout, downsampling, out_dtype,
                       vmem_limit):
    """One ResNetBasicBlock on channel-padded NHWC bf16 input [N, H, W, Cinp].

    Returns [N, Ho, Wo, Coutp] `out_dtype` (padded channels stay exactly 0).
    """
    N, H, W, cinp = x.shape
    coutp = _round_up(cout, LANE)
    apply_shortcut = (cin != cout)

    if downsampling == 2:
        x1, offs1, rows, wr, Wo, Ho, kc1 = _prep_conv1_s2(x)
        w1f = _prep_w3x3_s2d(w1, cinp, coutp)
        xs_off, xs_from_rows = 3 * cinp, False
    else:
        x1, offs1, rows, wr, Wo, Ho, kc1 = _prep_conv1_s1(x)
        w1f = _prep_w3x3(w1, cinp, coutp)
        xs_off, xs_from_rows = wr + 1, True

    x1 = x1.astype(jnp.bfloat16)
    w1f = w1f.astype(jnp.bfloat16)
    w2f = _prep_w3x3(w2, coutp, coutp).astype(jnp.bfloat16)
    rows_in = x1.shape[1]

    y1_off = _round_up(wr + 1, 16)                 # 16-aligned bf16 scratch store
    rows_scr = _round_up(y1_off + rows + wr + 2, 8)

    cparams = pltpu.CompilerParams(dimension_semantics=("parallel",),
                                   vmem_limit_bytes=vmem_limit)

    x_spec = pl.BlockSpec((None, rows_in, kc1), lambda n: (n, 0, 0))
    act_spec = pl.BlockSpec((None, rows, coutp), lambda n: (n, 0, 0))
    vec_spec = pl.BlockSpec((None, 1, coutp), lambda n: (n, 0, 0))

    def full2d(a):
        return pl.BlockSpec(a.shape, lambda n: (0, 0))

    if apply_shortcut:
        wsf = (jnp.zeros((cinp, coutp), jnp.float32)
               .at[:cin, :cout].set(ws).astype(jnp.bfloat16))
        kern = functools.partial(
            _block_shortcut_kernel, offs1=offs1, kc1=kc1, wr=wr,
            valid_w=Wo, valid_h=Ho, y1_off=y1_off,
            cinp=cinp, xs_off=xs_off, xs_from_rows=xs_from_rows)
        h, r, s1, s2 = pl.pallas_call(
            kern,
            out_shape=(jax.ShapeDtypeStruct((N, rows, coutp), jnp.float32),
                       jax.ShapeDtypeStruct((N, rows, coutp), jnp.bfloat16),
                       jax.ShapeDtypeStruct((N, 1, coutp), jnp.float32),
                       jax.ShapeDtypeStruct((N, 1, coutp), jnp.float32)),
            grid=(N,),
            in_specs=[x_spec, full2d(w1f), full2d(w2f), full2d(wsf)],
            out_specs=(act_spec, act_spec, vec_spec, vec_spec),
            scratch_shapes=[pltpu.VMEM((rows_scr, coutp), jnp.bfloat16)],
            compiler_params=cparams,
        )(x1, w1f, w2f, wsf)

        # BatchNorm2d, training mode (fresh module): biased batch stats over
        # (N, Ho, Wo), gamma=1, beta=0; folded into per-channel scale/shift.
        cnt = float(N * Ho * Wo)
        mu = jnp.sum(s1[:, 0, :], axis=0, keepdims=True) / cnt
        var = jnp.maximum(jnp.sum(s2[:, 0, :], axis=0, keepdims=True) / cnt
                          - mu * mu, 0.0)
        scale = jax.lax.rsqrt(var + EPS)
        bn = jnp.concatenate([scale, -mu * scale], axis=0)         # [2, coutp]

        out = pl.pallas_call(
            _bn_add_relu_kernel,
            out_shape=jax.ShapeDtypeStruct((N, rows, coutp), out_dtype),
            grid=(N,),
            in_specs=[act_spec, act_spec, full2d(bn)],
            out_specs=act_spec,
            compiler_params=cparams,
        )(h, r, bn)
    else:
        kern = functools.partial(
            _block_identity_kernel, offs1=offs1, kc1=kc1, wr=wr,
            valid_w=Wo, valid_h=Ho, y1_off=y1_off, res_off=wr + 1)
        out = pl.pallas_call(
            kern,
            out_shape=jax.ShapeDtypeStruct((N, rows, coutp), out_dtype),
            grid=(N,),
            in_specs=[x_spec, full2d(w1f), full2d(w2f)],
            out_specs=act_spec,
            scratch_shapes=[pltpu.VMEM((rows_scr, coutp), jnp.bfloat16)],
            compiler_params=cparams,
        )(x1, w1f, w2f)

    return out.reshape(N, Ho, wr, coutp)[:, :, :Wo, :]   # drop junk columns


def init_resnet_layer_params(key, in_channels, out_channels, n=1):
    """Deterministic synthetic weights (shapes match the PyTorch module)."""
    params = []
    for i in range(n):
        cin = in_channels if i == 0 else out_channels
        key, k1, k2, k3 = jax.random.split(key, 4)
        w1 = jax.random.normal(k1, (3, 3, cin, out_channels), jnp.float32) * (2.0 / (9 * cin)) ** 0.5
        w2 = jax.random.normal(k2, (3, 3, out_channels, out_channels), jnp.float32) * (2.0 / (9 * out_channels)) ** 0.5
        ws = jax.random.normal(k3, (cin, out_channels), jnp.float32) * (2.0 / cin) ** 0.5
        params.append((w1, w2, ws))
    return params


def resnet_layer(x_nchw, params, in_channels, out_channels, vmem_limit=None):
    """ResNetLayer.forward: NCHW float32 in -> NCHW float32 out."""
    if vmem_limit is None:
        vmem_limit = _default_vmem_limit()
    downsampling = 2 if in_channels != out_channels else 1
    x = jnp.transpose(x_nchw, (0, 2, 3, 1)).astype(jnp.float32)    # NCHW -> NHWC
    cinp = _round_up(in_channels, LANE)
    x = _pad_channels(x, cinp).astype(jnp.bfloat16)                # lane-dense, bf16
    n_blocks = len(params)
    out = None
    for i, (w1, w2, ws) in enumerate(params):
        cin_i = in_channels if i == 0 else out_channels
        ds_i = downsampling if i == 0 else 1
        last = (i == n_blocks - 1)
        out = resnet_basic_block(
            x, w1, w2, ws, cin=cin_i, cout=out_channels, downsampling=ds_i,
            out_dtype=jnp.float32 if last else jnp.bfloat16,       # bf16 between blocks
            vmem_limit=vmem_limit)
        x = out                                                    # already bf16 if not last
    out = out[..., :out_channels].astype(jnp.float32)
    return jnp.transpose(out, (0, 3, 1, 2))                        # NHWC -> NCHW


# --------------------------------- demo ------------------------------------ #

if __name__ == "__main__":
    key = jax.random.PRNGKey(0)
    kx, kp = jax.random.split(key)

    N, Cin, H, W = 2, 4, 16, 16
    Cout = 8                       # Cin != Cout -> downsampling=2, conv-shortcut path

    x = jax.random.normal(kx, (N, Cin, H, W), jnp.float32)
    params = init_resnet_layer_params(kp, Cin, Cout, n=1)

    fwd = jax.jit(functools.partial(resnet_layer, params=params,
                                    in_channels=Cin, out_channels=Cout))
    out = jax.block_until_ready(fwd(x))

    assert out.shape == (N, Cout, H // 2, W // 2), out.shape
    assert bool(jnp.all(jnp.isfinite(out)))
    assert bool(jnp.all(out >= 0.0))               # final ReLU
    print("KERNEL_OK")
</pallas_src>

<mosaic_0001>
module attributes {stable_mosaic.version = 11 : i64} {
  func.func @_block_shortcut_kernel(%arg0: i32, %arg1: memref<1x96x512xbf16, #tpu.memory_space<vmem>>, %arg2: memref<2048x128xbf16, #tpu.memory_space<vmem>>, %arg3: memref<1152x128xbf16, #tpu.memory_space<vmem>>, %arg4: memref<128x128xbf16, #tpu.memory_space<vmem>>, %arg5: memref<1x80x128xf32, #tpu.memory_space<vmem>>, %arg6: memref<1x80x128xbf16, #tpu.memory_space<vmem>>, %arg7: memref<1x1x128xf32, #tpu.memory_space<vmem>>, %arg8: memref<1x1x128xf32, #tpu.memory_space<vmem>>, %arg9: memref<112x128xbf16, #tpu.memory_space<vmem>>) attributes {dimension_semantics = [#tpu.dimension_semantics<parallel>], iteration_bounds = array<i64: 2>, scalar_prefetch = 0 : i64, scratch_operands = 1 : i64, tpu.core_type = #tpu.core_type<tc>, window_params = [{transform_indices = @transform_0, window_bounds = array<i64: 1, 96, 512>}, {pipeline_mode = #tpu.pipeline_mode<synchronous>, transform_indices = @transform_1, window_bounds = array<i64: 2048, 128>}, {pipeline_mode = #tpu.pipeline_mode<synchronous>, transform_indices = @transform_2, window_bounds = array<i64: 1152, 128>}, {pipeline_mode = #tpu.pipeline_mode<synchronous>, transform_indices = @transform_3, window_bounds = array<i64: 128, 128>}, {transform_indices = @transform_4, window_bounds = array<i64: 1, 80, 128>}, {transform_indices = @transform_5, window_bounds = array<i64: 1, 80, 128>}, {transform_indices = @transform_6, window_bounds = array<i64: 1, 1, 128>}, {transform_indices = @transform_7, window_bounds = array<i64: 1, 1, 128>}]} {
    %0 = tpu.iota {dimensions = array<i32: 0>} : vector<80x1xi32>
    %c10_i32 = arith.constant 10 : i32
    %c0_i32 = arith.constant 0 : i32
    %1 = arith.cmpi eq, %c10_i32, %c0_i32 : i32
    %c1_i32 = arith.constant 1 : i32
    %2 = arith.select %1, %c1_i32, %c10_i32 : i32
    %3 = vector.broadcast %2 : i32 to vector<80x1xi32>
    %4 = arith.remsi %0, %3 : vector<80x1xi32>
    %c0_i32_0 = arith.constant 0 : i32
    %5 = vector.broadcast %c0_i32_0 : i32 to vector<80x1xi32>
    %6 = arith.cmpi ne, %4, %5 : vector<80x1xi32>
    %c0_i32_1 = arith.constant 0 : i32
    %7 = vector.broadcast %c0_i32_1 : i32 to vector<80x1xi32>
    %8 = arith.cmpi slt, %4, %7 : vector<80x1xi32>
    %c0_i32_2 = arith.constant 0 : i32
    %9 = arith.cmpi slt, %2, %c0_i32_2 : i32
    %10 = vector.broadcast %9 : i1 to vector<80x1xi1>
    %11 = vector.broadcast %10 : vector<80x1xi1> to vector<80x1xi1>
    %12 = arith.xori %8, %11 : vector<80x1xi1>
    %13 = arith.andi %12, %6 : vector<80x1xi1>
    %14 = vector.broadcast %2 : i32 to vector<80x1xi32>
    %15 = arith.addi %4, %14 : vector<80x1xi32>
    %16 = arith.select %13, %15, %4 : vector<80x1xi1>, vector<80x1xi32>
    %c8_i32 = arith.constant 8 : i32
    %17 = vector.broadcast %c8_i32 : i32 to vector<80x1xi32>
    %18 = arith.cmpi slt, %16, %17 : vector<80x1xi32>
    %cst = arith.constant 0.000000e+00 : f32
    %19 = vector.broadcast %cst : f32 to vector<80x128xf32>
    %c0 = arith.constant 0 : index
    %c0_3 = arith.constant 0 : index
    %c0_4 = arith.constant 0 : index
    %20 = vector.load %arg1[%c0, %c0_3, %c0_4] : memref<1x96x512xbf16, #tpu.memory_space<vmem>>, vector<1x80x512xbf16>
    %21 = vector.shape_cast %20 : vector<1x80x512xbf16> to vector<80x512xbf16>
    %c0_5 = arith.constant 0 : index
    %c0_6 = arith.constant 0 : index
    %22 = vector.load %arg2[%c0_5, %c0_6] : memref<2048x128xbf16, #tpu.memory_space<vmem>>, vector<512x128xbf16>
    %cst_7 = arith.constant dense<0.000000e+00> : vector<80x128xf32>
    %23 = tpu.matmul %21, %22, %cst_7 {dimension_numbers = #tpu.dot_dimension_numbers<[1], [0], [0], [1], [0, 0, 1, 1], [], []>} : vector<80x512xbf16>, vector<512x128xbf16>, vector<80x128xf32> -> vector<80x128xf32>
    %24 = arith.addf %19, %23 : vector<80x128xf32>
    %c0_8 = arith.constant 0 : index
    %c1 = arith.constant 1 : index
    %c0_9 = arith.constant 0 : index
    %25 = vector.load %arg1[%c0_8, %c1, %c0_9] : memref<1x96x512xbf16, #tpu.memory_space<vmem>>, vector<1x80x512xbf16>
    %26 = vector.shape_cast %25 : vector<1x80x512xbf16> to vector<80x512xbf16>
    %c512 = arith.constant 512 : index
    %c0_10 = arith.constant 0 : index
    %27 = vector.load %arg2[%c512, %c0_10] : memref<2048x128xbf16, #tpu.memory_space<vmem>>, vector<512x128xbf16>
    %cst_11 = arith.constant dense<0.000000e+00> : vector<80x128xf32>
    %28 = tpu.matmul %26, %27, %cst_11 {dimension_numbers = #tpu.dot_dimension_numbers<[1], [0], [0], [1], [0, 0, 1, 1], [], []>} : vector<80x512xbf16>, vector<512x128xbf16>, vector<80x128xf32> -> vector<80x128xf32>
    %29 = arith.addf %24, %28 : vector<80x128xf32>
    %c0_12 = arith.constant 0 : index
    %c10 = arith.constant 10 : index
    %c0_13 = arith.constant 0 : index
    %30 = vector.load %arg1[%c0_12, %c10, %c0_13] : memref<1x96x512xbf16, #tpu.memory_space<vmem>>, vector<1x80x512xbf16>
    %31 = vector.shape_cast %30 : vector<1x80x512xbf16> to vector<80x512xbf16>
    %c1024 = arith.constant 1024 : index
    %c0_14 = arith.constant 0 : index
    %32 = vector.load %arg2[%c1024, %c0_14] : memref<2048x128xbf16, #tpu.memory_space<vmem>>, vector<512x128xbf16>
    %cst_15 = arith.constant dense<0.000000e+00> : vector<80x128xf32>
    %33 = tpu.matmul %31, %32, %cst_15 {dimension_numbers = #tpu.dot_dimension_numbers<[1], [0], [0], [1], [0, 0, 1, 1], [], []>} : vector<80x512xbf16>, vector<512x128xbf16>, vector<80x128xf32> -> vector<80x128xf32>
    %34 = arith.addf %29, %33 : vector<80x128xf32>
    %c0_16 = arith.constant 0 : index
    %c11 = arith.constant 11 : index
    %c0_17 = arith.constant 0 : index
    %35 = vector.load %arg1[%c0_16, %c11, %c0_17] : memref<1x96x512xbf16, #tpu.memory_space<vmem>>, vector<1x80x512xbf16>
    %36 = vector.shape_cast %35 : vector<1x80x512xbf16> to vector<80x512xbf16>
    %c1536 = arith.constant 1536 : index
    %c0_18 = arith.constant 0 : index
    %37 = vector.load %arg2[%c1536, %c0_18] : memref<2048x128xbf16, #tpu.memory_space<vmem>>, vector<512x128xbf16>
    %cst_19 = arith.constant dense<0.000000e+00> : vector<80x128xf32>
    %38 = tpu.matmul %36, %37, %cst_19 {dimension_numbers = #tpu.dot_dimension_numbers<[1], [0], [0], [1], [0, 0, 1, 1], [], []>} : vector<80x512xbf16>, vector<512x128xbf16>, vector<80x128xf32> -> vector<80x128xf32>
    %39 = arith.addf %34, %38 : vector<80x128xf32>
    %cst_20 = arith.constant 0.000000e+00 : f32
    %40 = vector.shape_cast %18 : vector<80x1xi1> to vector<80x1xi1>
    %41 = vector.broadcast %40 : vector<80x1xi1> to vector<80x128xi1>
    %42 = vector.broadcast %cst_20 : f32 to vector<80x128xf32>
    %43 = arith.select %41, %39, %42 : vector<80x128xi1>, vector<80x128xf32>
    %cst_21 = arith.constant dense<0.000000e+00> : vector<128xf32>
    %44 = vector.multi_reduction <add>, %43, %cst_21 [0] : vector<80x128xf32> to vector<128xf32>
    %45 = vector.shape_cast %44 : vector<128xf32> to vector<1x128xf32>
    %cst_22 = arith.constant 1.562500e-02 : f32
    %46 = vector.broadcast %cst_22 : f32 to vector<1x128xf32>
    %47 = arith.mulf %45, %46 : vector<1x128xf32>
    %48 = vector.broadcast %47 : vector<1x128xf32> to vector<80x128xf32>
    %49 = arith.subf %39, %48 : vector<80x128xf32>
    %50 = arith.mulf %49, %49 : vector<80x128xf32>
    %cst_23 = arith.constant 0.000000e+00 : f32
    %51 = vector.shape_cast %18 : vector<80x1xi1> to vector<80x1xi1>
    %52 = vector.broadcast %51 : vector<80x1xi1> to vector<80x128xi1>
    %53 = vector.broadcast %cst_23 : f32 to vector<80x128xf32>
    %54 = arith.select %52, %50, %53 : vector<80x128xi1>, vector<80x128xf32>
    %cst_24 = arith.constant dense<0.000000e+00> : vector<128xf32>
    %55 = vector.multi_reduction <add>, %54, %cst_24 [0] : vector<80x128xf32> to vector<128xf32>
    %56 = vector.shape_cast %55 : vector<128xf32> to vector<1x128xf32>
    %cst_25 = arith.constant 1.562500e-02 : f32
    %57 = vector.broadcast %cst_25 : f32 to vector<1x128xf32>
    %58 = arith.mulf %56, %57 : vector<1x128xf32>
    %cst_26 = arith.constant 9.99999974E-6 : f32
    %59 = vector.broadcast %cst_26 : f32 to vector<1x128xf32>
    %60 = arith.addf %58, %59 : vector<1x128xf32>
    %61 = math.rsqrt %60 : vector<1x128xf32>
    %62 = vector.broadcast %61 : vector<1x128xf32> to vector<80x128xf32>
    %63 = arith.mulf %49, %62 : vector<80x128xf32>
    %cst_27 = arith.constant 0.000000e+00 : f32
    %64 = vector.broadcast %cst_27 : f32 to vector<80x128xf32>
    %65 = arith.maximumf %63, %64 : vector<80x128xf32>
    %cst_28 = arith.constant 0.000000e+00 : f32
    %66 = vector.shape_cast %18 : vector<80x1xi1> to vector<80x1xi1>
    %67 = vector.broadcast %66 : vector<80x1xi1> to vector<80x128xi1>
    %68 = vector.broadcast %cst_28 : f32 to vector<80x128xf32>
    %69 = arith.select %67, %65, %68 : vector<80x128xi1>, vector<80x128xf32>
    %cst_29 = arith.constant 0.000000e+00 : bf16
    %70 = vector.broadcast %cst_29 : bf16 to vector<16x128xbf16>
    %c0_30 = arith.constant 0 : index
    %c0_31 = arith.constant 0 : index
    %71 = vector.load %arg9[%c0_30, %c0_31] : memref<112x128xbf16, #tpu.memory_space<vmem>>, vector<16x128xbf16>
    tpu.vector_store %arg9[%c0_30, %c0_31], %70 {strides = array<i32>} : memref<112x128xbf16, #tpu.memory_space<vmem>>, vector<16x128xbf16>,
    %cst_32 = arith.constant 0.000000e+00 : bf16
    %72 = vector.broadcast %cst_32 : bf16 to vector<16x128xbf16>
    %c96 = arith.constant 96 : index
    %c0_33 = arith.constant 0 : index
    %73 = vector.load %arg9[%c96, %c0_33] : memref<112x128xbf16, #tpu.memory_space<vmem>>, vector<16x128xbf16>
    tpu.vector_store %arg9[%c96, %c0_33], %72 {strides = array<i32>} : memref<112x128xbf16, #tpu.memory_space<vmem>>, vector<16x128xbf16>,
    %74 = arith.truncf %69 : vector<80x128xf32> to vector<80x128xbf16>
    %c16 = arith.constant 16 : index
    %c0_34 = arith.constant 0 : index
    %75 = vector.load %arg9[%c16, %c0_34] : memref<112x128xbf16, #tpu.memory_space<vmem>>, vector<80x128xbf16>
    tpu.vector_store %arg9[%c16, %c0_34], %74 {strides = array<i32>} : memref<112x128xbf16, #tpu.memory_space<vmem>>, vector<80x128xbf16>,
    %cst_35 = arith.constant 0.000000e+00 : f32
    %76 = vector.broadcast %cst_35 : f32 to vector<80x128xf32>
    %c5 = arith.constant 5 : index
    %c0_36 = arith.constant 0 : index
    %77 = vector.load %arg9[%c5, %c0_36] : memref<112x128xbf16, #tpu.memory_space<vmem>>, vector<80x128xbf16>
    %c0_37 = arith.constant 0 : index
    %c0_38 = arith.constant 0 : index
    %78 = vector.load %arg3[%c0_37, %c0_38] : memref<1152x128xbf16, #tpu.memory_space<vmem>>, vector<128x128xbf16>
    %cst_39 = arith.constant dense<0.000000e+00> : vector<80x128xf32>
    %79 = tpu.matmul %77, %78, %cst_39 {dimension_numbers = #tpu.dot_dimension_numbers<[1], [0], [0], [1], [0, 0, 1, 1], [], []>} : vector<80x128xbf16>, vector<128x128xbf16>, vector<80x128xf32> -> vector<80x128xf32>
    %80 = arith.addf %76, %79 : vector<80x128xf32>
    %c6 = arith.constant 6 : index
    %c0_40 = arith.constant 0 : index
    %81 = vector.load %arg9[%c6, %c0_40] : memref<112x128xbf16, #tpu.memory_space<vmem>>, vector<80x128xbf16>
    %c128 = arith.constant 128 : index
    %c0_41 = arith.constant 0 : index
    %82 = vector.load %arg3[%c128, %c0_41] : memref<1152x128xbf16, #tpu.memory_space<vmem>>, vector<128x128xbf16>
    %cst_42 = arith.constant dense<0.000000e+00> : vector<80x128xf32>
    %83 = tpu.matmul %81, %82, %cst_42 {dimension_numbers = #tpu.dot_dimension_numbers<[1], [0], [0], [1], [0, 0, 1, 1], [], []>} : vector<80x128xbf16>, vector<128x128xbf16>, vector<80x128xf32> -> vector<80x128xf32>
    %84 = arith.addf %80, %83 : vector<80x128xf32>
    %c7 = arith.constant 7 : index
    %c0_43 = arith.constant 0 : index
    %85 = vector.load %arg9[%c7, %c0_43] : memref<112x128xbf16, #tpu.memory_space<vmem>>, vector<80x128xbf16>
    %c256 = arith.constant 256 : index
    %c0_44 = arith.constant 0 : index
    %86 = vector.load %arg3[%c256, %c0_44] : memref<1152x128xbf16, #tpu.memory_space<vmem>>, vector<128x128xbf16>
    %cst_45 = arith.constant dense<0.000000e+00> : vector<80x128xf32>
    %87 = tpu.matmul %85, %86, %cst_45 {dimension_numbers = #tpu.dot_dimension_numbers<[1], [0], [0], [1], [0, 0, 1, 1], [], []>} : vector<80x128xbf16>, vector<128x128xbf16>, vector<80x128xf32> -> vector<80x128xf32>
    %88 = arith.addf %84, %87 : vector<80x128xf32>
    %c15 = arith.constant 15 : index
    %c0_46 = arith.constant 0 : index
    %89 = vector.load %arg9[%c15, %c0_46] : memref<112x128xbf16, #tpu.memory_space<vmem>>, vector<80x128xbf16>
    %c384 = arith.constant 384 : index
    %c0_47 = arith.constant 0 : index
    %90 = vector.load %arg3[%c384, %c0_47] : memref<1152x128xbf16, #tpu.memory_space<vmem>>, vector<128x128xbf16>
    %cst_48 = arith.constant dense<0.000000e+00> : vector<80x128xf32>
    %91 = tpu.matmul %89, %90, %cst_48 {dimension_numbers = #tpu.dot_dimension_numbers<[1], [0], [0], [1], [0, 0, 1, 1], [], []>} : vector<80x128xbf16>, vector<128x128xbf16>, vector<80x128xf32> -> vector<80x128xf32>
    %92 = arith.addf %88, %91 : vector<80x128xf32>
    %c16_49 = arith.constant 16 : index
    %c0_50 = arith.constant 0 : index
    %93 = vector.load %arg9[%c16_49, %c0_50] : memref<112x128xbf16, #tpu.memory_space<vmem>>, vector<80x128xbf16>
    %c512_51 = arith.constant 512 : index
    %c0_52 = arith.constant 0 : index
    %94 = vector.load %arg3[%c512_51, %c0_52] : memref<1152x128xbf16, #tpu.memory_space<vmem>>, vector<128x128xbf16>
    %cst_53 = arith.constant dense<0.000000e+00> : vector<80x128xf32>
    %95 = tpu.matmul %93, %94, %cst_53 {dimension_numbers = #tpu.dot_dimension_numbers<[1], [0], [0], [1], [0, 0, 1, 1], [], []>} : vector<80x128xbf16>, vector<128x128xbf16>, vector<80x128xf32> -> vector<80x128xf32>
    %96 = arith.addf %92, %95 : vector<80x128xf32>
    %c17 = arith.constant 17 : index
    %c0_54 = arith.constant 0 : index
    %97 = vector.load %arg9[%c17, %c0_54] : memref<112x128xbf16, #tpu.memory_space<vmem>>, vector<80x128xbf16>
    %c640 = arith.constant 640 : index
    %c0_55 = arith.constant 0 : index
    %98 = vector.load %arg3[%c640, %c0_55] : memref<1152x128xbf16, #tpu.memory_space<vmem>>, vector<128x128xbf16>
    %cst_56 = arith.constant dense<0.000000e+00> : vector<80x128xf32>
    %99 = tpu.matmul %97, %98, %cst_56 {dimension_numbers = #tpu.dot_dimension_numbers<[1], [0], [0], [1], [0, 0, 1, 1], [], []>} : vector<80x128xbf16>, vector<128x128xbf16>, vector<80x128xf32> -> vector<80x128xf32>
    %100 = arith.addf %96, %99 : vector<80x128xf32>
    %c25 = arith.constant 25 : index
    %c0_57 = arith.constant 0 : index
    %101 = vector.load %arg9[%c25, %c0_57] : memref<112x128xbf16, #tpu.memory_space<vmem>>, vector<80x128xbf16>
    %c768 = arith.constant 768 : index
    %c0_58 = arith.constant 0 : index
    %102 = vector.load %arg3[%c768, %c0_58] : memref<1152x128xbf16, #tpu.memory_space<vmem>>, vector<128x128xbf16>
    %cst_59 = arith.constant dense<0.000000e+00> : vector<80x128xf32>
    %103 = tpu.matmul %101, %102, %cst_59 {dimension_numbers = #tpu.dot_dimension_numbers<[1], [0], [0], [1], [0, 0, 1, 1], [], []>} : vector<80x128xbf16>, vector<128x128xbf16>, vector<80x128xf32> -> vector<80x128xf32>
    %104 = arith.addf %100, %103 : vector<80x128xf32>
    %c26 = arith.constant 26 : index
    %c0_60 = arith.constant 0 : index
    %105 = vector.load %arg9[%c26, %c0_60] : memref<112x128xbf16, #tpu.memory_space<vmem>>, vector<80x128xbf16>
    %c896 = arith.constant 896 : index
    %c0_61 = arith.constant 0 : index
    %106 = vector.load %arg3[%c896, %c0_61] : memref<1152x128xbf16, #tpu.memory_space<vmem>>, vector<128x128xbf16>
    %cst_62 = arith.constant dense<0.000000e+00> : vector<80x128xf32>
    %107 = tpu.matmul %105, %106, %cst_62 {dimension_numbers = #tpu.dot_dimension_numbers<[1], [0], [0], [1], [0, 0, 1, 1], [], []>} : vector<80x128xbf16>, vector<128x128xbf16>, vector<80x128xf32> -> vector<80x128xf32>
    %108 = arith.addf %104, %107 : vector<80x128xf32>
    %c27 = arith.constant 27 : index
    %c0_63 = arith.constant 0 : index
    %109 = vector.load %arg9[%c27, %c0_63] : memref<112x128xbf16, #tpu.memory_space<vmem>>, vector<80x128xbf16>
    %c1024_64 = arith.constant 1024 : index
    %c0_65 = arith.constant 0 : index
    %110 = vector.load %arg3[%c1024_64, %c0_65] : memref<1152x128xbf16, #tpu.memory_space<vmem>>, vector<128x128xbf16>
    %cst_66 = arith.constant dense<0.000000e+00> : vector<80x128xf32>
    %111 = tpu.matmul %109, %110, %cst_66 {dimension_numbers = #tpu.dot_dimension_numbers<[1], [0], [0], [1], [0, 0, 1, 1], [], []>} : vector<80x128xbf16>, vector<128x128xbf16>, vector<80x128xf32> -> vector<80x128xf32>
    %112 = arith.addf %108, %111 : vector<80x128xf32>
    %cst_67 = arith.constant 0.000000e+00 : f32
    %113 = vector.shape_cast %18 : vector<80x1xi1> to vector<80x1xi1>
    %114 = vector.broadcast %113 : vector<80x1xi1> to vector<80x128xi1>
    %115 = vector.broadcast %cst_67 : f32 to vector<80x128xf32>
    %116 = arith.select %114, %112, %115 : vector<80x128xi1>, vector<80x128xf32>
    %cst_68 = arith.constant dense<0.000000e+00> : vector<128xf32>
    %117 = vector.multi_reduction <add>, %116, %cst_68 [0] : vector<80x128xf32> to vector<128xf32>
    %118 = vector.shape_cast %117 : vector<128xf32> to vector<1x128xf32>
    %cst_69 = arith.constant 1.562500e-02 : f32
    %119 = vector.broadcast %cst_69 : f32 to vector<1x128xf32>
    %120 = arith.mulf %118, %119 : vector<1x128xf32>
    %121 = vector.broadcast %120 : vector<1x128xf32> to vector<80x128xf32>
    %122 = arith.subf %112, %121 : vector<80x128xf32>
    %123 = arith.mulf %122, %122 : vector<80x128xf32>
    %cst_70 = arith.constant 0.000000e+00 : f32
    %124 = vector.shape_cast %18 : vector<80x1xi1> to vector<80x1xi1>
    %125 = vector.broadcast %124 : vector<80x1xi1> to vector<80x128xi1>
    %126 = vector.broadcast %cst_70 : f32 to vector<80x128xf32>
    %127 = arith.select %125, %123, %126 : vector<80x128xi1>, vector<80x128xf32>
    %cst_71 = arith.constant dense<0.000000e+00> : vector<128xf32>
    %128 = vector.multi_reduction <add>, %127, %cst_71 [0] : vector<80x128xf32> to vector<128xf32>
    %129 = vector.shape_cast %128 : vector<128xf32> to vector<1x128xf32>
    %cst_72 = arith.constant 1.562500e-02 : f32
    %130 = vector.broadcast %cst_72 : f32 to vector<1x128xf32>
    %131 = arith.mulf %129, %130 : vector<1x128xf32>
    %cst_73 = arith.constant 9.99999974E-6 : f32
    %132 = vector.broadcast %cst_73 : f32 to vector<1x128xf32>
    %133 = arith.addf %131, %132 : vector<1x128xf32>
    %134 = math.rsqrt %133 : vector<1x128xf32>
    %135 = vector.broadcast %134 : vector<1x128xf32> to vector<80x128xf32>
    %136 = arith.mulf %122, %135 : vector<80x128xf32>
    %c0_74 = arith.constant 0 : index
    %c0_75 = arith.constant 0 : index
    %c0_76 = arith.constant 0 : index
    %137 = vector.load %arg5[%c0_74, %c0_75, %c0_76] : memref<1x80x128xf32, #tpu.memory_space<vmem>>, vector<1x80x128xf32>
    %138 = vector.shape_cast %137 : vector<1x80x128xf32> to vector<80x128xf32>
    %139 = vector.shape_cast %136 : vector<80x128xf32> to vector<1x80x128xf32>
    tpu.vector_store %arg5[%c0_74, %c0_75, %c0_76], %139 {strides = array<i32>} : memref<1x80x128xf32, #tpu.memory_space<vmem>>, vector<1x80x128xf32>,
    %c0_77 = arith.constant 0 : index
    %c0_78 = arith.constant 0 : index
    %c384_79 = arith.constant 384 : index
    %140 = vector.load %arg1[%c0_77, %c0_78, %c384_79] : memref<1x96x512xbf16, #tpu.memory_space<vmem>>, vector<1x80x128xbf16>
    %141 = vector.shape_cast %140 : vector<1x80x128xbf16> to vector<80x128xbf16>
    %c0_80 = arith.constant 0 : index
    %c0_81 = arith.constant 0 : index
    %142 = vector.load %arg4[%c0_80, %c0_81] : memref<128x128xbf16, #tpu.memory_space<vmem>>, vector<128x128xbf16>
    %cst_82 = arith.constant dense<0.000000e+00> : vector<80x128xf32>
    %143 = tpu.matmul %141, %142, %cst_82 {dimension_numbers = #tpu.dot_dimension_numbers<[1], [0], [0], [1], [0, 0, 1, 1], [], []>} : vector<80x128xbf16>, vector<128x128xbf16>, vector<80x128xf32> -> vector<80x128xf32>
    %144 = arith.truncf %143 : vector<80x128xf32> to vector<80x128xbf16>
    %c0_83 = arith.constant 0 : index
    %c0_84 = arith.constant 0 : index
    %c0_85 = arith.constant 0 : index
    %145 = vector.load %arg6[%c0_83, %c0_84, %c0_85] : memref<1x80x128xbf16, #tpu.memory_space<vmem>>, vector<1x80x128xbf16>
    %146 = vector.shape_cast %145 : vector<1x80x128xbf16> to vector<80x128xbf16>
    %147 = vector.shape_cast %144 : vector<80x128xbf16> to vector<1x80x128xbf16>
    tpu.vector_store %arg6[%c0_83, %c0_84, %c0_85], %147 {strides = array<i32>} : memref<1x80x128xbf16, #tpu.memory_space<vmem>>, vector<1x80x128xbf16>,
    %148 = arith.extf %144 : vector<80x128xbf16> to vector<80x128xf32>
    %cst_86 = arith.constant dense<0.000000e+00> : vector<128xf32>
    %149 = vector.multi_reduction <add>, %148, %cst_86 [0] : vector<80x128xf32> to vector<128xf32>
    %150 = vector.shape_cast %149 : vector<128xf32> to vector<1x128xf32>
    %c0_87 = arith.constant 0 : index
    %c0_88 = arith.constant 0 : index
    %c0_89 = arith.constant 0 : index
    %151 = vector.load %arg7[%c0_87, %c0_88, %c0_89] : memref<1x1x128xf32, #tpu.memory_space<vmem>>, vector<1x1x128xf32>
    %152 = vector.shape_cast %151 : vector<1x1x128xf32> to vector<1x128xf32>
    %153 = vector.shape_cast %150 : vector<1x128xf32> to vector<1x1x128xf32>
    tpu.vector_store %arg7[%c0_87, %c0_88, %c0_89], %153 {strides = array<i32>} : memref<1x1x128xf32, #tpu.memory_space<vmem>>, vector<1x1x128xf32>,
    %154 = arith.mulf %148, %148 : vector<80x128xf32>
    %cst_90 = arith.constant dense<0.000000e+00> : vector<128xf32>
    %155 = vector.multi_reduction <add>, %154, %cst_90 [0] : vector<80x128xf32> to vector<128xf32>
    %156 = vector.shape_cast %155 : vector<128xf32> to vector<1x128xf32>
    %c0_91 = arith.constant 0 : index
    %c0_92 = arith.constant 0 : index
    %c0_93 = arith.constant 0 : index
    %157 = vector.load %arg8[%c0_91, %c0_92, %c0_93] : memref<1x1x128xf32, #tpu.memory_space<vmem>>, vector<1x1x128xf32>
    %158 = vector.shape_cast %157 : vector<1x1x128xf32> to vector<1x128xf32>
    %159 = vector.shape_cast %156 : vector<1x128xf32> to vector<1x1x128xf32>
    tpu.vector_store %arg8[%c0_91, %c0_92, %c0_93], %159 {strides = array<i32>} : memref<1x1x128xf32, #tpu.memory_space<vmem>>, vector<1x1x128xf32>,
    return
  }
  func.func @transform_0(%arg0: i32) -> (i32, i32, i32) {
    %c0_i32 = arith.constant 0 : i32
    %c0_i32_0 = arith.constant 0 : i32
    %c0_i32_1 = arith.constant 0 : i32
    return %arg0, %c0_i32, %c0_i32_0 : i32, i32, i32
  }
  func.func @transform_1(%arg0: i32) -> (i32, i32) {
    %c0_i32 = arith.constant 0 : i32
    %c0_i32_0 = arith.constant 0 : i32
    %c0_i32_1 = arith.constant 0 : i32
    return %c0_i32, %c0_i32_0 : i32, i32
  }
  func.func @transform_2(%arg0: i32) -> (i32, i32) {
    %c0_i32 = arith.constant 0 : i32
    %c0_i32_0 = arith.constant 0 : i32
    %c0_i32_1 = arith.constant 0 : i32
    return %c0_i32, %c0_i32_0 : i32, i32
  }
  func.func @transform_3(%arg0: i32) -> (i32, i32) {
    %c0_i32 = arith.constant 0 : i32
    %c0_i32_0 = arith.constant 0 : i32
    %c0_i32_1 = arith.constant 0 : i32
    return %c0_i32, %c0_i32_0 : i32, i32
  }
  func.func @transform_4(%arg0: i32) -> (i32, i32, i32) {
    %c0_i32 = arith.constant 0 : i32
    %c0_i32_0 = arith.constant 0 : i32
    %c0_i32_1 = arith.constant 0 : i32
    return %arg0, %c0_i32, %c0_i32_0 : i32, i32, i32
  }
  func.func @transform_5(%arg0: i32) -> (i32, i32, i32) {
    %c0_i32 = arith.constant 0 : i32
    %c0_i32_0 = arith.constant 0 : i32
    %c0_i32_1 = arith.constant 0 : i32
    return %arg0, %c0_i32, %c0_i32_0 : i32, i32, i32
  }
  func.func @transform_6(%arg0: i32) -> (i32, i32, i32) {
    %c0_i32 = arith.constant 0 : i32
    %c0_i32_0 = arith.constant 0 : i32
    %c0_i32_1 = arith.constant 0 : i32
    return %arg0, %c0_i32, %c0_i32_0 : i32, i32, i32
  }
  func.func @transform_7(%arg0: i32) -> (i32, i32, i32) {
    %c0_i32 = arith.constant 0 : i32
    %c0_i32_0 = arith.constant 0 : i32
    %c0_i32_1 = arith.constant 0 : i32
    return %arg0, %c0_i32, %c0_i32_0 : i32, i32, i32
  }
}

module attributes {stable_mosaic.version = 11 : i64} {
  func.func @_bn_add_relu_kernel(%arg0: i32, %arg1: memref<1x80x128xf32, #tpu.memory_space<vmem>>, %arg2: memref<1x80x128xbf16, #tpu.memory_space<vmem>>, %arg3: memref<2x128xf32, #tpu.memory_space<vmem>>, %arg4: memref<1x80x128xf32, #tpu.memory_space<vmem>>) attributes {dimension_semantics = [#tpu.dimension_semantics<parallel>], iteration_bounds = array<i64: 2>, scalar_prefetch = 0 : i64, scratch_operands = 0 : i64, tpu.core_type = #tpu.core_type<tc>, window_params = [{transform_indices = @transform_0, window_bounds = array<i64: 1, 80, 128>}, {transform_indices = @transform_1, window_bounds = array<i64: 1, 80, 128>}, {pipeline_mode = #tpu.pipeline_mode<synchronous>, transform_indices = @transform_2, window_bounds = array<i64: 2, 128>}, {transform_indices = @transform_3, window_bounds = array<i64: 1, 80, 128>}]} {
    %c0 = arith.constant 0 : index
    %c0_0 = arith.constant 0 : index
    %0 = vector.load %arg3[%c0, %c0_0] : memref<2x128xf32, #tpu.memory_space<vmem>>, vector<2x128xf32>
    %1 = vector.extract_strided_slice %0 {offsets = [0, 0], sizes = [1, 128], strides = [1, 1]} : vector<2x128xf32> to vector<1x128xf32>
    %2 = vector.extract_strided_slice %0 {offsets = [1, 0], sizes = [1, 128], strides = [1, 1]} : vector<2x128xf32> to vector<1x128xf32>
    %c0_1 = arith.constant 0 : index
    %c0_2 = arith.constant 0 : index
    %c0_3 = arith.constant 0 : index
    %3 = vector.load %arg1[%c0_1, %c0_2, %c0_3] : memref<1x80x128xf32, #tpu.memory_space<vmem>>, vector<1x80x128xf32>
    %4 = vector.shape_cast %3 : vector<1x80x128xf32> to vector<80x128xf32>
    %c0_4 = arith.constant 0 : index
    %c0_5 = arith.constant 0 : index
    %c0_6 = arith.constant 0 : index
    %5 = vector.load %arg2[%c0_4, %c0_5, %c0_6] : memref<1x80x128xbf16, #tpu.memory_space<vmem>>, vector<1x80x128xbf16>
    %6 = vector.shape_cast %5 : vector<1x80x128xbf16> to vector<80x128xbf16>
    %7 = arith.extf %6 : vector<80x128xbf16> to vector<80x128xf32>
    %8 = vector.broadcast %1 : vector<1x128xf32> to vector<80x128xf32>
    %9 = arith.mulf %7, %8 : vector<80x128xf32>
    %10 = arith.addf %4, %9 : vector<80x128xf32>
    %11 = vector.broadcast %2 : vector<1x128xf32> to vector<80x128xf32>
    %12 = arith.addf %10, %11 : vector<80x128xf32>
    %cst = arith.constant 0.000000e+00 : f32
    %13 = vector.broadcast %cst : f32 to vector<80x128xf32>
    %14 = arith.maximumf %12, %13 : vector<80x128xf32>
    %c0_7 = arith.constant 0 : index
    %c0_8 = arith.constant 0 : index
    %c0_9 = arith.constant 0 : index
    %15 = vector.load %arg4[%c0_7, %c0_8, %c0_9] : memref<1x80x128xf32, #tpu.memory_space<vmem>>, vector<1x80x128xf32>
    %16 = vector.shape_cast %15 : vector<1x80x128xf32> to vector<80x128xf32>
    %17 = vector.shape_cast %14 : vector<80x128xf32> to vector<1x80x128xf32>
    tpu.vector_store %arg4[%c0_7, %c0_8, %c0_9], %17 {strides = array<i32>} : memref<1x80x128xf32, #tpu.memory_space<vmem>>, vector<1x80x128xf32>,
    return
  }
  func.func @transform_0(%arg0: i32) -> (i32, i32, i32) {
    %c0_i32 = arith.constant 0 : i32
    %c0_i32_0 = arith.constant 0 : i32
    %c0_i32_1 = arith.constant 0 : i32
    return %arg0, %c0_i32, %c0_i32_0 : i32, i32, i32
  }
  func.func @transform_1(%arg0: i32) -> (i32, i32, i32) {
    %c0_i32 = arith.constant 0 : i32
    %c0_i32_0 = arith.constant 0 : i32
    %c0_i32_1 = arith.constant 0 : i32
    return %arg0, %c0_i32, %c0_i32_0 : i32, i32, i32
  }
  func.func @transform_2(%arg0: i32) -> (i32, i32) {
    %c0_i32 = arith.constant 0 : i32
    %c0_i32_0 = arith.constant 0 : i32
    %c0_i32_1 = arith.constant 0 : i32
    return %c0_i32, %c0_i32_0 : i32, i32
  }
  func.func @transform_3(%arg0: i32) -> (i32, i32, i32) {
    %c0_i32 = arith.constant 0 : i32
    %c0_i32_0 = arith.constant 0 : i32
    %c0_i32_1 = arith.constant 0 : i32
    return %arg0, %c0_i32, %c0_i32_0 : i32, i32, i32
  }
}

</mosaic_0001>

<bundles_post_ra>
// kernel: resnet_layer.3
= control target key start
LH: loop header
LB: loop body
LE: loop exit
PB: predicated region body
PF: predicated region fallthrough
CT: control target
= control target key end

     0   :  { %s419_s12 = smov 0   ;;  %s505_s0 = inlined_call_operand.vmem [shape: f32[2,80,128], index: 0, kind: input, shape index: {}]   ;;  %s506_s1 = inlined_call_operand.vmem [shape: bf16[2,80,128], index: 1, kind: input, shape index: {}]   ;;  %s507_s2 = inlined_call_operand.vmem [shape: f32[2,128], index: 2, kind: input, shape index: {}]   ;;  %s508_s3 = inlined_call_operand.vmem [shape: f32[2,80,128], index: 3, kind: output, shape index: {}]  }
   0x1 LB: > { %s347_s13 = sadd.s32 4294967295, %s397_s12   ;;  %p351_p0 = scmp.ge.s32.totalorder %s397_s12, 1  ;;  %s397_s12 = sphi %s419_s12, %s13_s12  }
   0x2   : > { %p147_p1 = scmp.lt.s32.totalorder %s397_s12, 3 }
   0x4   : > { %p148_p2 = pnand %p351_p0, %p147_p1 }
   0x5   : > { %p176_p3 = scmp.lt.s32.totalorder (!%p148_p2), %s347_s13, 1  ;;  %v222_v0 = vlaneseq (!%p148_p2)  ;;  %v191_v2 = vld [vmem:[%s507_s2] sm:$0x3] (!%p148_p2) }
   0x6   : > { %151 = sbr.rel (%p148_p2) target bundleno = 40 (0x28), region = 32 }
   0x7   : > { %v223_v1 = vshrl.u32 (!%p148_p2), %v222_v0, 7 }
   0x9   : > { %v224_v3 = vsub.s32 (!%p148_p2), 0, %v223_v1  ;;  %v248_v4 = vsub.s32 (!%p148_p2), 1, %v223_v1 }
   0xb   : > { %v446_v5 = vrot.slane (!%p148_p2), %v191_v2, %v224_v3  ;;  %v453_v15 = vrot.slane (!%p148_p2), %v191_v2, %v248_v4 }
   0xd   : > { %s510_s13 = smov (!%p176_p3, %s347_s13), 1 }
   0xe   : > { %s381_s14 = smul.u32 80, %s510_s13 }
   0xf   : > { %s382_s17 = smul.u32 40, %s510_s13 }
  0x10   : > { %s439_s20 = scalar_lea.vmem %s505_s0, %s381_s14  ;;  %s479_s26 = scalar_lea.vmem %s508_s3, %s381_s14 }
  0x11   : > { %s444_s23 = scalar_lea.vmem %s506_s1, %s382_s17  ;;  %v192_v8 = vld [vmem:[%s439_s20] sm:$0xff]  ;;  %v193_v10 = vld [vmem:[%s439_s20 + $0x8] sm:$0xff]  ;;  %v194_v16 = vld [vmem:[%s439_s20 + $0x10] sm:$0xff] }
  0x12   : > { %v358_v6 = vld [vmem:[%s444_s23] sm:$0xff]   ;;  %v377_v7 = vld [vmem:[%s444_s23 + $0x8] sm:$0xff]   ;;  %v378_v14 = vld [vmem:[%s444_s23 + $0x10] sm:$0xff]  }
  0x13   : > { %v359_v9 = vunpack.c.l.bf16 %v358_v6  ;;  %v360_v11 = vunpack.c.h.bf16 %v358_v6  ;;  %v363_v12 = vunpack.c.l.bf16 %v377_v7  ;;  %v364_v13 = vunpack.c.h.bf16 %v377_v7  ;;  %v195_v17 = vld [vmem:[%s439_s20 + $0x18] sm:$0xff]  ;;  %v196_v25 = vld [vmem:[%s439_s20 + $0x20] sm:$0xff]  ;;  %v197_v26 = vld [vmem:[%s439_s20 + $0x28] sm:$0xff] }
  0x14   : > { %v367_v18 = vunpack.c.l.bf16 %v378_v14  ;;  %v368_v19 = vunpack.c.h.bf16 %v378_v14  ;;  %v379_v20 = vld [vmem:[%s444_s23 + $0x18] sm:$0xff]   ;;  %v198_v35 = vld [vmem:[%s439_s20 + $0x30] sm:$0xff]  ;;  %v380_v49 = vld [vmem:[%s444_s23 + $0x20] sm:$0xff]  }
  0x15   : > { %v226_v21 = vmul.f32 %v359_v9, %v446_v5  ;;  %v227_v22 = vmul.f32 %v360_v11, %v446_v5  ;;  %v228_v23 = vmul.f32 %v363_v12, %v446_v5  ;;  %v229_v24 = vmul.f32 %v364_v13, %v446_v5  ;;  %v199_v36 = vld [vmem:[%s439_s20 + $0x38] sm:$0xff]  ;;  %v200_v62 = vld [vmem:[%s439_s20 + $0x40] sm:$0xff]  ;;  %v201_v63 = vld [vmem:[%s439_s20 + $0x48] sm:$0xff] }
  0x16   : > { %v230_v27 = vmul.f32 %v367_v18, %v446_v5  ;;  %v231_v28 = vmul.f32 %v368_v19, %v446_v5  ;;  %v371_v29 = vunpack.c.l.bf16 %v379_v20  ;;  %v372_v30 = vunpack.c.h.bf16 %v379_v20 }
  0x17   : > { %v236_v31 = vadd.f32 %v226_v21, %v192_v8  ;;  %v237_v32 = vadd.f32 %v227_v22, %v193_v10  ;;  %v238_v33 = vadd.f32 %v228_v23, %v194_v16  ;;  %v239_v34 = vadd.f32 %v229_v24, %v195_v17 }
  0x18   : > { %v240_v37 = vadd.f32 %v230_v27, %v196_v25  ;;  %v241_v38 = vadd.f32 %v231_v28, %v197_v26  ;;  %v232_v39 = vmul.f32 %v371_v29, %v446_v5  ;;  %v233_v40 = vmul.f32 %v372_v30, %v446_v5 }
  0x19   : > { %v250_v41 = vadd.f32 %v453_v15, %v236_v31  ;;  %v251_v42 = vadd.f32 %v453_v15, %v237_v32  ;;  %v252_v43 = vadd.f32 %v453_v15, %v238_v33  ;;  %v253_v44 = vadd.f32 %v453_v15, %v239_v34 }
  0x1a   : > { %v254_v45 = vadd.f32 %v453_v15, %v240_v37  ;;  %v255_v46 = vadd.f32 %v453_v15, %v241_v38  ;;  %v242_v47 = vadd.f32 %v232_v39, %v198_v35  ;;  %v243_v48 = vadd.f32 %v233_v40, %v199_v36 }
  0x1b   : > { %v260_v50 = vmax.f32 %v250_v41, 0.0  ;;  %v261_v51 = vmax.f32 %v251_v42, 0.0  ;;  %v262_v52 = vmax.f32 %v252_v43, 0.0  ;;  %v263_v53 = vmax.f32 %v253_v44, 0.0 }
  0x1c   : > { %v264_v54 = vmax.f32 %v254_v45, 0.0  ;;  %v265_v55 = vmax.f32 %v255_v46, 0.0  ;;  %v256_v56 = vadd.f32 %v453_v15, %v242_v47  ;;  %v257_v57 = vadd.f32 %v453_v15, %v243_v48 }
  0x1d   : > { %270 = vst [vmem:[%s479_s26] sm:$0xff] %v260_v50  ;;  %271 = vst [vmem:[%s479_s26 + $0x8] sm:$0xff] %v261_v51  ;;  %v375_v58 = vunpack.c.l.bf16 %v380_v49  ;;  %v376_v59 = vunpack.c.h.bf16 %v380_v49 }
  0x1e   : > { %272 = vst [vmem:[%s479_s26 + $0x10] sm:$0xff] %v262_v52  ;;  %273 = vst [vmem:[%s479_s26 + $0x18] sm:$0xff] %v263_v53  ;;  %v266_v60 = vmax.f32 %v256_v56, 0.0  ;;  %v267_v61 = vmax.f32 %v257_v57, 0.0 }
  0x1f   : > { %274 = vst [vmem:[%s479_s26 + $0x20] sm:$0xff] %v264_v54  ;;  %275 = vst [vmem:[%s479_s26 + $0x28] sm:$0xff] %v265_v55  ;;  %v234_v0 = vmul.f32 %v375_v58, %v446_v5  ;;  %v235_v1 = vmul.f32 %v376_v59, %v446_v5 }
  0x20   : > { %276 = vst [vmem:[%s479_s26 + $0x30] sm:$0xff] %v266_v60  ;;  %277 = vst [vmem:[%s479_s26 + $0x38] sm:$0xff] %v267_v61 }
  0x21   : > { %v244_v2 = vadd.f32 %v234_v0, %v200_v62  ;;  %v245_v3 = vadd.f32 %v235_v1, %v201_v63 }
  0x23   : > { %v258_v4 = vadd.f32 %v453_v15, %v244_v2  ;;  %v259_v6 = vadd.f32 %v453_v15, %v245_v3 }
  0x25   : > { %v268_v7 = vmax.f32 %v258_v4, 0.0  ;;  %v269_v8 = vmax.f32 %v259_v6, 0.0 }
  0x27   : > { %278 = vst [vmem:[%s479_s26 + $0x40] sm:$0xff] %v268_v7  ;;  %279 = vst [vmem:[%s479_s26 + $0x48] sm:$0xff] %v269_v8 }
  0x28 PF: > { %s13_s12 = sadd.s32 1, %s397_s12  }
  0x29   : > { %p10_p4 = scmp.ge.s32.totalorder %s13_s12, 4  }
  0x2b   :  { %12 = sbr.rel (!%p10_p4) target bundleno = 1 (0x1), region = 65 }

// kernel: resnet_layer.2
= control target key start
LH: loop header
LB: loop body
LE: loop exit
PB: predicated region body
PF: predicated region fallthrough
CT: control target
= control target key end

     0   :  { %s6859_s24 = smov 0   ;;  %s8828_s0 = inlined_call_operand.vmem [shape: bf16[2,96,512], index: 0, kind: input, shape index: {}]   ;;  %s8829_s1 = inlined_call_operand.vmem [shape: bf16[2048,128], index: 1, kind: input, shape index: {}]   ;;  %s8830_s2 = inlined_call_operand.vmem [shape: bf16[1152,128], index: 2, kind: input, shape index: {}]   ;;  %s8831_s3 = inlined_call_operand.vmem [shape: bf16[128,128], index: 3, kind: input, shape index: {}]   ;;  %s8832_s4 = inlined_call_operand.vmem [shape: f32[2,80,128], index: 4, kind: output, shape index: {0}]   ;;  %s8833_s5 = inlined_call_operand.vmem [shape: bf16[2,80,128], index: 5, kind: output, shape index: {1}]   ;;  %s8834_s6 = inlined_call_operand.vmem [shape: f32[2,1,128], index: 6, kind: output, shape index: {2}]   ;;  %s8835_s7 = inlined_call_operand.vmem [shape: f32[2,1,128], index: 7, kind: output, shape index: {3}]  }
   0x1 LB: > { %s5140_s25 = sadd.s32 4294967295, %s6814_s24   ;;  %p5144_p0 = scmp.ge.s32.totalorder %s6814_s24, 1  ;;  %s6814_s24 = sphi %s6859_s24, %s18_s24  }
   0x2   : > { %p244_p1 = scmp.lt.s32.totalorder %s6814_s24, 3 }
   0x4   : > { %p245_p2 = pnand %p5144_p0, %p244_p1 }
   0x6   : > { %248 = sbr.rel (%p245_p2) target bundleno = 1298 (0x512), region = 36 }
   0xd   : > { %v6516_v0 = vld [vmem:[%s8829_s1 + $0x140] sm:$0xff]   ;;  %p287_p3 = scmp.lt.s32.totalorder %s5140_s25, 1  ;;  %v6518_v2 = vld [vmem:[%s8829_s1 + $0x148] sm:$0xff]   ;;  %v6520_v4 = vld [vmem:[%s8829_s1 + $0x150] sm:$0xff]   ;;  %vm730_vm0 = vsmask.f32 7424 }
   0xe   : > { %v6517_v1 = vld [vmem:[%s8829_s1 + $0x100] sm:$0xff]   ;;  %5464 = vmatprep.subr.bf16.mxu1 %v6516_v0  ;;  %v6519_v3 = vld [vmem:[%s8829_s1 + $0x108] sm:$0xff]   ;;  %v6521_v5 = vld [vmem:[%s8829_s1 + $0x110] sm:$0xff]   ;;  %vm1799_vm1 = vcmask 1046528   ;;  %vm2288_vm2 = vsmask.f32 6400 }
   0xf   : > { %5465 = vmatpush3.bf16.msra.mxu1 %v6517_v1  ;;  %s8920_s25 = smov (!%p287_p3, %s5140_s25), 1  ;;  %v6522_v6 = vld [vmem:[%s8829_s1 + $0x158] sm:$0xff]   ;;  %v6524_v8 = vld [vmem:[%s8829_s1 + $0x160] sm:$0xff]   ;;  %v6526_v10 = vld [vmem:[%s8829_s1 + $0x168] sm:$0xff]   ;;  %vm6818_vm3 = vmmov 0  }
  0x10   : > { %5466 = vmatprep.subr.bf16.mxu1 %v6518_v2  ;;  %s6482_s17 = smul.u32 192, %s8920_s25  ;;  %v6523_v7 = vld [vmem:[%s8829_s1 + $0x118] sm:$0xff]   ;;  %v6525_v9 = vld [vmem:[%s8829_s1 + $0x120] sm:$0xff]   ;;  %v6527_v16 = vld [vmem:[%s8829_s1 + $0x128] sm:$0xff]   ;;  %s304_s29 = scalar_lea.vmem %s8834_s6, %s8920_s25 }
  0x11   : > { %v6528_v21 = vld [vmem:[%s8829_s1 + $0x170] sm:$0xff]   ;;  %v6530_v32 = vld [vmem:[%s8829_s1 + $0x178] sm:$0xff]   ;;  %v6537_v43 = vld [vmem:[%s8829_s1 + $0x1c0] sm:$0xff]   ;;  %s6484_s20 = smul.u32 40, %s8920_s25  ;;  %s307_s9 = scalar_lea.vmem %s8835_s7, %s8920_s25 }
  0x12   : > { %s6900_s26 = scalar_lea.vmem %s8828_s0, %s6482_s17  ;;  %v6529_v25 = vld [vmem:[%s8829_s1 + $0x130] sm:$0xff]   ;;  %v6531_v39 = vld [vmem:[%s8829_s1 + $0x138] sm:$0xff]   ;;  %v6538_v48 = vld [vmem:[%s8829_s1 + $0x180] sm:$0xff]   ;;  %s6483_s10 = smul.u32 80, %s8920_s25 }
  0x13   : > { %5467 = vmatpush3.bf16.msra.mxu1 %v6519_v3  ;;  %v494_v11 = vld [vmem:[%s6900_s26 + $0x20] sm:$0xff]  ;;  %v6910_v12 = vld [vmem:[%s6900_s26 + $0x30] sm:$0xff]  ;;  %v6539_v49 = vld [vmem:[%s8829_s1 + $0x1c8] sm:$0xff]   ;;  %s8766_s23 = scalar_lea.vmem %s8833_s5, %s6484_s20 }
  0x14   : > { %5468 = vmatprep.subr.bf16.mxu1 %v6520_v4  ;;  %v6913_v13 = vld [vmem:[%s6900_s26 + $0x4] ss:$16 sps:$4 sm:$0xff]   ;;  %v6916_v14 = vld [vmem:[%s6900_s26] ss:$16 sps:$4 sm:$0xff]   ;;  %v6919_v15 = vcombine.high %v494_v11, %v6910_v12  ;;  %v6927_v19 = vcombine.low %v494_v11, %v6910_v12  ;;  %v6540_v57 = vld [vmem:[%s8829_s1 + $0x188] sm:$0xff]   ;;  %s296_s13 = scalar_lea.vmem %s8832_s4, %s6483_s10 }
  0x15   : > { %v744_v17 = vshrl.u32 %v6913_v13, 16  ;;  %v746_v18 = vshll.u32 %v6913_v13, 16  ;;  %v734_v20 = vshll.u32 %v6916_v14, 16  ;;  %v732_v27 = vshrl.u32 %v6916_v14, 16  ;;  %v6940_v30 = vld [vmem:[%s6900_s26 + $0x40] sm:$0xff]  ;;  %v6943_v31 = vld [vmem:[%s6900_s26 + $0x50] sm:$0xff] }
  0x16   : > { %v751_v22 = vshll.u32 %v6919_v15, 16  ;;  %v739_v29 = vshll.u32 %v6927_v19, 16  ;;  %v6950_v33 = vcombine.high %v6940_v30, %v6943_v31  ;;  %v787_v34 = vshrl.u32 %v6919_v15, 16  ;;  %v6956_v37 = vld [vmem:[%s6900_s26 + $0x60] sm:$0xff]  ;;  %v6959_v38 = vld [vmem:[%s6900_s26 + $0x70] sm:$0xff] }
  0x17   : > { %5469 = vmatpush3.bf16.msra.mxu1 %v6521_v5  ;;  %v748_v23 = vrot.slane %v746_v18, 1  ;;  %v736_v28 = vrot.slane %v734_v20, 1  ;;  %v6966_v42 = vcombine.low %v6940_v30, %v6943_v31  ;;  %v6973_v46 = vcombine.high %v6956_v37, %v6959_v38  ;;  %v6988_v55 = vld [vmem:[%s6900_s26 + $0x80] sm:$0xff]  ;;  %v508_v56 = vld [vmem:[%s6900_s26 + $0x90] sm:$0xff] }
  0x18   : > { %5470 = vmatprep.subr.bf16.mxu1 %v6522_v6  ;;  %v753_v24 = vrot.slane %v751_v22, 1  ;;  %v791_v36 = vshll.u32 %v6950_v33, 16  ;;  %v741_v41 = vrot.slane %v739_v29, 1  ;;  %v779_v50 = vshrl.u32 %v6927_v19, 16  ;;  %v6543_v61 = vld [vmem:[%s8829_s1 + $0x1d0] sm:$0xff]   ;;  %v6546_v6 = vld [vmem:[%s8829_s1 + $0x1d8] sm:$0xff]  }
  0x19   : > { %v749_v26 = vor.u32 %v748_v23, %v744_v17  ;;  %v737_v40 = vor.u32 %v736_v28, %v732_v27  ;;  %v783_v51 = vshll.u32 %v6966_v42, 16  ;;  %v819_v52 = vshrl.u32 %v6950_v33, 16  ;;  %v6544_v2 = vld [vmem:[%s8829_s1 + $0x190] sm:$0xff]   ;;  %v6548_v17 = vld [vmem:[%s8829_s1 + $0x198] sm:$0xff]   ;;  %v6549_v18 = vld [vmem:[%s8829_s1 + $0x1e0] sm:$0xff]  }
  0x1a   : > { %v789_v44 = vor.u32 %v787_v34, %v753_v24  ;;  %v793_v45 = vrot.slane %v791_v36, 1  ;;  %v823_v54 = vshll.u32 %v6973_v46, 16  ;;  %v781_v58 = vor.u32 %v779_v50, %v741_v41  ;;  %v6550_v23 = vld [vmem:[%s8829_s1 + $0x1a0] sm:$0xff]   ;;  %v495_v29 = vld [vmem:[%s6900_s26 + $0x28] sm:$0xff]  ;;  %v6557_v50 = vld [vmem:[%s8829_s1 + $0x1b0] sm:$0xff]  }
  0x1b   : > { %5471 = vmatpush3.bf16.msra.mxu1 %v6523_v7  ;;  %v754_v35 = vsel %vm730_vm0, %v749_v26, %v753_v24  ;;  %v742_v47 = vsel %vm730_vm0, %v737_v40, %v741_v41  ;;  %v785_v59 = vrot.slane %v783_v51, 1  ;;  %v6996_v60 = vcombine.low %v6956_v37, %v6959_v38  ;;  %v6553_v26 = vld [vmem:[%s8829_s1 + $0x1e8] sm:$0xff]  }
  0x1c   : > { %5472 = vmatprep.subr.bf16.mxu1 %v6524_v8  ;;  %1151 = vmatprep.mubr.bf16.mxu1 %v754_v35  ;;  %v794_v53 = vsel %vm730_vm0, %v789_v44, %v793_v45  ;;  %v821_v62 = vor.u32 %v819_v52, %v793_v45  ;;  %v825_v63 = vrot.slane %v823_v54, 1  ;;  %v7002_v0 = vcombine.high %v6988_v55, %v508_v56  ;;  %v7039_v35 = vld [vmem:[%s6900_s26 + $0x38] sm:$0xff]  ;;  %v6555_v44 = vld [vmem:[%s8829_s1 + $0x1f0] sm:$0xff]  }
  0x1d   : > { %v786_v1 = vsel %vm730_vm0, %v781_v58, %v785_v59  ;;  %v811_v3 = vshrl.u32 %v6966_v42, 16  ;;  %v815_v4 = vshll.u32 %v6996_v60, 16  ;;  %v851_v7 = vshrl.u32 %v6973_v46, 16  ;;  %v7042_v36 = vld [vmem:[%s6900_s26 + $0xc] ss:$16 sps:$4 sm:$0xff]  }
  0x1e   : > { %v826_v5 = vsel %vm730_vm0, %v821_v62, %v825_v63  ;;  %v855_v8 = vshll.u32 %v7002_v0, 16  ;;  %v843_v24 = vshrl.u32 %v6996_v60, 16  ;;  %v883_v28 = vshrl.u32 %v7002_v0, 16  ;;  %v7062_v54 = vld [vmem:[%s6900_s26 + $0x8] ss:$16 sps:$4 sm:$0xff]  }
  0x1f   : > { %5473 = vmatpush3.bf16.msra.mxu1 %v6525_v9  ;;  %v574_v9 = vld [vmem:[%s6900_s26 + $0xa0] sm:$0x11]  ;;  %v813_v11 = vor.u32 %v811_v3, %v785_v59  ;;  %v853_v20 = vor.u32 %v851_v7, %v825_v63  ;;  %v7051_v45 = vcombine.high %v495_v29, %v7039_v35  ;;  %v7069_v62 = vld [vmem:[%s6900_s26 + $0x48] sm:$0xff]  ;;  %v7072_v63 = vld [vmem:[%s6900_s26 + $0x58] sm:$0xff]  ;;  %v7080_v3 = vcombine.low %v6910_v12, %v6940_v30 }
  0x20   : > { %5474 = vmatprep.subr.bf16.mxu1 %v6526_v10  ;;  %v7018_v10 = vcombine.low %v6988_v55, %v508_v56  ;;  %v5169_v22 = vcombine.high %v574_v9, %v574_v9  ;;  %v6560_v7 = vld [vmem:[%s8829_s1 + $0x1b8] sm:$0xff]  }
  0x21   : > { %v775_v58 = vshll.u32 %v7051_v45, 16 }
  0x22   : > { %v887_v34 = vshll.u32 %v5169_v22, 16  ;;  %v875_v51 = vshrl.u32 %v7018_v10, 16 }
  0x23   : > { %5475 = vmatpush3.bf16.msra.mxu1 %v6527_v16  ;;  %v817_v16 = vrot.slane %v815_v4, 1  ;;  %v7084_v4 = vcombine.high %v6910_v12, %v6940_v30  ;;  %v7094_v12 = vcombine.high %v7069_v62, %v7072_v63  ;;  %v756_v30 = vshrl.u32 %v7062_v54, 16 }
  0x24   : > { %5476 = vmatprep.subr.bf16.mxu1 %v6528_v21  ;;  %v857_v21 = vrot.slane %v855_v8, 1 }
  0x25   : > { %v818_v27 = vsel %vm730_vm0, %v813_v11, %v817_v16  ;;  %v845_v40 = vor.u32 %v843_v24, %v817_v16  ;;  %v6566_v11 = vld [vmem:[%s8829_s1 + $0x40] sm:$0xff]   ;;  %v505_v24 = vld [vmem:[%s6900_s26 + $0x78] sm:$0xff] }
  0x27   : > { %5477 = vmatpush3.bf16.msra.mxu1 %v6529_v25  ;;  %v847_v25 = vshll.u32 %v7018_v10, 16 }
  0x28   : > { %5478 = vmatprep.subr.bf16.mxu1 %v6530_v32  ;;  %v858_v32 = vsel %vm730_vm0, %v853_v20, %v857_v21  ;;  %v803_v20 = vshrl.u32 %v7051_v45, 16 }
  0x29   : > { %v849_v41 = vrot.slane %v847_v25, 1 }
  0x2b   : > { %5479 = vmatpush3.bf16.msra.mxu1 %v6531_v39  ;;  %v5168_v39 = vcombine.low %v574_v9, %v574_v9  ;;  %v850_v56 = vsel %vm730_vm0, %v845_v40, %v849_v41  ;;  %v777_v9 = vrot.slane %v775_v58, 1  ;;  %v7122_v40 = vcombine.low %v6943_v31, %v6956_v37  ;;  %v6572_v58 = vld [vmem:[%s8829_s1 + $0x50] sm:$0xff]  }
  0x2c   : > { %5510 = vmatprep.subr.bf16.mxu1 %v6537_v43  ;;  %v6554_v43 = vld [vmem:[%s8829_s1 + $0x1a8] sm:$0xff]  }
  0x2d   : > { %v879_v52 = vshll.u32 %v5168_v39, 16  ;;  %v6567_v39 = vld [vmem:[%s8829_s1] sm:$0xff]  }
  0x2e   : > { %1152 = vmatmul.mubr.bf16.vlgmr.msra.gmra.mrb[0].mxu1 %v742_v47  ;;  %v885_v47 = vor.u32 %v883_v28, %v857_v21  ;;  %v7101_v21 = vld [vmem:[%s6900_s26 + $0x68] sm:$0xff]  ;;  %v805_v28 = vor.u32 %v803_v20, %v777_v9  ;;  %v6577_v20 = vld [vmem:[%s8829_s1 + $0x18] sm:$0xff]  }
  0x2f   : > { %5511 = vmatpush3.bf16.msra.mxu1 %v6538_v48  ;;  %1159 = vmatprep.mubr.bf16.mxu1 %v794_v53  ;;  %v889_v48 = vrot.slane %v887_v34, 1  ;;  %v6559_v53 = vld [vmem:[%s8829_s1 + $0x1f8] sm:$0xff]   ;;  %v7115_v34 = vcombine.high %v6943_v31, %v6956_v37  ;;  %v6569_v31 = vld [vmem:[%s8829_s1 + $0x8] sm:$0xff]  }
  0x30   : > { %5512 = vmatprep.subr.bf16.mxu1 %v6539_v49  ;;  %v770_v49 = vshll.u32 %v7042_v36, 16 }
  0x31   : > { %v890_v59 = vsel %vm730_vm0, %v885_v47, %v889_v48  ;;  %v835_v48 = vshrl.u32 %v7094_v12, 16 }
  0x33   : > { %5513 = vmatpush3.bf16.msra.mxu1 %v6540_v57  ;;  %v768_v57 = vshrl.u32 %v7042_v36, 16 }
  0x34   : > { %5514 = vmatprep.subr.bf16.mxu1 %v6543_v61  ;;  %v772_v61 = vrot.slane %v770_v49, 1 }
  0x36   : > { %1160 = vmatmul.mubr.bf16.gmra.mrb[4].mxu1 %v786_v1  ;;  %v7075_v1 = vcombine.low %v495_v29, %v7039_v35  ;;  %v773_v8 = vor.u32 %v772_v61, %v768_v57  ;;  %v7143_v57 = vcombine.high %v6959_v38, %v6988_v55 }
  0x37   : > { %5515 = vmatpush3.bf16.msra.mxu1 %v6544_v2  ;;  %1167 = vmatprep.mubr.bf16.mxu1 %v826_v5  ;;  %v758_v2 = vshll.u32 %v7062_v54, 16  ;;  %v877_v5 = vor.u32 %v875_v51, %v849_v41  ;;  %v6568_v41 = vld [vmem:[%s8829_s1 + $0x48] sm:$0xff]  }
  0x38   : > { %5516 = vmatprep.subr.bf16.mxu1 %v6546_v6  ;;  %v881_v6 = vrot.slane %v879_v52, 1  ;;  %v778_v22 = vsel %vm730_vm0, %v773_v8, %v777_v9  ;;  %v507_v51 = vld [vmem:[%s6900_s26 + $0x88] sm:$0xff]  ;;  %v509_v52 = vld [vmem:[%s6900_s26 + $0x98] sm:$0xff] }
  0x39   : > { %v760_v16 = vrot.slane %v758_v2, 1  ;;  %v7148_v2 = vcombine.high %v507_v51, %v509_v52 }
  0x3b   : > { %5517 = vmatpush3.bf16.msra.mxu1 %v6548_v17  ;;  %v763_v17 = vshll.u32 %v7075_v1, 16  ;;  %v761_v25 = vor.u32 %v760_v16, %v756_v30  ;;  %v575_v16 = vld [vmem:[%s6900_s26 + $0xa8] sm:$0x11] }
  0x3c   : > { %5518 = vmatprep.subr.bf16.mxu1 %v6549_v18  ;;  %v882_v18 = vsel %vm730_vm0, %v877_v5, %v881_v6  ;;  %v7152_v5 = vcombine.low %v6959_v38, %v6988_v55  ;;  %v6573_v6 = vld [vmem:[%s8829_s1 + $0x10] sm:$0xff]   ;;  %v871_v55 = vshll.u32 %v7148_v2, 16 }
  0x3e   : > { %1168 = vmatmul.mubr.bf16.gmra.mrb[8].mxu1 %v818_v27  ;;  %v7108_v27 = vcombine.low %v7069_v62, %v7072_v63 }
  0x3f   : > { %5519 = vmatpush3.bf16.msra.mxu1 %v6550_v23  ;;  %1175 = vmatprep.mubr.bf16.mxu1 %v858_v32  ;;  %v807_v23 = vshll.u32 %v7094_v12, 16  ;;  %v7111_v32 = vcombine.high %v7101_v21, %v505_v24 }
  0x40   : > { %5520 = vmatprep.subr.bf16.mxu1 %v6553_v26  ;;  %v765_v26 = vrot.slane %v763_v17, 1  ;;  %v799_v47 = vshll.u32 %v7108_v27, 16  ;;  %v827_v9 = vshrl.u32 %v7108_v27, 16 }
  0x41   : > { %v809_v29 = vrot.slane %v807_v23, 1  ;;  %v867_v38 = vshrl.u32 %v7111_v32, 16  ;;  %v6578_v23 = vld [vmem:[%s8829_s1 + $0x60] sm:$0xff]  }
  0x43   : > { %5521 = vmatpush3.bf16.msra.mxu1 %v6554_v43  ;;  %v795_v43 = vshrl.u32 %v7075_v1, 16  ;;  %v810_v49 = vsel %vm730_vm0, %v805_v28, %v809_v29  ;;  %v6579_v28 = vld [vmem:[%s8829_s1 + $0x20] sm:$0xff]  }
  0x44   : > { %5522 = vmatprep.subr.bf16.mxu1 %v6555_v44  ;;  %v766_v44 = vsel %vm730_vm0, %v761_v25, %v765_v26  ;;  %v873_v25 = vrot.slane %v871_v55, 1  ;;  %v6589_v55 = vld [vmem:[%s8829_s1 + $0x38] sm:$0xff]  }
  0x45   : > { %v797_v37 = vor.u32 %v795_v43, %v765_v26  ;;  %v5171_v26 = vcombine.high %v575_v16, %v575_v16  ;;  %v6582_v43 = vld [vmem:[%s8829_s1 + $0x68] sm:$0xff]  }
  0x46   : > { %1176 = vmatmul.mubr.bf16.gmra.mrb[12].mxu1 %v850_v56  ;;  %v7139_v56 = vcombine.low %v7101_v21, %v505_v24 }
  0x47   : > { %1183 = vmatprep.mubr.bf16.mxu1 %v890_v59  ;;  %5523 = vmatpush3.bf16.msra.mxu1 %v6557_v50  ;;  %v839_v50 = vshll.u32 %v7111_v32, 16  ;;  %v837_v59 = vor.u32 %v835_v48, %v809_v29  ;;  %v903_v48 = vshll.u32 %v5171_v26, 16  ;;  %v6603_v26 = vld [vmem:[%s8829_s1 + $0xb0] sm:$0xff]  }
  0x48   : > { %5524 = vmatprep.subr.bf16.mxu1 %v6559_v53  ;;  %v801_v53 = vrot.slane %v799_v47, 1  ;;  %v859_v29 = vshrl.u32 %v7139_v56, 16  ;;  %v899_v47 = vshrl.u32 %v7148_v2, 16 }
  0x49   : > { %v841_v61 = vrot.slane %v839_v50, 1 }
  0x4a   : > { %v802_v8 = vsel %vm730_vm0, %v797_v37, %v801_v53  ;;  %v829_v17 = vor.u32 %v827_v9, %v801_v53  ;;  %v901_v37 = vor.u32 %v899_v47, %v873_v25  ;;  %v905_v53 = vrot.slane %v903_v48, 1  ;;  %v1623_v47 = vld [vmem:[%s6900_s26 + $0x10] sm:$0xee] }
  0x4b   : > { %5525 = vmatpush3.bf16.msra.mxu1 %v6560_v7  ;;  %v6575_v7 = vld [vmem:[%s8829_s1 + $0x58] sm:$0xff]   ;;  %v842_v30 = vsel %vm730_vm0, %v837_v59, %v841_v61  ;;  %v869_v24 = vor.u32 %v867_v38, %v841_v61  ;;  %v7203_v9 = vcombine.low %v7039_v35, %v7069_v62 }
  0x4c   : > { %5556 = vmatprep.subr.bf16.mxu1 %v6566_v11  ;;  %v831_v11 = vshll.u32 %v7139_v56, 16 }
  0x4e   : > { %1184 = vmatmul.mubr.bf16.gmra.mrb[16].mxu1 %v882_v18  ;;  %v833_v18 = vrot.slane %v831_v11, 1  ;;  %v7207_v11 = vcombine.high %v7039_v35, %v7069_v62  ;;  %v7219_v35 = vcombine.high %v7072_v63, %v7101_v21  ;;  %v7223_v62 = vcombine.low %v7072_v63, %v7101_v21  ;;  %v6594_v63 = vld [vmem:[%s8829_s1 + $0xd0] sm:$0xff]  }
  0x4f   : > { %1224 = vmatprep.mubr.bf16.mxu1 %v778_v22  ;;  %v7170_v22 = vcombine.low %v507_v51, %v509_v52  ;;  %v6583_v51 = vld [vmem:[%s8829_s1 + $0x28] sm:$0xff]   ;;  %v5170_v52 = vcombine.low %v575_v16, %v575_v16  ;;  %v6590_v16 = vld [vmem:[%s8829_s1 + $0xc0] sm:$0xff]   ;;  %v6595_v21 = vld [vmem:[%s8829_s1 + $0x90] sm:$0xff]  }
  0x51   : > { %v891_v61 = vshrl.u32 %v7170_v22, 16 }
  0x56   : > { %1225 = vmatmul.mubr.bf16.vlgmr.msra.gmra.mrb[20].mxu1 %v766_v44  ;;  %v874_v44 = vsel %vm730_vm0, %v869_v24, %v873_v25  ;;  %v6599_v24 = vld [vmem:[%s8829_s1 + $0xa0] sm:$0xff]   ;;  %v6602_v25 = vld [vmem:[%s8829_s1 + $0xf0] sm:$0xff]  }
  0x57   : > { %5557 = vmatpush3.bf16.msra.mxu1 %v6567_v39  ;;  %1232 = vmatprep.mubr.bf16.mxu1 %v810_v49  ;;  %v834_v39 = vsel %vm730_vm0, %v829_v17, %v833_v18  ;;  %v861_v49 = vor.u32 %v859_v29, %v833_v18  ;;  %v6591_v18 = vld [vmem:[%s8829_s1 + $0x80] sm:$0xff]   ;;  %v6609_v29 = vld [vmem:[%s8829_s1 + $0x208] sm:$0xff]  }
  0x58   : > { %5558 = vmatprep.subr.bf16.mxu1 %v6568_v41  ;;  %v863_v41 = vshll.u32 %v7170_v22, 16 }
  0x5a   : > { %v865_v50 = vrot.slane %v863_v41, 1  ;;  %v6615_v41 = vld [vmem:[%s8829_s1 + $0x220] sm:$0xff]  }
  0x5b   : > { %5559 = vmatpush3.bf16.msra.mxu1 %v6569_v31  ;;  %v6584_v31 = vld [vmem:[%s8829_s1 + $0x70] sm:$0xff]  }
  0x5c   : > { %5560 = vmatprep.subr.bf16.mxu1 %v6572_v58  ;;  %v6586_v58 = vld [vmem:[%s8829_s1 + $0x30] sm:$0xff]   ;;  %v866_v59 = vsel %vm730_vm0, %v861_v49, %v865_v50  ;;  %v6621_v49 = vld [vmem:[%s8829_s1 + $0x238] sm:$0xff]  }
  0x5e   : > { %1233 = vmatmul.mubr.bf16.gmra.mrb[24].mxu1 %v802_v8  ;;  %v6588_v8 = vld [vmem:[%s8829_s1 + $0x78] sm:$0xff]  }
  0x5f   : > { %5561 = vmatpush3.bf16.msra.mxu1 %v6573_v6  ;;  %1240 = vmatprep.mubr.bf16.mxu1 %v842_v30  ;;  %v895_v6 = vshll.u32 %v5170_v52, 16  ;;  %v893_v30 = vor.u32 %v891_v61, %v865_v50  ;;  %v6626_v52 = vld [vmem:[%s8829_s1 + $0x2c0] sm:$0xff]  }
  0x60   : > { %5562 = vmatprep.subr.bf16.mxu1 %v6575_v7  ;;  %v906_v7 = vsel %vm730_vm0, %v901_v37, %v905_v53  ;;  %v1801_v37 = vrot.slane %v7080_v3, 1  ;;  %v1814_v53 = vrot.slane %v7115_v34, 1 }
  0x61   : > { %v897_v38 = vrot.slane %v895_v6, 1  ;;  %v6629_v6 = vld [vmem:[%s8829_s1 + $0x288] sm:$0xff]  }
  0x63   : > { %5563 = vmatpush3.bf16.msra.mxu1 %v6577_v20  ;;  %v898_v17 = vsel %vm730_vm0, %v893_v30, %v897_v38  ;;  %v6592_v20 = vld [vmem:[%s8829_s1 + $0xc8] sm:$0xff]   ;;  %v1822_v30 = vrot.slane %v7143_v57, 1  ;;  %v6633_v38 = vld [vmem:[%s8829_s1 + $0x290] sm:$0xff]  }
  0x64   : > { %5564 = vmatprep.subr.bf16.mxu1 %v6578_v23  ;;  %v6598_v23 = vld [vmem:[%s8829_s1 + $0xe0] sm:$0xff]  }
  0x66   : > { %1241 = vmatmul.mubr.bf16.gmra.mrb[28].mxu1 %v834_v39  ;;  %v6614_v39 = vld [vmem:[%s8829_s1 + $0x260] sm:$0xff]  }
  0x67   : > { %5565 = vmatpush3.bf16.msra.mxu1 %v6579_v28  ;;  %1248 = vmatprep.mubr.bf16.mxu1 %v874_v44  ;;  %v6606_v28 = vld [vmem:[%s8829_s1 + $0x240] sm:$0xff]   ;;  %v6619_v44 = vld [vmem:[%s8829_s1 + $0x230] sm:$0xff]  }
  0x68   : > { %5566 = vmatprep.subr.bf16.mxu1 %v6582_v43  ;;  %v6618_v43 = vld [vmem:[%s8829_s1 + $0x270] sm:$0xff]  }
  0x6b   : > { %5567 = vmatpush3.bf16.msra.mxu1 %v6583_v51  ;;  %v1804_v51 = vrot.slane %v7084_v4, 1 }
  0x6c   : > { %5568 = vmatprep.subr.bf16.mxu1 %v6584_v31 }
  0x6e   : > { %1249 = vmatmul.mubr.bf16.gmra.mrb[32].mxu1 %v866_v59  ;;  %v6628_v59 = vld [vmem:[%s8829_s1 + $0x2c8] sm:$0xff]  }
  0x6f   : > { %1256 = vmatprep.mubr.bf16.mxu1 %v906_v7  ;;  %5569 = vmatpush3.bf16.msra.mxu1 %v6586_v58  ;;  %v6627_v58 = vld [vmem:[%s8829_s1 + $0x280] sm:$0xff]   ;;  %v1812_v7 = vrot.slane %v7122_v40, 1 }
  0x70   : > { %5570 = vmatprep.subr.bf16.mxu1 %v6588_v8  ;;  %v6632_v8 = vld [vmem:[%s8829_s1 + $0x2d0] sm:$0xff]  }
  0x73   : > { %5571 = vmatpush3.bf16.msra.mxu1 %v6589_v55  ;;  %v1641_v55 = vld [vmem:[%s6900_s26 + $0xa0] sm:$0xff] }
  0x74   : > { %5602 = vmatprep.subr.bf16.mxu1 %v6590_v16  ;;  %v6635_v16 = vld [vmem:[%s8829_s1 + $0x2d8] sm:$0xff]  }
  0x76   : > { %1257 = vmatmul.mubr.bf16.gmra.mrb[36].mxu1 %v898_v17  ;;  %v1813_v17 = vsel %vm1799_vm1, %v1801_v37, %v1812_v7 }
  0x77   : > { %1509 = vmatprep.mubr.bf16.mxu1 %v6913_v13  ;;  %v6593_v13 = vld [vmem:[%s8829_s1 + $0x88] sm:$0xff]  }
  0x7e   : > { %1510 = vmatmul.mubr.bf16.vlgmr.msra.gmra.mrb[40].mxu1 %v6916_v14  ;;  %v6596_v14 = vld [vmem:[%s8829_s1 + $0xd8] sm:$0xff]  }
  0x7f   : > { %5603 = vmatpush3.bf16.msra.mxu1 %v6591_v18  ;;  %1517 = vmatprep.mubr.bf16.mxu1 %v6919_v15  ;;  %v6597_v15 = vld [vmem:[%s8829_s1 + $0x98] sm:$0xff]   ;;  %v1823_v18 = vsel %vm1799_vm1, %v1814_v53, %v1822_v30 }
  0x80   : > { %5604 = vmatprep.subr.bf16.mxu1 %v6592_v20  ;;  %v6788_v20 = vld [vmem:[%s6900_s26 + $0x90] sm:$0xff] }
  0x83   : > { %5605 = vmatpush3.bf16.msra.mxu1 %v6593_v13  ;;  %v7378_v13 = vcombine.high %v6788_v20, %v1641_v55 }
  0x84   : > { %5606 = vmatprep.subr.bf16.mxu1 %v6594_v63  ;;  %v1820_v63 = vrot.slane %v7152_v5, 1 }
  0x86   : > { %1518 = vmatmul.mubr.bf16.gmra.mrb[44].mxu1 %v6927_v19  ;;  %v6600_v19 = vld [vmem:[%s8829_s1 + $0xe8] sm:$0xff]  }
  0x87   : > { %5607 = vmatpush3.bf16.msra.mxu1 %v6595_v21  ;;  %1525 = vmatprep.mubr.bf16.mxu1 %v6950_v33  ;;  %v6601_v33 = vld [vmem:[%s8829_s1 + $0xa8] sm:$0xff]   ;;  %v6637_v21 = vld [vmem:[%s8829_s1 + $0x298] sm:$0xff]  }
  0x88   : > { %5608 = vmatprep.subr.bf16.mxu1 %v6596_v14  ;;  %v6638_v14 = vld [vmem:[%s8829_s1 + $0x2e0] sm:$0xff]  }
  0x8b   : > { %5609 = vmatpush3.bf16.msra.mxu1 %v6597_v15  ;;  %v1830_v15 = vrot.slane %v7378_v13, 1 }
  0x8c   : > { %5610 = vmatprep.subr.bf16.mxu1 %v6598_v23  ;;  %v6639_v23 = vld [vmem:[%s8829_s1 + $0x2a0] sm:$0xff]  }
  0x8e   : > { %1526 = vmatmul.mubr.bf16.gmra.mrb[48].mxu1 %v6966_v42  ;;  %v6604_v42 = vld [vmem:[%s8829_s1 + $0xf8] sm:$0xff]  }
  0x8f   : > { %5611 = vmatpush3.bf16.msra.mxu1 %v6599_v24  ;;  %1533 = vmatprep.mubr.bf16.mxu1 %v6973_v46  ;;  %v6605_v46 = vld [vmem:[%s8829_s1 + $0xb8] sm:$0xff]   ;;  %v1643_v24 = vld [vmem:[%s6900_s26 + $0xb0] sm:$0x11] }
  0x90   : > { %5612 = vmatprep.subr.bf16.mxu1 %v6600_v19  ;;  %v1821_v19 = vsel %vm1799_vm1, %v1812_v7, %v1820_v63  ;;  %v1816_v7 = vrot.slane %v7223_v62, 1 }
  0x93   : > { %5613 = vmatpush3.bf16.msra.mxu1 %v6601_v33  ;;  %v7393_v33 = vcombine.low %v6788_v20, %v1641_v55  ;;  %v6663_v20 = vld [vmem:[%s8829_s1 + $0x358] sm:$0xff]  }
  0x94   : > { %5614 = vmatprep.subr.bf16.mxu1 %v6602_v25  ;;  %v6642_v25 = vld [vmem:[%s8829_s1 + $0x2e8] sm:$0xff]  }
  0x96   : > { %1534 = vmatmul.mubr.bf16.gmra.mrb[52].mxu1 %v6996_v60  ;;  %v6607_v60 = vld [vmem:[%s8829_s1 + $0x200] sm:$0xff]  }
  0x97   : > { %1541 = vmatprep.mubr.bf16.mxu1 %v7002_v0  ;;  %5615 = vmatpush3.bf16.msra.mxu1 %v6603_v26  ;;  %v6608_v0 = vld [vmem:[%s8829_s1 + $0x248] sm:$0xff]   ;;  %v1831_v26 = vsel %vm1799_vm1, %v1822_v30, %v1830_v15 }
  0x98   : > { %5616 = vmatprep.subr.bf16.mxu1 %v6604_v42  ;;  %v5257_v42 = vcombine.high %v1643_v24, %v1643_v24 }
  0x9b   : > { %5617 = vmatpush3.bf16.msra.mxu1 %v6605_v46  ;;  %v1828_v46 = vrot.slane %v7393_v33, 1 }
  0x9c   : > { %5648 = vmatprep.subr.bf16.mxu1 %v6606_v28  ;;  %v6643_v28 = vld [vmem:[%s8829_s1 + $0x2a8] sm:$0xff]  }
  0x9e   : > { %1542 = vmatmul.mubr.bf16.gmra.mrb[56].mxu1 %v7018_v10  ;;  %v6610_v10 = vld [vmem:[%s8829_s1 + $0x250] sm:$0xff]  }
  0x9f   : > { %1582 = vmatprep.mubr.bf16.mxu1 %v7042_v36  ;;  %v6611_v36 = vld [vmem:[%s8829_s1 + $0x210] sm:$0xff]  }
  0xa6   : > { %1583 = vmatmul.mubr.bf16.vlgmr.msra.gmra.mrb[60].mxu1 %v7062_v54  ;;  %v6612_v54 = vld [vmem:[%s8829_s1 + $0x258] sm:$0xff]  }
  0xa7   : > { %5649 = vmatpush3.bf16.msra.mxu1 %v6607_v60  ;;  %1590 = vmatprep.mubr.bf16.mxu1 %v7051_v45  ;;  %v6613_v45 = vld [vmem:[%s8829_s1 + $0x218] sm:$0xff]   ;;  %v6644_v60 = vld [vmem:[%s8829_s1 + $0x2f0] sm:$0xff]  }
  0xa8   : > { %5650 = vmatprep.subr.bf16.mxu1 %v6608_v0  ;;  %v1838_v0 = vrot.slane %v5257_v42, 1 }
  0xab   : > { %5651 = vmatpush3.bf16.msra.mxu1 %v6609_v29  ;;  %v6646_v29 = vld [vmem:[%s8829_s1 + $0x2b0] sm:$0xff]  }
  0xac   : > { %5652 = vmatprep.subr.bf16.mxu1 %v6610_v10  ;;  %v1624_v10 = vld [vmem:[%s6900_s26 + $0x18] sm:$0xee] }
  0xae   : > { %1591 = vmatmul.mubr.bf16.gmra.mrb[64].mxu1 %v7075_v1  ;;  %v6616_v1 = vld [vmem:[%s8829_s1 + $0x268] sm:$0xff]  }
  0xaf   : > { %5653 = vmatpush3.bf16.msra.mxu1 %v6611_v36  ;;  %1598 = vmatprep.mubr.bf16.mxu1 %v7094_v12  ;;  %v6617_v12 = vld [vmem:[%s8829_s1 + $0x228] sm:$0xff]   ;;  %v6648_v36 = vld [vmem:[%s8829_s1 + $0x2f8] sm:$0xff]  }
  0xb0   : > { %5654 = vmatprep.subr.bf16.mxu1 %v6612_v54  ;;  %v1829_v54 = vsel %vm1799_vm1, %v1820_v63, %v1828_v46  ;;  %v6792_v63 = vld [vmem:[%s6900_s26 + $0x98] sm:$0xff] }
  0xb3   : > { %5655 = vmatpush3.bf16.msra.mxu1 %v6613_v45  ;;  %v5256_v45 = vcombine.low %v1643_v24, %v1643_v24 }
  0xb4   : > { %5656 = vmatprep.subr.bf16.mxu1 %v6614_v39  ;;  %v1839_v39 = vsel %vm1799_vm1, %v1830_v15, %v1838_v0  ;;  %v6665_v15 = vld [vmem:[%s8829_s1 + $0x318] sm:$0xff]  }
  0xb6   : > { %1599 = vmatmul.mubr.bf16.gmra.mrb[68].mxu1 %v7108_v27  ;;  %v6620_v27 = vld [vmem:[%s8829_s1 + $0x278] sm:$0xff]  }
  0xb7   : > { %5657 = vmatpush3.bf16.msra.mxu1 %v6615_v41  ;;  %1606 = vmatprep.mubr.bf16.mxu1 %v7111_v32  ;;  %v6787_v32 = vld [vmem:[%s6900_s26 + $0x20] sm:$0xff]  ;;  %v6789_v41 = vld [vmem:[%s6900_s26 + $0x28] sm:$0xff] }
  0xb8   : > { %5658 = vmatprep.subr.bf16.mxu1 %v6616_v1  ;;  %v7333_v48 = vcombine.high %v1623_v47, %v6787_v32  ;;  %v7345_v31 = vcombine.low %v1623_v47, %v6787_v32  ;;  %v7416_v1 = vcombine.high %v1624_v10, %v6789_v41  ;;  %v1810_v47 = vrot.slane %v7207_v11, 1 }
  0xba   : > { %v1803_v50 = vrot.slane %v7333_v48, 1 }
  0xbb   : > { %5659 = vmatpush3.bf16.msra.mxu1 %v6617_v12  ;;  %v1836_v12 = vrot.slane %v5256_v45, 1 }
  0xbc   : > { %5660 = vmatprep.subr.bf16.mxu1 %v6618_v43  ;;  %v6649_v43 = vld [vmem:[%s8829_s1 + $0x2b8] sm:$0xff]  }
  0xbd   : > { %v1837_v32 = vsel %vm1799_vm1, %v1828_v46, %v1836_v12 }
  0xbe   : > { %1607 = vmatmul.mubr.bf16.gmra.mrb[72].mxu1 %v7139_v56  ;;  %v1805_v56 = vsel %vm1799_vm1, %v1803_v50, %v1804_v51 }
  0xbf   : > { %1614 = vmatprep.mubr.bf16.mxu1 %v7148_v2  ;;  %5661 = vmatpush3.bf16.msra.mxu1 %v6619_v44  ;;  %v1800_v2 = vrot.slane %v7345_v31, 1  ;;  %v1809_v44 = vrot.slane %v7416_v1, 1 }
  0xc0   : > { %5662 = vmatprep.subr.bf16.mxu1 %v6620_v27  ;;  %v6654_v27 = vld [vmem:[%s8829_s1 + $0x340] sm:$0xff]  }
  0xc1   : > { %v1802_v61 = vsel %vm1799_vm1, %v1800_v2, %v1801_v37  ;;  %v1811_v50 = vsel %vm1799_vm1, %v1809_v44, %v1810_v47  ;;  %v6655_v37 = vld [vmem:[%s8829_s1 + $0x300] sm:$0xff]   ;;  %v2307_v44 = vshrl.u32 %v7333_v48, 16 }
  0xc3   : > { %5663 = vmatpush3.bf16.msra.mxu1 %v6621_v49  ;;  %v7427_v49 = vcombine.low %v1624_v10, %v6789_v41  ;;  %v6671_v41 = vld [vmem:[%s8829_s1 + $0x328] sm:$0xff]  }
  0xc4   : > { %5694 = vmatprep.subr.bf16.mxu1 %v6626_v52  ;;  %v1807_v52 = vrot.slane %v7203_v9, 1 }
  0xc6   : > { %1615 = vmatmul.mubr.bf16.gmra.mrb[76].mxu1 %v7170_v22  ;;  %v1815_v22 = vsel %vm1799_vm1, %v1804_v51, %v1814_v53  ;;  %v1806_v51 = vrot.slane %v7427_v49, 1  ;;  %v6656_v53 = vld [vmem:[%s8829_s1 + $0x348] sm:$0xff]   ;;  %v1817_v55 = vsel %vm1799_vm1, %v1807_v52, %v1816_v7 }
  0xc7   : > { %2088 = vmatprep.mubr.bf16.mxu1 %v1805_v56  ;;  %v1818_v56 = vrot.slane %v7219_v35, 1 }
  0xc8   : > { %v1808_v2 = vsel %vm1799_vm1, %v1806_v51, %v1807_v52 }
  0xce   : > { %2089 = vmatmul.mubr.bf16.vlgmr.msra.gmra.mrb[80].mxu1 %v1802_v61  ;;  %v6791_v61 = vld [vmem:[%s6900_s26 + $0x88] sm:$0xff] }
  0xcf   : > { %5695 = vmatpush3.bf16.msra.mxu1 %v6627_v58  ;;  %2096 = vmatprep.mubr.bf16.mxu1 %v1815_v22  ;;  %v1819_v58 = vsel %vm1799_vm1, %v1810_v47, %v1818_v56  ;;  %v2310_v47 = vshll.u32 %v7333_v48, 16 }
  0xd0   : > { %5696 = vmatprep.subr.bf16.mxu1 %v6628_v59  ;;  %v6790_v59 = vld [vmem:[%s6900_s26 + $0x78] sm:$0xff] }
  0xd1   : > { %v7443_v22 = vcombine.high %v6790_v59, %v6791_v61 }
  0xd3   : > { %5697 = vmatpush3.bf16.msra.mxu1 %v6629_v6  ;;  %v6657_v6 = vld [vmem:[%s8829_s1 + $0x308] sm:$0xff]   ;;  %v1826_v30 = vrot.slane %v7443_v22, 1 }
  0xd4   : > { %5698 = vmatprep.subr.bf16.mxu1 %v6632_v8  ;;  %v6660_v8 = vld [vmem:[%s8829_s1 + $0x350] sm:$0xff]  }
  0xd6   : > { %2097 = vmatmul.mubr.bf16.gmra.mrb[84].mxu1 %v1813_v17  ;;  %v7458_v17 = vcombine.low %v6790_v59, %v6791_v61  ;;  %v2309_v59 = vrot.slane %v2307_v44, 1  ;;  %v2312_v61 = vrot.slane %v2310_v47, 2  ;;  %v2361_v44 = vshll.u32 %v7122_v40, 16 }
  0xd7   : > { %5699 = vmatpush3.bf16.msra.mxu1 %v6633_v38  ;;  %2104 = vmatprep.mubr.bf16.mxu1 %v1823_v18  ;;  %v1642_v38 = vld [vmem:[%s6900_s26 + $0xa8] sm:$0xff]  ;;  %v1827_v18 = vsel %vm1799_vm1, %v1818_v56, %v1826_v30 }
  0xd8   : > { %5700 = vmatprep.subr.bf16.mxu1 %v6635_v16  ;;  %v6661_v16 = vld [vmem:[%s8829_s1 + $0x310] sm:$0xff]   ;;  %v7482_v0 = vcombine.low %v6792_v63, %v1642_v38 }
  0xdb   : > { %5701 = vmatpush3.bf16.msra.mxu1 %v6637_v21  ;;  %v7465_v21 = vcombine.high %v6792_v63, %v1642_v38  ;;  %v2290_v38 = vshrl.u32 %v7345_v31, 16  ;;  %v2313_v63 = vor.u32 %v2312_v61, %v2309_v59 }
  0xdc   : > { %5702 = vmatprep.subr.bf16.mxu1 %v6638_v14  ;;  %v1824_v14 = vrot.slane %v7458_v17, 1 }
  0xdd   : > { %v1834_v24 = vrot.slane %v7465_v21, 1 }
  0xde   : > { %2105 = vmatmul.mubr.bf16.gmra.mrb[88].mxu1 %v1821_v19  ;;  %v1644_v19 = vld [vmem:[%s6900_s26 + $0xb8] sm:$0x11] }
  0xdf   : > { %5703 = vmatpush3.bf16.msra.mxu1 %v6639_v23  ;;  %2112 = vmatprep.mubr.bf16.mxu1 %v1831_v26  ;;  %v6666_v23 = vld [vmem:[%s8829_s1 + $0x360] sm:$0xff]   ;;  %v5258_v52 = vcombine.low %v1644_v19, %v1644_v19 }
  0xe0   : > { %5704 = vmatprep.subr.bf16.mxu1 %v6642_v25 }
  0xe3   : > { %5705 = vmatpush3.bf16.msra.mxu1 %v6643_v28  ;;  %v1825_v28 = vsel %vm1799_vm1, %v1816_v7, %v1824_v14 }
  0xe4   : > { %5706 = vmatprep.subr.bf16.mxu1 %v6644_v60  ;;  %v6667_v60 = vld [vmem:[%s8829_s1 + $0x320] sm:$0xff]  }
  0xe6   : > { %2113 = vmatmul.mubr.bf16.gmra.mrb[92].mxu1 %v1829_v54  ;;  %v6670_v54 = vld [vmem:[%s8829_s1 + $0x368] sm:$0xff]  }
  0xe7   : > { %2120 = vmatprep.mubr.bf16.mxu1 %v1839_v39  ;;  %5707 = vmatpush3.bf16.msra.mxu1 %v6646_v29  ;;  %v5259_v29 = vcombine.high %v1644_v19, %v1644_v19  ;;  %v1832_v39 = vrot.slane %v7482_v0, 1 }
  0xe8   : > { %5708 = vmatprep.subr.bf16.mxu1 %v6648_v36  ;;  %v1835_v36 = vsel %vm1799_vm1, %v1826_v30, %v1834_v24  ;;  %v1840_v30 = vrot.slane %v5258_v52, 1 }
  0xe9   : > { %v1842_v12 = vrot.slane %v5259_v29, 1 }
  0xeb   : > { %5709 = vmatpush3.bf16.msra.mxu1 %v6649_v43  ;;  %v6672_v43 = vld [vmem:[%s8829_s1 + $0x370] sm:$0xff]  }
  0xec   : > { %5740 = vmatprep.subr.bf16.mxu1 %v6654_v27  ;;  %v2315_v27 = vshrl.u32 %v7084_v4, 16 }
  0xee   : > { %2121 = vmatmul.mubr.bf16.gmra.mrb[96].mxu1 %v1837_v32  ;;  %v2318_v32 = vshll.u32 %v7084_v4, 16  ;;  %v6676_v4 = vld [vmem:[%s8829_s1 + $0x378] sm:$0xff]  }
  0xef   : > { %2161 = vmatprep.mubr.bf16.mxu1 %v1811_v50 }
  0xf0   : > { %v2320_v7 = vrot.slane %v2318_v32, 2  ;;  %v2406_v32 = vshll.u32 %v7143_v57, 16 }
  0xf2   : > { %v2408_v61 = vrot.slane %v2406_v32, 2 }
  0xf6   : > { %2162 = vmatmul.mubr.bf16.vlgmr.msra.gmra.mrb[100].mxu1 %v1808_v2 }
  0xf7   : > { %5741 = vmatpush3.bf16.msra.mxu1 %v6655_v37  ;;  %2169 = vmatprep.mubr.bf16.mxu1 %v1819_v58  ;;  %v1833_v37 = vsel %vm1799_vm1, %v1824_v14, %v1832_v39  ;;  %v6674_v58 = vld [vmem:[%s8829_s1 + $0x330] sm:$0xff]  }
  0xf8   : > { %5742 = vmatprep.subr.bf16.mxu1 %v6656_v53  ;;  %v1843_v53 = vsel %vm1799_vm1, %v1834_v24, %v1842_v12  ;;  %v2370_v24 = vshll.u32 %v7115_v34, 16 }
  0xfb   : > { %5743 = vmatpush3.bf16.msra.mxu1 %v6657_v6  ;;  %v2317_v6 = vrot.slane %v2315_v27, 1  ;;  %v2403_v27 = vshrl.u32 %v7143_v57, 16 }
  0xfc   : > { %5744 = vmatprep.subr.bf16.mxu1 %v6660_v8 }
  0xfd   : > { %v2321_v14 = vor.u32 %v2320_v7, %v2317_v6  ;;  %v2405_v59 = vrot.slane %v2403_v27, 1  ;;  %v2394_v7 = vshrl.u32 %v7152_v5, 16 }
  0xfe   : > { %2170 = vmatmul.mubr.bf16.gmra.mrb[104].mxu1 %v1817_v55  ;;  %v6677_v55 = vld [vmem:[%s8829_s1 + $0x338] sm:$0xff]  }
  0xff   : > { %5745 = vmatpush3.bf16.msra.mxu1 %v6661_v16  ;;  %2177 = vmatprep.mubr.bf16.mxu1 %v1827_v18  ;;  %v2293_v16 = vshll.u32 %v7345_v31, 16  ;;  %v2298_v18 = vshrl.u32 %v7080_v3, 16  ;;  %v1841_v31 = vsel %vm1799_vm1, %v1832_v39, %v1840_v30  ;;  %v2397_v30 = vshll.u32 %v7152_v5, 16 }
 0x100   : > { %5746 = vmatprep.subr.bf16.mxu1 %v6663_v20  ;;  %v2301_v20 = vshll.u32 %v7080_v3, 16 }
 0x101   : > { %v5480_v25 = vpop.f32.mrb[0].mxu1 }
 0x102   : > { %v5481_v26 = vpop.f32.mrb[1].mxu1  ;;  %v2303_v29 = vrot.slane %v2301_v20, 2  ;;  %v2439_v20 = vshrl.u32 %v7378_v13, 16 }
 0x103   : > { %v7476_v42 = vadd.f32 %v5481_v26, %v5480_v25  ;;  %v5483_v46 = vpop.f32.mrb[2].mxu1  ;;  %5747 = vmatpush3.bf16.msra.mxu1 %v6665_v15  ;;  %v6678_v15 = vld [vmem:[%s8829_s1 + $0x3c0] sm:$0xff]   ;;  %v2292_v26 = vrot.slane %v2290_v38, 1  ;;  %v6681_v38 = vld [vmem:[%s8829_s1 + $0x388] sm:$0xff]  }
 0x104   : > { %v5484_v10 = vpop.f32.mrb[3].mxu1  ;;  %5748 = vmatprep.subr.bf16.mxu1 %v6666_v23  ;;  %v2367_v23 = vshrl.u32 %v7115_v34, 16 }
 0x105   : > { %v7488_v45 = vadd.f32 %v5484_v10, %v5483_v46 }
 0x106   : > { %2178 = vmatmul.mubr.bf16.gmra.mrb[108].mxu1 %v1825_v28  ;;  %v2295_v28 = vrot.slane %v2293_v16, 2  ;;  %v6682_v16 = vld [vmem:[%s8829_s1 + $0x3d0] sm:$0xff]  }
 0x107   : > { %5749 = vmatpush3.bf16.msra.mxu1 %v6667_v60  ;;  %2185 = vmatprep.mubr.bf16.mxu1 %v1835_v36  ;;  %v2300_v60 = vrot.slane %v2298_v18, 1  ;;  %v2322_v36 = vsel %vm2288_vm2, %v2313_v63, %v2321_v14  ;;  %v2409_v18 = vor.u32 %v2408_v61, %v2405_v59  ;;  %v2442_v63 = vshll.u32 %v7378_v13, 16  ;;  %v6688_v61 = vld [vmem:[%s8829_s1 + $0x3e8] sm:$0xff]  }
 0x108   : > { %5750 = vmatprep.subr.bf16.mxu1 %v6670_v54  ;;  %v2369_v54 = vrot.slane %v2367_v23, 1  ;;  %v2296_v12 = vor.u32 %v2295_v28, %v2292_v26  ;;  %v2396_v23 = vrot.slane %v2394_v7, 1  ;;  %v6683_v26 = vld [vmem:[%s8829_s1 + $0x390] sm:$0xff]  }
 0x109   : > { %v5486_v50 = vpop.f32.mrb[4].mxu1  ;;  %v2304_v39 = vor.u32 %v2303_v29, %v2300_v60  ;;  %v6684_v60 = vld [vmem:[%s8829_s1 + $0x3d8] sm:$0xff]   ;;  %v2441_v29 = vrot.slane %v2439_v20, 1 }
 0x10a   : > { %v5487_v51 = vpop.f32.mrb[5].mxu1 }
 0x10b   : > { %v7501_v56 = vadd.f32 %v5487_v51, %v5486_v50  ;;  %v5489_v2 = vpop.f32.mrb[6].mxu1  ;;  %5751 = vmatpush3.bf16.msra.mxu1 %v6671_v41  ;;  %v2372_v41 = vrot.slane %v2370_v24, 2  ;;  %v2399_v24 = vrot.slane %v2397_v30, 2 }
 0x10c   : > { %v5490_v48 = vpop.f32.mrb[7].mxu1  ;;  %5752 = vmatprep.subr.bf16.mxu1 %v6672_v43  ;;  %v2358_v43 = vshrl.u32 %v7122_v40, 16  ;;  %v6680_v40 = vld [vmem:[%s8829_s1 + $0x3c8] sm:$0xff]  }
 0x10d   : > { %v7511_v8 = vadd.f32 %v5490_v48, %v5489_v2  ;;  %v2373_v47 = vor.u32 %v2372_v41, %v2369_v54  ;;  %v2363_v48 = vrot.slane %v2361_v44, 2  ;;  %v2400_v54 = vor.u32 %v2399_v24, %v2396_v23 }
 0x10e   : > { %2186 = vmatmul.mubr.bf16.gmra.mrb[112].mxu1 %v1833_v37  ;;  %v2305_v37 = vsel %vm2288_vm2, %v2296_v12, %v2304_v39  ;;  %v2430_v41 = vshrl.u32 %v7393_v33, 16  ;;  %v2433_v12 = vshll.u32 %v7393_v33, 16 }
 0x10f   : > { %2193 = vmatprep.mubr.bf16.mxu1 %v1843_v53  ;;  %5753 = vmatpush3.bf16.msra.mxu1 %v6674_v58  ;;  %v6679_v53 = vld [vmem:[%s8829_s1 + $0x380] sm:$0xff]   ;;  %v2360_v58 = vrot.slane %v2358_v43, 1  ;;  %v2374_v57 = vsel %vm2288_vm2, %v2321_v14, %v2373_v47  ;;  %v2212_v14 = vld [vmem:[%s6900_s26 + $0xb0] sm:$0x33]  ;;  %v2410_v13 = vsel %vm2288_vm2, %v2373_v47, %v2409_v18 }
 0x110   : > { %5754 = vmatprep.subr.bf16.mxu1 %v6676_v4  ;;  %v6686_v47 = vld [vmem:[%s8829_s1 + $0x3e0] sm:$0xff]   ;;  %v2435_v33 = vrot.slane %v2433_v12, 2 }
 0x111   : > { %v5492_v19 = vpop.f32.mrb[8].mxu1 }
 0x112   : > { %v5493_v25 = vpop.f32.mrb[9].mxu1 }
 0x113   : > { %v7526_v46 = vadd.f32 %v5493_v25, %v5492_v19  ;;  %v5495_v3 = vpop.f32.mrb[10].mxu1  ;;  %5755 = vmatpush3.bf16.msra.mxu1 %v6677_v55  ;;  %v2364_v55 = vor.u32 %v2363_v48, %v2360_v58  ;;  %v6687_v58 = vld [vmem:[%s8829_s1 + $0x3a0] sm:$0xff]  }
 0x114   : > { %v5496_v10 = vpop.f32.mrb[11].mxu1  ;;  %5786 = vmatprep.subr.bf16.mxu1 %v6678_v15 }
 0x115   : > { %v7529_v34 = vadd.f32 %v5496_v10, %v5495_v3  ;;  %v5293_v3 = vcombine.high %v2212_v14, %v2212_v14  ;;  %v2444_v10 = vrot.slane %v2442_v63, 2 }
 0x116   : > { %2194 = vmatmul.mubr.bf16.gmra.mrb[116].mxu1 %v1841_v31  ;;  %v2365_v31 = vsel %vm2288_vm2, %v2304_v39, %v2364_v55  ;;  %v6685_v39 = vld [vmem:[%s8829_s1 + $0x398] sm:$0xff]  }
 0x117   : > { %2745 = vmatprep.mubr.bf16.mxu1 %v2322_v36  ;;  %v2475_v43 = vshrl.u32 %v5293_v3, 16  ;;  %v2478_v44 = vshll.u32 %v5293_v3, 16  ;;  %v2445_v27 = vor.u32 %v2444_v10, %v2441_v29 }
 0x119   : > { %v5498_v50 = vpop.f32.mrb[12].mxu1  ;;  %v2477_v48 = vrot.slane %v2475_v43, 1  ;;  %v2446_v59 = vsel %vm2288_vm2, %v2409_v18, %v2445_v27  ;;  %v2324_v43 = vshrl.u32 %v7427_v49, 16 }
 0x11a   : > { %v5499_v51 = vpop.f32.mrb[13].mxu1 }
 0x11b   : > { %v7535_v52 = vadd.f32 %v5499_v51, %v5498_v50  ;;  %v5501_v2 = vpop.f32.mrb[14].mxu1  ;;  %v2401_v51 = vsel %vm2288_vm2, %v2364_v55, %v2400_v54 }
 0x11c   : > { %v5502_v4 = vpop.f32.mrb[15].mxu1 }
 0x11d   : > { %v7545_v6 = vadd.f32 %v5502_v4, %v5501_v2  ;;  %v2432_v2 = vrot.slane %v2430_v41, 1  ;;  %v2480_v4 = vrot.slane %v2478_v44, 2  ;;  %v2327_v44 = vshll.u32 %v7427_v49, 16 }
 0x11e   : > { %2746 = vmatmul.mubr.bf16.vlgmr.msra.gmra.mrb[120].mxu1 %v2305_v37  ;;  %v2388_v49 = vshll.u32 %v7219_v35, 16 }
 0x11f   : > { %5787 = vmatpush3.bf16.msra.mxu1 %v6679_v53  ;;  %2753 = vmatprep.mubr.bf16.mxu1 %v2374_v57  ;;  %v2481_v18 = vor.u32 %v2480_v4, %v2477_v48 }
 0x120   : > { %5788 = vmatprep.subr.bf16.mxu1 %v6680_v40  ;;  %v5292_v40 = vcombine.low %v2212_v14, %v2212_v14  ;;  %v2341_v14 = vshrl.u32 %v7416_v1, 16 }
 0x121   : > { %v5504_v15 = vpop.f32.mrb[16].mxu1  ;;  %v2482_v3 = vsel %vm2288_vm2, %v2445_v27, %v2481_v18 }
 0x122   : > { %v5505_v5 = vpop.f32.mrb[17].mxu1  ;;  %v2466_v20 = vshrl.u32 %v5292_v40, 16  ;;  %v2469_v63 = vshll.u32 %v5292_v40, 16  ;;  %v2343_v29 = vrot.slane %v2341_v14, 1  ;;  %v2379_v14 = vshll.u32 %v7223_v62, 16 }
 0x123   : > { %v7558_v19 = vadd.f32 %v5505_v5, %v5504_v15  ;;  %v5507_v25 = vpop.f32.mrb[18].mxu1  ;;  %5789 = vmatpush3.bf16.msra.mxu1 %v6681_v38  ;;  %v2436_v38 = vor.u32 %v2435_v33, %v2432_v2  ;;  %v2344_v15 = vshll.u32 %v7416_v1, 16  ;;  %v2352_v5 = vshll.u32 %v7207_v11, 16 }
 0x124   : > { %v5508_v28 = vpop.f32.mrb[19].mxu1  ;;  %5790 = vmatprep.subr.bf16.mxu1 %v6682_v16  ;;  %v6689_v16 = vld [vmem:[%s8829_s1 + $0x3a8] sm:$0xff]   ;;  %v2385_v33 = vshrl.u32 %v7219_v35, 16 }
 0x125   : > { %v7568_v36 = vadd.f32 %v5508_v28, %v5507_v25  ;;  %v2437_v25 = vsel %vm2288_vm2, %v2400_v54, %v2436_v38  ;;  %v6692_v28 = vld [vmem:[%s8829_s1 + $0x3b0] sm:$0xff]   ;;  %v2346_v10 = vrot.slane %v2344_v15, 2  ;;  %v2354_v41 = vrot.slane %v2352_v5, 2 }
 0x126   : > { %2754 = vmatmul.mubr.bf16.gmra.mrb[124].mxu1 %v2365_v31  ;;  %v2424_v5 = vshll.u32 %v7443_v22, 16 }
 0x127   : > { %5791 = vmatpush3.bf16.msra.mxu1 %v6683_v26  ;;  %2761 = vmatprep.mubr.bf16.mxu1 %v2410_v13  ;;  %v2468_v13 = vrot.slane %v2466_v20, 1 }
 0x128   : > { %5792 = vmatprep.subr.bf16.mxu1 %v6684_v60  ;;  %v2471_v60 = vrot.slane %v2469_v63, 2 }
 0x129   : > { %v5526_v32 = vpop.f32.mrb[20].mxu1 }
 0x12a   : > { %v5527_v50 = vpop.f32.mrb[21].mxu1  ;;  %v2472_v27 = vor.u32 %v2471_v60, %v2468_v13  ;;  %v2426_v60 = vrot.slane %v2424_v5, 2 }
 0x12b   : > { %v5528_v37 = vadd.f32 %v5527_v50, %v5526_v32  ;;  %v5529_v53 = vpop.f32.mrb[22].mxu1  ;;  %5793 = vmatpush3.bf16.msra.mxu1 %v6685_v39  ;;  %v6695_v32 = vld [vmem:[%s8829_s1 + $0x3b8] sm:$0xff]   ;;  %v2332_v50 = vshrl.u32 %v7203_v9, 16 }
 0x12c   : > { %v5530_v57 = vpop.f32.mrb[23].mxu1  ;;  %5794 = vmatprep.subr.bf16.mxu1 %v6686_v47  ;;  %v2473_v40 = vsel %vm2288_vm2, %v2436_v38, %v2472_v27  ;;  %v2376_v38 = vshrl.u32 %v7223_v62, 16 }
 0x12d   : > { %v7587_v7 = vadd.f32 %v5528_v37, %v7476_v42  ;;  %v5531_v30 = vadd.f32 %v5530_v57, %v5529_v53  ;;  %v6690_v42 = vld [vmem:[%s8829_s1 + $0x3f0] sm:$0xff]   ;;  %v2326_v53 = vrot.slane %v2324_v43, 1  ;;  %v2334_v57 = vrot.slane %v2332_v50, 1 }
 0x12e   : > { %2762 = vmatmul.mubr.bf16.gmra.mrb[128].mxu1 %v2401_v51  ;;  %v2347_v51 = vor.u32 %v2346_v10, %v2343_v29 }
 0x12f   : > { %v7590_v55 = vadd.f32 %v5531_v30, %v7488_v45  ;;  %5795 = vmatpush3.bf16.msra.mxu1 %v6687_v58  ;;  %2769 = vmatprep.mubr.bf16.mxu1 %v2446_v59  ;;  %v2349_v45 = vshrl.u32 %v7207_v11, 16  ;;  %v6694_v11 = vld [vmem:[%s8829_s1 + $0x3f8] sm:$0xff]   ;;  %v2329_v58 = vrot.slane %v2327_v44, 2  ;;  %v2387_v30 = vrot.slane %v2385_v33, 1 }
 0x130   : > { %5796 = vmatprep.subr.bf16.mxu1 %v6688_v61  ;;  %v2213_v44 = vld [vmem:[%s6900_s26 + $0xb8] sm:$0x33] }
 0x131   : > { %v5532_v23 = vpop.f32.mrb[24].mxu1  ;;  %v2351_v54 = vrot.slane %v2349_v45, 1  ;;  %v2330_v20 = vor.u32 %v2329_v58, %v2326_v53  ;;  %v2421_v45 = vshrl.u32 %v7443_v22, 16  ;;  %v2412_v22 = vshrl.u32 %v7458_v17, 16 }
 0x132   : > { %v5533_v24 = vpop.f32.mrb[25].mxu1  ;;  %v2448_v58 = vshrl.u32 %v7482_v0, 16 }
 0x133   : > { %v5534_v31 = vadd.f32 %v5533_v24, %v5532_v23  ;;  %v5535_v26 = vpop.f32.mrb[26].mxu1  ;;  %5797 = vmatpush3.bf16.msra.mxu1 %v6689_v16  ;;  %v2355_v2 = vor.u32 %v2354_v41, %v2351_v54  ;;  %v2390_v16 = vrot.slane %v2388_v49, 2  ;;  %v2423_v13 = vrot.slane %v2421_v45, 1 }
 0x134   : > { %v5536_v1 = vpop.f32.mrb[27].mxu1  ;;  %5798 = vmatprep.subr.bf16.mxu1 %v6690_v42  ;;  %v2457_v41 = vshrl.u32 %v7465_v21, 16  ;;  %v2414_v27 = vrot.slane %v2412_v22, 1  ;;  %v5295_v49 = vcombine.high %v2213_v44, %v2213_v44 }
 0x135   : > { %v7611_v12 = vadd.f32 %v5534_v31, %v7501_v56  ;;  %v5537_v39 = vadd.f32 %v5536_v1, %v5535_v26  ;;  %v2335_v56 = vshll.u32 %v7203_v9, 16  ;;  %v2356_v9 = vsel %vm2288_vm2, %v2347_v51, %v2355_v2 }
 0x136   : > { %2770 = vmatmul.mubr.bf16.gmra.mrb[132].mxu1 %v2437_v25  ;;  %v2391_v15 = vor.u32 %v2390_v16, %v2387_v30  ;;  %v2378_v26 = vrot.slane %v2376_v38, 1  ;;  %v2427_v54 = vor.u32 %v2426_v60, %v2423_v13  ;;  %v2450_v16 = vrot.slane %v2448_v58, 1 }
 0x137   : > { %v7616_v47 = vadd.f32 %v5537_v39, %v7511_v8  ;;  %2777 = vmatprep.mubr.bf16.mxu1 %v2482_v3  ;;  %5799 = vmatpush3.bf16.msra.mxu1 %v6692_v28  ;;  %v2337_v59 = vrot.slane %v2335_v56, 2  ;;  %v2460_v39 = vshll.u32 %v7465_v21, 16 }
 0x138   : > { %5800 = vmatprep.subr.bf16.mxu1 %v6694_v11  ;;  %v2392_v28 = vsel %vm2288_vm2, %v2355_v2, %v2391_v15  ;;  %v2415_v11 = vshll.u32 %v7458_v17, 16  ;;  %v2459_v2 = vrot.slane %v2457_v41, 1 }
 0x139   : > { %v5538_v8 = vpop.f32.mrb[28].mxu1  ;;  %v2338_v42 = vor.u32 %v2337_v59, %v2334_v57  ;;  %v2462_v33 = vrot.slane %v2460_v39, 2  ;;  %v2496_v57 = vshll.u32 %v5295_v49, 16 }
 0x13a   : > { %v5539_v37 = vpop.f32.mrb[29].mxu1 }
 0x13b   : > { %v5540_v48 = vadd.f32 %v5539_v37, %v5538_v8  ;;  %v5541_v4 = vpop.f32.mrb[30].mxu1  ;;  %5801 = vmatpush3.bf16.msra.mxu1 %v6695_v32  ;;  %v2339_v31 = vsel %vm2288_vm2, %v2330_v20, %v2338_v42  ;;  %v2417_v32 = vrot.slane %v2415_v11, 2  ;;  %v5294_v20 = vcombine.low %v2213_v44, %v2213_v44 }
 0x13c   : > { %v5542_v61 = vpop.f32.mrb[31].mxu1 }
 0x13d   : > { %v7628_v18 = vadd.f32 %v5540_v48, %v7526_v46  ;;  %v5543_v35 = vadd.f32 %v5542_v61, %v5541_v4  ;;  %v2418_v21 = vor.u32 %v2417_v32, %v2414_v27  ;;  %v2451_v48 = vshll.u32 %v7482_v0, 16 }
 0x13e   : > { %2778 = vmatmul.mubr.bf16.gmra.mrb[136].mxu1 %v2473_v40  ;;  %v2463_v4 = vor.u32 %v2462_v33, %v2459_v2  ;;  %v2493_v40 = vshrl.u32 %v5295_v49, 16 }
 0x13f   : > { %v7631_v63 = vadd.f32 %v5543_v35, %v7529_v34  ;;  %2818 = vmatprep.mubr.bf16.mxu1 %v2356_v9  ;;  %v2381_v34 = vrot.slane %v2379_v14, 2  ;;  %v2453_v35 = vrot.slane %v2451_v48, 2  ;;  %v2498_v14 = vrot.slane %v2496_v57, 2 }
 0x140   : > { %v2495_v38 = vrot.slane %v2493_v40, 1 }
 0x141   : > { %v5544_v23 = vpop.f32.mrb[32].mxu1  ;;  %v2382_v10 = vor.u32 %v2381_v34, %v2378_v26  ;;  %v2454_v5 = vor.u32 %v2453_v35, %v2450_v16 }
 0x142   : > { %v5545_v46 = vpop.f32.mrb[33].mxu1 }
 0x143   : > { %v5546_v24 = vadd.f32 %v5545_v46, %v5544_v23  ;;  %v5547_v25 = vpop.f32.mrb[34].mxu1  ;;  %v2383_v51 = vsel %vm2288_vm2, %v2338_v42, %v2382_v10  ;;  %v2419_v9 = vsel %vm2288_vm2, %v2382_v10, %v2418_v21  ;;  %v2484_v23 = vshrl.u32 %v5294_v20, 16 }
 0x144   : > { %v5548_v3 = vpop.f32.mrb[35].mxu1  ;;  %v2487_v46 = vshll.u32 %v5294_v20, 16 }
 0x145   : > { %v7640_v62 = vadd.f32 %v5546_v24, %v7535_v52  ;;  %v5549_v1 = vadd.f32 %v5548_v3, %v5547_v25  ;;  %v2499_v24 = vor.u32 %v2498_v14, %v2495_v38  ;;  %v2455_v3 = vsel %vm2288_vm2, %v2418_v21, %v2454_v5 }
 0x146   : > { %2819 = vmatmul.mubr.bf16.vlgmr.msra.gmra.mrb[140].mxu1 %v2339_v31  ;;  %v2489_v13 = vrot.slane %v2487_v46, 2 }
 0x147   : > { %v7645_v29 = vadd.f32 %v5549_v1, %v7545_v6  ;;  %2826 = vmatprep.mubr.bf16.mxu1 %v2392_v28  ;;  %v2428_v6 = vsel %vm2288_vm2, %v2391_v15, %v2427_v54  ;;  %v2486_v28 = vrot.slane %v2484_v23, 1 }
 0x149   : > { %v5550_v43 = vpop.f32.mrb[36].mxu1  ;;  %v2490_v11 = vor.u32 %v2489_v13, %v2486_v28 }
 0x14a   : > { %v5551_v52 = vpop.f32.mrb[37].mxu1 }
 0x14b   : > { %v5552_v50 = vadd.f32 %v5551_v52, %v5550_v43  ;;  %v5553_v56 = vpop.f32.mrb[38].mxu1  ;;  %v2491_v43 = vsel %vm2288_vm2, %v2454_v5, %v2490_v11 }
 0x14c   : > { %v5554_v17 = vpop.f32.mrb[39].mxu1 }
 0x14d   : > { %v7653_v8 = vadd.f32 %v5552_v50, %v7558_v19  ;;  %v5555_v37 = vadd.f32 %v5554_v17, %v5553_v56 }
 0x14e   : > { %2827 = vmatmul.mubr.bf16.gmra.mrb[144].mxu1 %v2383_v51 }
 0x14f   : > { %v7656_v53 = vadd.f32 %v5555_v37, %v7568_v36  ;;  %2834 = vmatprep.mubr.bf16.mxu1 %v2428_v6  ;;  %v2464_v36 = vsel %vm2288_vm2, %v2427_v54, %v2463_v4 }
 0x151   : > { %v5572_v59 = vpop.f32.mrb[40].mxu1 }
 0x152   : > { %v5573_v61 = vpop.f32.mrb[41].mxu1 }
 0x153   : > { %v5574_v19 = vadd.f32 %v5573_v61, %v5572_v59  ;;  %v5575_v30 = vpop.f32.mrb[42].mxu1 }
 0x154   : > { %v5576_v42 = vpop.f32.mrb[43].mxu1 }
 0x155   : > { %v1512_v15 = vadd.f32 %v5574_v19, %v7587_v7  ;;  %v5577_v0 = vadd.f32 %v5576_v42, %v5575_v30  ;;  %v2500_v7 = vsel %vm2288_vm2, %v2463_v4, %v2499_v24 }
 0x156   : > { %2835 = vmatmul.mubr.bf16.gmra.mrb[148].mxu1 %v2419_v9 }
 0x157   : > { %v1515_v45 = vadd.f32 %v5577_v0, %v7590_v55  ;;  %2842 = vmatprep.mubr.bf16.mxu1 %v2464_v36 }
 0x159   : > { %v5578_v25 = vpop.f32.mrb[44].mxu1 }
 0x15a   : > { %v5579_v31 = vpop.f32.mrb[45].mxu1 }
 0x15b   : > { %v5580_v26 = vadd.f32 %v5579_v31, %v5578_v25  ;;  %v5581_v34 = vpop.f32.mrb[46].mxu1 }
 0x15c   : > { %v5582_v60 = vpop.f32.mrb[47].mxu1 }
 0x15d   : > { %v1520_v1 = vadd.f32 %v5580_v26, %v7611_v12  ;;  %v5583_v22 = vadd.f32 %v5582_v60, %v5581_v34 }
 0x15e   : > { %2843 = vmatmul.mubr.bf16.gmra.mrb[152].mxu1 %v2455_v3 }
 0x15f   : > { %v1523_v55 = vadd.f32 %v5583_v22, %v7616_v47  ;;  %2850 = vmatprep.mubr.bf16.mxu1 %v2500_v7 }
 0x161   : > { %v5584_v10 = vpop.f32.mrb[48].mxu1 }
 0x162   : > { %v5585_v54 = vpop.f32.mrb[49].mxu1 }
 0x163   : > { %v5586_v41 = vadd.f32 %v5585_v54, %v5584_v10  ;;  %v5587_v39 = vpop.f32.mrb[50].mxu1 }
 0x164   : > { %v5588_v44 = vpop.f32.mrb[51].mxu1 }
 0x165   : > { %v1528_v52 = vadd.f32 %v5586_v41, %v7628_v18  ;;  %v5589_v27 = vadd.f32 %v5588_v44, %v5587_v39 }
 0x166   : > { %2851 = vmatmul.mubr.bf16.gmra.mrb[156].mxu1 %v2491_v43 }
 0x167   : > { %v1531_v32 = vadd.f32 %v5589_v27, %v7631_v63 }
 0x169   : > { %v5590_v12 = vpop.f32.mrb[52].mxu1 }
 0x16a   : > { %v5591_v50 = vpop.f32.mrb[53].mxu1 }
 0x16b   : > { %v5592_v56 = vadd.f32 %v5591_v50, %v5590_v12  ;;  %v5593_v51 = vpop.f32.mrb[54].mxu1 }
 0x16c   : > { %v5594_v47 = vpop.f32.mrb[55].mxu1 }
 0x16d   : > { %v1536_v17 = vadd.f32 %v5592_v56, %v7640_v62  ;;  %v5595_v6 = vadd.f32 %v5594_v47, %v5593_v51 }
 0x16f   : > { %v1539_v2 = vadd.f32 %v5595_v6, %v7645_v29 }
 0x171   : > { %v5596_v33 = vpop.f32.mrb[56].mxu1 }
 0x172   : > { %v5597_v49 = vpop.f32.mrb[57].mxu1 }
 0x173   : > { %v5598_v37 = vadd.f32 %v5597_v49, %v5596_v33  ;;  %v5599_v21 = vpop.f32.mrb[58].mxu1 }
 0x174   : > { %v5600_v58 = vpop.f32.mrb[59].mxu1 }
 0x175   : > { %v1544_v18 = vadd.f32 %v5598_v37, %v7653_v8  ;;  %v5601_v48 = vadd.f32 %v5600_v58, %v5599_v21 }
 0x177   : > { %v1547_v63 = vadd.f32 %v5601_v48, %v7656_v53 }
 0x179   : > { %v5618_v4 = vpop.f32.mrb[60].mxu1 }
 0x17a   : > { %v5619_v40 = vpop.f32.mrb[61].mxu1 }
 0x17b   : > { %v5620_v57 = vadd.f32 %v5619_v40, %v5618_v4  ;;  %v5621_v59 = vpop.f32.mrb[62].mxu1 }
 0x17c   : > { %v5622_v61 = vpop.f32.mrb[63].mxu1 }
 0x17d   : > { %v7675_v9 = vadd.f32 %v5620_v57, %v1512_v15  ;;  %v5623_v62 = vadd.f32 %v5622_v61, %v5621_v59 }
 0x17f   : > { %v7677_v19 = vadd.f32 %v5623_v62, %v1515_v45 }
 0x181   : > { %v5624_v29 = vpop.f32.mrb[64].mxu1 }
 0x182   : > { %v5625_v30 = vpop.f32.mrb[65].mxu1 }
 0x183   : > { %v5626_v16 = vadd.f32 %v5625_v30, %v5624_v29  ;;  %v5627_v35 = vpop.f32.mrb[66].mxu1 }
 0x184   : > { %v5628_v20 = vpop.f32.mrb[67].mxu1 }
 0x185   : > { %v7679_v42 = vadd.f32 %v5626_v16, %v1520_v1  ;;  %v5629_v8 = vadd.f32 %v5628_v20, %v5627_v35 }
 0x187   : > { %v7681_v36 = vadd.f32 %v5629_v8, %v1523_v55 }
 0x189   : > { %v5630_v53 = vpop.f32.mrb[68].mxu1 }
 0x18a   : > { %v5631_v38 = vpop.f32.mrb[69].mxu1 }
 0x18b   : > { %v5632_v14 = vadd.f32 %v5631_v38, %v5630_v53  ;;  %v5633_v0 = vpop.f32.mrb[70].mxu1 }
 0x18c   : > { %v5634_v5 = vpop.f32.mrb[71].mxu1 }
 0x18d   : > { %v7683_v15 = vadd.f32 %v5632_v14, %v1528_v52  ;;  %v5635_v23 = vadd.f32 %v5634_v5, %v5633_v0 }
 0x18f   : > { %v7685_v45 = vadd.f32 %v5635_v23, %v1531_v32 }
 0x191   : > { %v5636_v46 = vpop.f32.mrb[72].mxu1 }
 0x192   : > { %v5637_v24 = vpop.f32.mrb[73].mxu1 }
 0x193   : > { %v5638_v25 = vadd.f32 %v5637_v24, %v5636_v46  ;;  %v5639_v31 = vpop.f32.mrb[74].mxu1 }
 0x194   : > { %v5640_v26 = vpop.f32.mrb[75].mxu1 }
 0x195   : > { %v7687_v34 = vadd.f32 %v5638_v25, %v1536_v17  ;;  %v5641_v3 = vadd.f32 %v5640_v26, %v5639_v31 }
 0x197   : > { %v7689_v28 = vadd.f32 %v5641_v3, %v1539_v2 }
 0x199   : > { %v5642_v13 = vpop.f32.mrb[76].mxu1 }
 0x19a   : > { %v5643_v60 = vpop.f32.mrb[77].mxu1 }
 0x19b   : > { %v5644_v7 = vadd.f32 %v5643_v60, %v5642_v13  ;;  %v5645_v1 = vpop.f32.mrb[78].mxu1 }
 0x19c   : > { %v5646_v22 = vpop.f32.mrb[79].mxu1 }
 0x19d   : > { %v7691_v55 = vadd.f32 %v5644_v7, %v1544_v18  ;;  %v5647_v11 = vadd.f32 %v5646_v22, %v5645_v1 }
 0x19f   : > { %v7693_v10 = vadd.f32 %v5647_v11, %v1547_v63 }
 0x1a1   : > { %v5664_v54 = vpop.f32.mrb[80].mxu1 }
 0x1a2   : > { %v5665_v41 = vpop.f32.mrb[81].mxu1 }
 0x1a3   : > { %v5666_v39 = vadd.f32 %v5665_v41, %v5664_v54  ;;  %v5667_v43 = vpop.f32.mrb[82].mxu1 }
 0x1a4   : > { %v5668_v44 = vpop.f32.mrb[83].mxu1 }
 0x1a5   : > { %v5669_v52 = vadd.f32 %v5668_v44, %v5667_v43 }
 0x1a9   : > { %v5670_v27 = vpop.f32.mrb[84].mxu1 }
 0x1aa   : > { %v5671_v32 = vpop.f32.mrb[85].mxu1 }
 0x1ab   : > { %v5672_v12 = vadd.f32 %v5671_v32, %v5670_v27  ;;  %v5673_v50 = vpop.f32.mrb[86].mxu1 }
 0x1ac   : > { %v5674_v56 = vpop.f32.mrb[87].mxu1 }
 0x1ad   : > { %v5675_v51 = vadd.f32 %v5674_v56, %v5673_v50 }
 0x1b1   : > { %v5676_v47 = vpop.f32.mrb[88].mxu1 }
 0x1b2   : > { %v5677_v17 = vpop.f32.mrb[89].mxu1 }
 0x1b3   : > { %v5678_v6 = vadd.f32 %v5677_v17, %v5676_v47  ;;  %v5679_v2 = vpop.f32.mrb[90].mxu1 }
 0x1b4   : > { %v5680_v33 = vpop.f32.mrb[91].mxu1 }
 0x1b5   : > { %v5681_v49 = vadd.f32 %v5680_v33, %v5679_v2 }
 0x1b9   : > { %v5682_v37 = vpop.f32.mrb[92].mxu1 }
 0x1ba   : > { %v5683_v21 = vpop.f32.mrb[93].mxu1 }
 0x1bb   : > { %v5684_v58 = vadd.f32 %v5683_v21, %v5682_v37  ;;  %v5685_v18 = vpop.f32.mrb[94].mxu1 }
 0x1bc   : > { %v5686_v48 = vpop.f32.mrb[95].mxu1 }
 0x1bd   : > { %v5687_v63 = vadd.f32 %v5686_v48, %v5685_v18 }
 0x1c1   : > { %v5688_v4 = vpop.f32.mrb[96].mxu1 }
 0x1c2   : > { %v5689_v40 = vpop.f32.mrb[97].mxu1 }
 0x1c3   : > { %v5690_v57 = vadd.f32 %v5689_v40, %v5688_v4  ;;  %v5691_v59 = vpop.f32.mrb[98].mxu1  ;;  %v309_v40 = vlaneseq }
 0x1c4   : > { %v5692_v61 = vpop.f32.mrb[99].mxu1 }
 0x1c5   : > { %v5693_v62 = vadd.f32 %v5692_v61, %v5691_v59  ;;  %v7738_v59 = vshrl.u32 %v309_v40, 7 }
 0x1c9   : > { %v5710_v29 = vpop.f32.mrb[100].mxu1 }
 0x1ca   : > { %v5711_v30 = vpop.f32.mrb[101].mxu1 }
 0x1cb   : > { %v5712_v16 = vadd.f32 %v5711_v30, %v5710_v29  ;;  %v5713_v35 = vpop.f32.mrb[102].mxu1 }
 0x1cc   : > { %v5714_v20 = vpop.f32.mrb[103].mxu1 }
 0x1cd   : > { %v2164_v8 = vadd.f32 %v5712_v16, %v5666_v39  ;;  %v5715_v53 = vadd.f32 %v5714_v20, %v5713_v35  ;;  %v6700_v16 = vld [vmem:[%s8830_s2 + $0x50] sm:$0xff]   ;;  %v311_v20 = vadd.s32 8, %v7738_v59 }
 0x1cf   : > { %v7696_v38 = vadd.f32 %v2164_v8, %v7675_v9  ;;  %v2167_v14 = vadd.f32 %v5715_v53, %v5669_v52  ;;  %v6701_v8 = vld [vmem:[%s8830_s2 + $0x58] sm:$0xff]  }
 0x1d1   : > { %v7699_v0 = vadd.f32 %v2167_v14, %v7677_v19  ;;  %v5716_v5 = vpop.f32.mrb[104].mxu1 }
 0x1d2   : > { %v5717_v23 = vpop.f32.mrb[105].mxu1 }
 0x1d3   : > { %v5718_v46 = vadd.f32 %v5717_v23, %v5716_v5  ;;  %v5719_v24 = vpop.f32.mrb[106].mxu1  ;;  %v7754_v14 = vmul.u32.u64.low 3435973837, %v7738_v59  ;;  %v7755_v5 = vmul.u32.u64.high 3435973837, %v7738_v59, %v7754_v14 }
 0x1d4   : > { %v5720_v25 = vpop.f32.mrb[107].mxu1 }
 0x1d5   : > { %v2172_v31 = vadd.f32 %v5718_v46, %v5672_v12  ;;  %v5721_v26 = vadd.f32 %v5720_v25, %v5719_v24  ;;  %v7757_v23 = vmul.u32.u64.low 3435973837, %v311_v20  ;;  %v7758_v46 = vmul.u32.u64.high 3435973837, %v311_v20, %v7757_v23 }
 0x1d7   : > { %v7702_v3 = vadd.f32 %v2172_v31, %v7679_v42  ;;  %v2175_v13 = vadd.f32 %v5721_v26, %v5675_v51 }
 0x1d9   : > { %v7705_v60 = vadd.f32 %v2175_v13, %v7681_v36  ;;  %v5722_v9 = vpop.f32.mrb[108].mxu1  ;;  %v7764_v13 = vadd.s32 16, %v7738_v59 }
 0x1da   : > { %v5723_v7 = vpop.f32.mrb[109].mxu1 }
 0x1db   : > { %v5724_v1 = vadd.f32 %v5723_v7, %v5722_v9  ;;  %v5725_v22 = vpop.f32.mrb[110].mxu1  ;;  %v6702_v9 = vld [vmem:[%s8830_s2 + $0x60] sm:$0xff]  }
 0x1dc   : > { %v5726_v19 = vpop.f32.mrb[111].mxu1 }
 0x1dd   : > { %v2180_v11 = vadd.f32 %v5724_v1, %v5678_v6  ;;  %v5727_v54 = vadd.f32 %v5726_v19, %v5725_v22  ;;  %v7772_v1 = vadd.s32 24, %v7738_v59 }
 0x1de   : > { %v7776_v22 = vmul.u32.u64.low 3435973837, %v7764_v13  ;;  %v7777_v19 = vmul.u32.u64.high 3435973837, %v7764_v13, %v7776_v22 }
 0x1df   : > { %v7708_v41 = vadd.f32 %v2180_v11, %v7683_v15  ;;  %v2183_v39 = vadd.f32 %v5727_v54, %v5681_v49  ;;  %v6703_v11 = vld [vmem:[%s8830_s2 + $0x68] sm:$0xff]  }
 0x1e1   : > { %v7711_v43 = vadd.f32 %v2183_v39, %v7685_v45  ;;  %v5728_v42 = vpop.f32.mrb[112].mxu1  ;;  %v326_v39 = vshrl.u32 %v7755_v5, 3  ;;  %v7830_v5 = vadd.s32 56, %v7738_v59 }
 0x1e2   : > { %v5729_v44 = vpop.f32.mrb[113].mxu1 }
 0x1e3   : > { %v5730_v52 = vadd.f32 %v5729_v44, %v5728_v42  ;;  %v5731_v27 = vpop.f32.mrb[114].mxu1  ;;  %v337_v42 = vshrl.u32 %v7758_v46, 3 }
 0x1e4   : > { %v5732_v36 = vpop.f32.mrb[115].mxu1 }
 0x1e5   : > { %v2188_v32 = vadd.f32 %v5730_v52, %v5684_v58  ;;  %v5733_v12 = vadd.f32 %v5732_v36, %v5731_v27  ;;  %v7785_v52 = vmul.u32.u64.low 3435973837, %v7772_v1  ;;  %v7786_v27 = vmul.u32.u64.high 3435973837, %v7772_v1, %v7785_v52 }
 0x1e6   : > { %v6817_v36 = vmov 0  }
 0x1e7   : > { %v7714_v50 = vadd.f32 %v2188_v32, %v7687_v34  ;;  %v2191_v56 = vadd.f32 %v5733_v12, %v5687_v63  ;;  %v6698_v63 = vld [vmem:[%s8830_s2 + $0x40] sm:$0xff]   ;;  %2993 = vst [vmem:[#allocation2] sm:$0xff] %v6817_v36  ;;  %2994 = vst [vmem:[#allocation2 + $0x30] sm:$0xff] %v6817_v36 }
 0x1e9   : > { %v7717_v51 = vadd.f32 %v2191_v56, %v7689_v28  ;;  %v5734_v15 = vpop.f32.mrb[116].mxu1 }
 0x1ea   : > { %v5735_v47 = vpop.f32.mrb[117].mxu1 }
 0x1eb   : > { %v5736_v17 = vadd.f32 %v5735_v47, %v5734_v15  ;;  %v5737_v6 = vpop.f32.mrb[118].mxu1  ;;  %v6704_v15 = vld [vmem:[%s8830_s2 + $0x70] sm:$0xff]  }
 0x1ec   : > { %v5738_v45 = vpop.f32.mrb[119].mxu1 }
 0x1ed   : > { %v2196_v2 = vadd.f32 %v5736_v17, %v5690_v57  ;;  %v5739_v33 = vadd.f32 %v5738_v45, %v5737_v6  ;;  %v8847_v57 = vmov 0.0   ;;  %v327_v17 = vmul.u32 10, %v326_v39 }
 0x1ee   : > { %5962 = vmatprep.subr.bf16.mxu0 %v8847_v57  ;;  %6286 = vmatprep.subr.bf16.mxu1 %v8847_v57  ;;  %v338_v6 = vmul.u32 10, %v337_v42  ;;  %v7797_v45 = vadd.s32 32, %v7738_v59 }
 0x1ef   : > { %v7720_v49 = vadd.f32 %v2196_v2, %v7691_v55  ;;  %v2199_v37 = vadd.f32 %v5739_v33, %v5693_v62  ;;  %5963 = vmatpush3.bf16.msra.mxu0 %v6698_v63  ;;  %v6699_v55 = vld [vmem:[%s8830_s2 + $0x48] sm:$0xff]   ;;  %v7800_v2 = vadd.s32 40, %v7738_v59  ;;  %v348_v33 = vshrl.u32 %v7777_v19, 3  ;;  %5978 = vmatprep.mubr.msk.bf16.mxu0 %vm6818_vm3, %v8847_v57 }
 0x1f0   : > { %5964 = vmatprep.subr.bf16.mxu0 %v8847_v57  ;;  %6302 = vmatprep.mubr.msk.bf16.mxu1 %vm6818_vm3, %v8847_v57 }
 0x1f1   : > { %v7723_v21 = vadd.f32 %v2199_v37, %v7693_v10  ;;  %v5756_v34 = vpop.f32.mrb[120].mxu1  ;;  %v6705_v37 = vld [vmem:[%s8830_s2 + $0x78] sm:$0xff]  }
 0x1f2   : > { %v5757_v58 = vpop.f32.mrb[121].mxu1 }
 0x1f3   : > { %v7725_v18 = vadd.f32 %v5757_v58, %v5756_v34  ;;  %v5759_v28 = vpop.f32.mrb[122].mxu1  ;;  %5965 = vmatpush3.bf16.msra.mxu0 %v6699_v55  ;;  %v328_v58 = vsub.s32 %v7738_v59, %v327_v17  ;;  %v359_v55 = vshrl.u32 %v7786_v27, 3 }
 0x1f4   : > { %v5760_v48 = vpop.f32.mrb[123].mxu1  ;;  %5966 = vmatprep.subr.bf16.mxu0 %v8847_v57 }
 0x1f5   : > { %v7730_v4 = vadd.f32 %v5760_v48, %v5759_v28  ;;  %v339_v28 = vsub.s32 %v311_v20, %v338_v6  ;;  %v7809_v48 = vmul.u32.u64.low 3435973837, %v7797_v45  ;;  %v7810_v63 = vmul.u32.u64.high 3435973837, %v7797_v45, %v7809_v48 }
 0x1f6   : > { %v349_v20 = vmul.u32 10, %v348_v33  ;;  %vm430_vm4 = vcmp.ne.s32.totalorder %v328_v58, 0  ;;  %vm440_vm5 = vcmp.lt.s32.totalorder %v328_v58, 0  ;;  %v360_v14 = vmul.u32 10, %v359_v55 }
 0x1f7   : > { %5967 = vmatpush3.bf16.msra.mxu0 %v6700_v16  ;;  %vm431_vm6 = vcmp.ne.s32.totalorder %v339_v28, 0  ;;  %vm441_vm7 = vcmp.lt.s32.totalorder %v339_v28, 0  ;;  %v460_v23 = vadd.s32 10, %v328_v58  ;;  %vm7832_vm8 = vmand %vm440_vm5, %vm430_vm4  ;;  %v7858_v6 = vadd.s32 64, %v7738_v59 }
 0x1f8   : > { %5968 = vmatprep.subr.bf16.mxu0 %v8847_v57  ;;  %vm7841_vm9 = vmand %vm441_vm7, %vm431_vm6  ;;  %v361_v39 = vsub.s32 %v7772_v1, %v360_v14 }
 0x1f9   : > { %v5762_v10 = vpop.f32.mrb[124].mxu1  ;;  %v470_v36 = vsel %vm7832_vm8, %v460_v23, %v328_v58 }
 0x1fa   : > { %v5763_v61 = vpop.f32.mrb[125].mxu1  ;;  %vm433_vm12 = vcmp.ne.s32.totalorder %v361_v39, 0  ;;  %vm443_vm13 = vcmp.lt.s32.totalorder %v361_v39, 0  ;;  %vm7867_vm14 = vcmp.lt.s32.totalorder %v470_v36, 8 }
 0x1fb   : > { %v7740_v62 = vadd.f32 %v5763_v61, %v5762_v10  ;;  %v5765_v29 = vpop.f32.mrb[126].mxu1  ;;  %5969 = vmatpush3.bf16.msra.mxu0 %v6701_v8  ;;  %v7814_v10 = vmul.u32.u64.low 3435973837, %v7800_v2  ;;  %v7815_v61 = vmul.u32.u64.high 3435973837, %v7800_v2, %v7814_v10  ;;  %v7823_v8 = vadd.s32 48, %v7738_v59  ;;  %vm7886_vm2 = vmand %vm443_vm13, %vm433_vm12 }
 0x1fc   : > { %v5766_v30 = vpop.f32.mrb[127].mxu1  ;;  %5970 = vmatprep.subr.bf16.mxu0 %v8847_v57 }
 0x1fd   : > { %v7746_v35 = vadd.f32 %v5766_v30, %v5765_v29  ;;  %v381_v42 = vshrl.u32 %v7815_v61, 3 }
 0x1ff   : > { %5971 = vmatpush3.bf16.msra.mxu0 %v6702_v9  ;;  %v382_v33 = vmul.u32 10, %v381_v42 }
 0x200   : > { %5972 = vmatprep.subr.bf16.mxu0 %v8847_v57 }
 0x201   : > { %v5768_v53 = vpop.f32.mrb[128].mxu1 }
 0x202   : > { %v5769_v24 = vpop.f32.mrb[129].mxu1 }
 0x203   : > { %v7760_v25 = vadd.f32 %v5769_v24, %v5768_v53  ;;  %v5771_v31 = vpop.f32.mrb[130].mxu1  ;;  %5973 = vmatpush3.bf16.msra.mxu0 %v6703_v11  ;;  %v461_v24 = vadd.s32 10, %v339_v28  ;;  %v370_v11 = vshrl.u32 %v7810_v63, 3 }
 0x204   : > { %v5772_v26 = vpop.f32.mrb[131].mxu1  ;;  %5974 = vmatprep.subr.bf16.mxu0 %v8847_v57 }
 0x205   : > { %v7769_v7 = vadd.f32 %v5772_v26, %v5771_v31  ;;  %v350_v31 = vsub.s32 %v7764_v13, %v349_v20  ;;  %v7838_v26 = vmul.u32.u64.low 3435973837, %v7823_v8  ;;  %v7839_v9 = vmul.u32.u64.high 3435973837, %v7823_v8, %v7838_v26 }
 0x206   : > { %v371_v17 = vmul.u32 10, %v370_v11  ;;  %v383_v20 = vsub.s32 %v7800_v2, %v382_v33 }
 0x207   : > { %5975 = vmatpush3.bf16.msra.mxu0 %v6704_v15  ;;  %vm432_vm10 = vcmp.ne.s32.totalorder %v350_v31, 0  ;;  %vm442_vm11 = vcmp.lt.s32.totalorder %v350_v31, 0 }
 0x208   : > { %5976 = vmatprep.subr.bf16.mxu0 %v8847_v57  ;;  %vm7877_vm1 = vmand %vm442_vm11, %vm432_vm10  ;;  %v372_v10 = vsub.s32 %v7797_v45, %v371_v17  ;;  %vm435_vm7 = vcmp.ne.s32.totalorder %v383_v20, 0  ;;  %vm445_vm8 = vcmp.lt.s32.totalorder %v383_v20, 0  ;;  %v465_v36 = vadd.s32 10, %v383_v20 }
 0x209   : > { %v5774_v54 = vpop.f32.mrb[132].mxu1  ;;  %vm7935_vm11 = vmand %vm445_vm8, %vm435_vm7 }
 0x20a   : > { %v5775_v44 = vpop.f32.mrb[133].mxu1  ;;  %vm434_vm4 = vcmp.ne.s32.totalorder %v372_v10, 0  ;;  %vm444_vm5 = vcmp.lt.s32.totalorder %v372_v10, 0 }
 0x20b   : > { %v7788_v32 = vadd.f32 %v5775_v44, %v5774_v54  ;;  %v5777_v12 = vpop.f32.mrb[134].mxu1  ;;  %5977 = vmatpush3.bf16.msra.mxu0 %v6705_v37  ;;  %v7849_v44 = vmul.u32.u64.low 3435973837, %v7830_v5  ;;  %v7850_v52 = vmul.u32.u64.high 3435973837, %v7830_v5, %v7849_v44  ;;  %v7861_v37 = vadd.s32 72, %v7738_v59  ;;  %vm7924_vm10 = vmand %vm444_vm5, %vm434_vm4 }
 0x20c   : > { %v5778_v56 = vpop.f32.mrb[135].mxu1  ;;  %5998 = vmatprep.subr.bf16.mxu0 %v8847_v57  ;;  %v463_v59 = vadd.s32 10, %v361_v39 }
 0x20d   : > { %v7794_v47 = vadd.f32 %v5778_v56, %v5777_v12  ;;  %v471_v12 = vsel %vm7841_vm9, %v461_v24, %v339_v28  ;;  %v462_v28 = vadd.s32 10, %v350_v31  ;;  %v403_v14 = vshrl.u32 %v7850_v52, 3 }
 0x20e   : > { %vm7871_vm15 = vcmp.lt.s32.totalorder %v471_v12, 8 }
 0x20f   : > { %v472_v24 = vsel %vm7877_vm1, %v462_v28, %v350_v31  ;;  %v404_v31 = vmul.u32 10, %v403_v14 }
 0x210   : > { %vm7912_vm6 = vcmp.lt.s32.totalorder %v472_v24, 8 }
 0x211   : > { %v5780_v34 = vpop.f32.mrb[136].mxu1 }
 0x212   : > { %v5781_v40 = vpop.f32.mrb[137].mxu1 }
 0x213   : > { %v7817_v29 = vadd.f32 %v5781_v40, %v5780_v34  ;;  %v5783_v30 = vpop.f32.mrb[138].mxu1 }
 0x214   : > { %v5784_v16 = vpop.f32.mrb[139].mxu1 }
 0x215   : > { %v7827_v53 = vadd.f32 %v5784_v16, %v5783_v30  ;;  %v7892_v61 = vmul.u32.u64.low 3435973837, %v7858_v6  ;;  %v7893_v30 = vmul.u32.u64.high 3435973837, %v7858_v6, %v7892_v61 }
 0x219   : > { %v5802_v22 = vpop.f32.mrb[140].mxu1 }
 0x21a   : > { %v5803_v54 = vpop.f32.mrb[141].mxu1 }
 0x21b   : > { %v5804_v13 = vadd.f32 %v5803_v54, %v5802_v22  ;;  %v5805_v27 = vpop.f32.mrb[142].mxu1  ;;  %v473_v22 = vsel %vm7886_vm2, %v463_v59, %v361_v39  ;;  %v464_v39 = vadd.s32 10, %v372_v10 }
 0x21c   : > { %v5806_v56 = vpop.f32.mrb[143].mxu1  ;;  %vm7920_vm9 = vcmp.lt.s32.totalorder %v473_v22, 8 }
 0x21d   : > { %v2821_v15 = vadd.f32 %v5804_v13, %v7725_v18  ;;  %v5807_v1 = vadd.f32 %v5806_v56, %v5805_v27  ;;  %v474_v28 = vsel %vm7924_vm10, %v464_v39, %v372_v10 }
 0x21e   : > { %vm7950_vm1 = vcmp.lt.s32.totalorder %v474_v28, 8 }
 0x21f   : > { %v7864_v34 = vadd.f32 %v2821_v15, %v7696_v38  ;;  %v2824_v58 = vadd.f32 %v5807_v1, %v7730_v4  ;;  %v392_v38 = vshrl.u32 %v7839_v9, 3  ;;  %v414_v1 = vshrl.u32 %v7893_v30, 3 }
 0x221   : > { %v7883_v4 = vadd.f32 %v2824_v58, %v7699_v0  ;;  %v5808_v40 = vpop.f32.mrb[144].mxu1  ;;  %v7898_v0 = vmul.u32.u64.low 3435973837, %v7861_v37  ;;  %v7899_v23 = vmul.u32.u64.high 3435973837, %v7861_v37, %v7898_v0  ;;  %v2889_v46 = vsel %vm7867_vm14, %v7864_v34, 0.0 }
 0x222   : > { %v5809_v16 = vpop.f32.mrb[145].mxu1  ;;  %v393_v11 = vmul.u32 10, %v392_v38  ;;  %v405_v58 = vsub.s32 %v7830_v5, %v404_v31  ;;  %v415_v30 = vmul.u32 10, %v414_v1 }
 0x223   : > { %v2890_v45 = vsel %vm7871_vm15, %v7883_v4, 0.0  ;;  %v5810_v26 = vadd.f32 %v5809_v16, %v5808_v40  ;;  %v5811_v9 = vpop.f32.mrb[146].mxu1  ;;  %v425_v59 = vshrl.u32 %v7899_v23, 3  ;;  %v475_v40 = vsel %vm7935_vm11, %v465_v36, %v383_v20 }
 0x224   : > { %v2899_v2 = vadd.f32 %v2890_v45, %v2889_v46  ;;  %v5812_v19 = vpop.f32.mrb[147].mxu1  ;;  %v394_v12 = vsub.s32 %v7823_v8, %v393_v11  ;;  %vm437_vm2 = vcmp.ne.s32.totalorder %v405_v58, 0  ;;  %vm447_vm4 = vcmp.lt.s32.totalorder %v405_v58, 0 }
 0x225   : > { %v2829_v54 = vadd.f32 %v5810_v26, %v7740_v62  ;;  %v5813_v42 = vadd.f32 %v5812_v19, %v5811_v9  ;;  %v426_v20 = vmul.u32 10, %v425_v59  ;;  %vm7958_vm5 = vcmp.lt.s32.totalorder %v475_v40, 8  ;;  %vm7972_vm8 = vmand %vm447_vm4, %vm437_vm2 }
 0x226   : > { %vm436_vm12 = vcmp.ne.s32.totalorder %v394_v12, 0  ;;  %vm446_vm13 = vcmp.lt.s32.totalorder %v394_v12, 0  ;;  %v466_v0 = vadd.s32 10, %v394_v12  ;;  %v467_v46 = vadd.s32 10, %v405_v58 }
 0x227   : > { %v7917_v52 = vadd.f32 %v2829_v54, %v7702_v3  ;;  %v2832_v13 = vadd.f32 %v5813_v42, %v7746_v35  ;;  %vm7962_vm7 = vmand %vm446_vm13, %vm436_vm12  ;;  %v416_v26 = vsub.s32 %v7858_v6, %v415_v30 }
 0x228   : > { %v476_v19 = vsel %vm7962_vm7, %v466_v0, %v394_v12  ;;  %v477_v31 = vsel %vm7972_vm8, %v467_v46, %v405_v58 }
 0x229   : > { %v2891_v56 = vsel %vm7912_vm6, %v7917_v52, 0.0  ;;  %v7933_v3 = vadd.f32 %v2832_v13, %v7705_v60  ;;  %v5814_v35 = vpop.f32.mrb[148].mxu1  ;;  %vm438_vm10 = vcmp.ne.s32.totalorder %v416_v26, 0  ;;  %vm448_vm11 = vcmp.lt.s32.totalorder %v416_v26, 0 }
 0x22a   : > { %v2900_v17 = vadd.f32 %v2899_v2, %v2891_v56  ;;  %v5815_v33 = vpop.f32.mrb[149].mxu1  ;;  %vm7986_vm12 = vcmp.lt.s32.totalorder %v476_v19, 8  ;;  %v468_v36 = vadd.s32 10, %v416_v26  ;;  %vm7992_vm4 = vcmp.lt.s32.totalorder %v477_v31, 8  ;;  %vm7996_vm7 = vmand %vm448_vm11, %vm438_vm10 }
 0x22b   : > { %v2892_v8 = vsel %vm7920_vm9, %v7933_v3, 0.0  ;;  %v5816_v60 = vadd.f32 %v5815_v33, %v5814_v35  ;;  %v5817_v63 = vpop.f32.mrb[150].mxu1 }
 0x22c   : > { %v2901_v38 = vadd.f32 %v2900_v17, %v2892_v8  ;;  %v5818_v55 = vpop.f32.mrb[151].mxu1  ;;  %v478_v58 = vsel %vm7996_vm7, %v468_v36, %v416_v26  ;;  %vm4101_vm7 = vsmask.f32 3328 }
 0x22d   : > { %v2837_v61 = vadd.f32 %v5816_v60, %v7760_v25  ;;  %v5819_v5 = vadd.f32 %v5818_v55, %v5817_v63  ;;  %vm8008_vm10 = vcmp.lt.s32.totalorder %v478_v58, 8 }
 0x22f   : > { %v7955_v10 = vadd.f32 %v2837_v61, %v7708_v41  ;;  %v2840_v14 = vadd.f32 %v5819_v5, %v7769_v7 }
 0x231   : > { %v2893_v45 = vsel %vm7950_vm1, %v7955_v10, 0.0  ;;  %v7970_v41 = vadd.f32 %v2840_v14, %v7711_v43  ;;  %v5820_v24 = vpop.f32.mrb[152].mxu1  ;;  %v427_v43 = vsub.s32 %v7861_v37, %v426_v20 }
 0x232   : > { %v2902_v9 = vadd.f32 %v2901_v38, %v2893_v45  ;;  %v5821_v2 = vpop.f32.mrb[153].mxu1 }
 0x233   : > { %v2894_v22 = vsel %vm7958_vm5, %v7970_v41, 0.0  ;;  %v5822_v11 = vadd.f32 %v5821_v2, %v5820_v24  ;;  %v5823_v54 = vpop.f32.mrb[154].mxu1  ;;  %vm439_vm13 = vcmp.ne.s32.totalorder %v427_v43, 0  ;;  %vm449_vm2 = vcmp.lt.s32.totalorder %v427_v43, 0 }
 0x234   : > { %v2903_v42 = vadd.f32 %v2902_v9, %v2894_v22  ;;  %v5824_v13 = vpop.f32.mrb[155].mxu1  ;;  %v469_v17 = vadd.s32 10, %v427_v43  ;;  %vm459_vm8 = vmand %vm449_vm2, %vm439_vm13  ;;  %vm3050_vm13 = vcmask 1044480   ;;  %vm3573_vm2 = vsmask.f32 256 }
 0x235   : > { %v2845_v6 = vadd.f32 %v5822_v11, %v7788_v32  ;;  %v5825_v39 = vadd.f32 %v5824_v13, %v5823_v54 }
 0x236   : > { %v479_v38 = vsel %vm459_vm8, %v469_v17, %v427_v43  ;;  %vm8854_vm8 = vsmask.f32 2304 }
 0x237   : > { %v2865_v12 = vadd.f32 %v2845_v6, %v7714_v50  ;;  %v2848_v56 = vadd.f32 %v5825_v39, %v7794_v47  ;;  %vm8014_vm11 = vcmp.lt.s32.totalorder %v479_v38, 8 }
 0x239   : > { %v2895_v35 = vsel %vm7986_vm12, %v2865_v12, 0.0  ;;  %v2866_v15 = vadd.f32 %v2848_v56, %v7717_v51  ;;  %v5826_v1 = vpop.f32.mrb[156].mxu1 }
 0x23a   : > { %v2904_v50 = vadd.f32 %v2903_v42, %v2895_v35  ;;  %v5827_v33 = vpop.f32.mrb[157].mxu1 }
 0x23b   : > { %v2896_v47 = vsel %vm7992_vm4, %v2866_v15, 0.0  ;;  %v5828_v8 = vadd.f32 %v5827_v33, %v5826_v1  ;;  %v5829_v28 = vpop.f32.mrb[158].mxu1 }
 0x23c   : > { %v2905_v60 = vadd.f32 %v2904_v50, %v2896_v47  ;;  %v5830_v63 = vpop.f32.mrb[159].mxu1 }
 0x23d   : > { %v2853_v59 = vadd.f32 %v5828_v8, %v7817_v29  ;;  %v5831_v40 = vadd.f32 %v5830_v63, %v5829_v28 }
 0x23f   : > { %v2867_v55 = vadd.f32 %v2853_v59, %v7720_v49  ;;  %v2856_v61 = vadd.f32 %v5831_v40, %v7827_v53 }
 0x241   : > { %v2897_v30 = vsel %vm8008_vm10, %v2867_v55, 0.0  ;;  %v2868_v14 = vadd.f32 %v2856_v61, %v7723_v21 }
 0x242   : > { %v2906_v29 = vadd.f32 %v2905_v60, %v2897_v30 }
 0x243   : > { %v2898_v0 = vsel %vm8014_vm11, %v2868_v14, 0.0 }
 0x244   : > { %v2907_v20 = vadd.f32 %v2906_v29, %v2898_v0 }
 0x246   : > { %v2908_v25 = vrot.slane %v2907_v20, 4 }
 0x248   : > { %v2909_v46 = vadd.f32 %v2908_v25, %v2907_v20 }
 0x24a   : > { %v2910_v45 = vrot.slane %v2909_v46, 2 }
 0x24c   : > { %v2911_v49 = vadd.f32 %v2910_v45, %v2909_v46  ;;  %v8049_v46 = vld [vmem:[#allocation2] sm:$0xf8] }
 0x24e   : > { %v2912_v24 = vrot.slane %v2911_v49, 1 }
 0x250   : > { %v2913_v53 = vadd.f32 %v2912_v24, %v2911_v49  ;;  %v3051_v49 = vrot.slane %v8049_v46, 3 }
 0x252   : > { %v2914_v7 = vmul.f32 0.015625, %v2913_v53 }
 0x254   : > { %v2915_v26 = vsub.f32 %v7864_v34, %v2914_v7  ;;  %v2916_v9 = vsub.f32 %v7883_v4, %v2914_v7  ;;  %v2917_v2 = vsub.f32 %v7917_v52, %v2914_v7  ;;  %v2918_v21 = vsub.f32 %v7933_v3, %v2914_v7 }
 0x255   : > { %v2919_v22 = vsub.f32 %v7955_v10, %v2914_v7  ;;  %v2920_v19 = vsub.f32 %v7970_v41, %v2914_v7  ;;  %v2921_v11 = vsub.f32 %v2865_v12, %v2914_v7  ;;  %v2922_v54 = vsub.f32 %v2866_v15, %v2914_v7 }
 0x256   : > { %v2923_v43 = vsub.f32 %v2867_v55, %v2914_v7  ;;  %v2924_v42 = vsub.f32 %v2868_v14, %v2914_v7  ;;  %v2925_v31 = vmul.f32 %v2915_v26, %v2915_v26  ;;  %v2926_v13 = vmul.f32 %v2916_v9, %v2916_v9 }
 0x257   : > { %v2927_v6 = vmul.f32 %v2917_v2, %v2917_v2  ;;  %v2928_v52 = vmul.f32 %v2918_v21, %v2918_v21  ;;  %v2929_v3 = vmul.f32 %v2919_v22, %v2919_v22  ;;  %v2930_v36 = vmul.f32 %v2920_v19, %v2920_v19 }
 0x258   : > { %v2935_v34 = vsel %vm7867_vm14, %v2925_v31, 0.0  ;;  %v2936_v4 = vsel %vm7871_vm15, %v2926_v13, 0.0  ;;  %v2931_v32 = vmul.f32 %v2921_v11, %v2921_v11  ;;  %v2932_v1 = vmul.f32 %v2922_v54, %v2922_v54 }
 0x259   : > { %v2945_v39 = vadd.f32 %v2936_v4, %v2935_v34  ;;  %v2937_v10 = vsel %vm7912_vm6, %v2927_v6, 0.0  ;;  %v2938_v12 = vsel %vm7920_vm9, %v2928_v52, 0.0  ;;  %v2939_v35 = vsel %vm7950_vm1, %v2929_v3, 0.0 }
 0x25a   : > { %v2940_v17 = vsel %vm7958_vm5, %v2930_v36, 0.0  ;;  %v2933_v33 = vmul.f32 %v2923_v43, %v2923_v43  ;;  %v2941_v47 = vsel %vm7986_vm12, %v2931_v32, 0.0  ;;  %v2934_v8 = vmul.f32 %v2924_v42, %v2924_v42 }
 0x25b   : > { %v2946_v41 = vadd.f32 %v2945_v39, %v2937_v10  ;;  %v2942_v28 = vsel %vm7992_vm4, %v2932_v1, 0.0 }
 0x25c   : > { %v2943_v63 = vsel %vm8008_vm10, %v2933_v33, 0.0  ;;  %v2944_v38 = vsel %vm8014_vm11, %v2934_v8, 0.0 }
 0x25d   : > { %v2947_v56 = vadd.f32 %v2946_v41, %v2938_v12 }
 0x25f   : > { %v2948_v15 = vadd.f32 %v2947_v56, %v2939_v35 }
 0x261   : > { %v2949_v50 = vadd.f32 %v2948_v15, %v2940_v17 }
 0x263   : > { %v2950_v58 = vadd.f32 %v2949_v50, %v2941_v47 }
 0x265   : > { %v2951_v60 = vadd.f32 %v2950_v58, %v2942_v28  ;;  %v6706_v28 = vld [vmem:[%s8830_s2] sm:$0xff]  }
 0x267   : > { %v2952_v59 = vadd.f32 %v2951_v60, %v2943_v63  ;;  %v6707_v63 = vld [vmem:[%s8830_s2 + $0x8] sm:$0xff]  }
 0x269   : > { %v2953_v40 = vadd.f32 %v2952_v59, %v2944_v38  ;;  %v6708_v38 = vld [vmem:[%s8830_s2 + $0x10] sm:$0xff]  }
 0x26b   : > { %v2954_v55 = vrot.slane %v2953_v40, 4 }
 0x26d   : > { %v2955_v61 = vadd.f32 %v2954_v55, %v2953_v40 }
 0x26f   : > { %v2956_v30 = vrot.slane %v2955_v61, 2 }
 0x271   : > { %v2957_v14 = vadd.f32 %v2956_v30, %v2955_v61 }
 0x273   : > { %v2958_v29 = vrot.slane %v2957_v14, 1 }
 0x275   : > { %v2959_v0 = vadd.f32 %v2958_v29, %v2957_v14 }
 0x277   : > { %v2960_v20 = vmul.f32 0.015625, %v2959_v0  ;;  %v6709_v0 = vld [vmem:[%s8830_s2 + $0x18] sm:$0xff]  }
 0x279   : > { %v2961_v25 = vadd.f32 1e-05, %v2960_v20 }
 0x27b   : > { %6783 = vrsqrt.f32 %v2961_v25 }
 0x285   : > { %v6784_v45 = vpop.eup %6783 }
 0x286   : > { %v8052_v24 = vmul.f32 %v6784_v45, %v2915_v26  ;;  %v8054_v53 = vmul.f32 %v6784_v45, %v2916_v9  ;;  %v8056_v7 = vmul.f32 %v6784_v45, %v2917_v2  ;;  %v8058_v31 = vmul.f32 %v6784_v45, %v2918_v21 }
 0x287   : > { %v8060_v13 = vmul.f32 %v6784_v45, %v2919_v22  ;;  %v8062_v6 = vmul.f32 %v6784_v45, %v2920_v19  ;;  %v8064_v34 = vmul.f32 %v6784_v45, %v2921_v11  ;;  %v8066_v4 = vmul.f32 %v6784_v45, %v2922_v54 }
 0x288   : > { %v8068_v52 = vmul.f32 %v6784_v45, %v2923_v43  ;;  %v8070_v39 = vmul.f32 %v6784_v45, %v2924_v42  ;;  %v8845_v26 = vmax.f32 %v8052_v24, 0.0  ;;  %v8844_v9 = vmax.f32 %v8054_v53, 0.0 }
 0x289   : > { %v8843_v2 = vmax.f32 %v8056_v7, 0.0  ;;  %v8842_v21 = vmax.f32 %v8058_v31, 0.0  ;;  %v8841_v22 = vmax.f32 %v8060_v13, 0.0  ;;  %v8840_v19 = vmax.f32 %v8062_v6, 0.0 }
 0x28a   : > { %v8839_v11 = vmax.f32 %v8064_v34, 0.0  ;;  %v8838_v54 = vmax.f32 %v8066_v4, 0.0  ;;  %v8837_v43 = vmax.f32 %v8068_v52, 0.0  ;;  %v8836_v42 = vmax.f32 %v8070_v39, 0.0 }
 0x28b   : > { %v2983_v3 = vsel %vm7867_vm14, %v8845_v26, 0.0  ;;  %v2984_v10 = vsel %vm7871_vm15, %v8844_v9, 0.0  ;;  %v2985_v41 = vsel %vm7912_vm6, %v8843_v2, 0.0  ;;  %v2986_v36 = vsel %vm7920_vm9, %v8842_v21, 0.0  ;;  %v6713_v26 = vld [vmem:[%s8830_s2 + $0x38] sm:$0xff]  }
 0x28c   : > { %v2987_v12 = vsel %vm7950_vm1, %v8841_v22, 0.0  ;;  %v2988_v56 = vsel %vm7958_vm5, %v8840_v19, 0.0  ;;  %v2989_v32 = vsel %vm7986_vm12, %v8839_v11, 0.0  ;;  %v2990_v35 = vsel %vm7992_vm4, %v8838_v54, 0.0  ;;  %v6712_v11 = vld [vmem:[%s8830_s2 + $0x30] sm:$0xff]  }
 0x28d   : > { %v2991_v15 = vsel %vm8008_vm10, %v8837_v43, 0.0  ;;  %v2992_v1 = vsel %vm8014_vm11, %v8836_v42, 0.0  ;;  %v2995_v17 = vpack.c.bf16 %v2984_v10, %v2983_v3  ;;  %v8122_v50 = vpack.c.bf16 %v2986_v36, %v2985_v41 }
 0x28e   : > { %v8124_v33 = vpack.c.bf16 %v2988_v56, %v2987_v12  ;;  %v8126_v47 = vpack.c.bf16 %v2990_v35, %v2989_v32  ;;  %v8128_v58 = vpack.c.bf16 %v2992_v1, %v2991_v15  ;;  %v6710_v56 = vld [vmem:[%s8830_s2 + $0x20] sm:$0xff]  }
 0x28f   : > { %8893 = vst [vmem:[#allocation3_spill] sm:$0xff] %v8122_v50  ;;  %3000 = vst [vmem:[#allocation2 + $0x8] sm:$0xff] %v2995_v17  ;;  %v3052_v8 = vrot.slane %v2995_v17, 3  ;;  %v3054_v59 = vrot.slane %v8122_v50, 3  ;;  %v8145_v40 = vshrl.u32 %v2995_v17, 16  ;;  %v8150_v61 = vshrl.u32 %v8122_v50, 16 }
 0x290   : > { %8894 = vst [vmem:[#allocation4_spill] sm:$0xff] %v8124_v33  ;;  %8895 = vst [vmem:[#allocation5_spill] sm:$0xff] %v8126_v47  ;;  %v8153_v30 = vshrl.u32 %v8124_v33, 16  ;;  %v8156_v14 = vshrl.u32 %v8126_v47, 16  ;;  %v8158_v29 = vshll.u32 %v2995_v17, 16  ;;  %v3056_v20 = vrot.slane %v8124_v33, 3 }
 0x291   : > { %8896 = vst [vmem:[#allocation6_spill] sm:$0xff] %v8128_v58  ;;  %3004 = vst [vmem:[#allocation2 + $0x28] sm:$0xff] %v8128_v58  ;;  %v3053_v60 = vsel %vm3050_vm13, %v3051_v49, %v3052_v8  ;;  %v3055_v55 = vsel %vm3050_vm13, %v3052_v8, %v3054_v59  ;;  %v8168_v25 = vshll.u32 %v8122_v50, 16  ;;  %v8171_v45 = vshll.u32 %v8124_v33, 16 }
 0x292   : > { %5979 = vmatmul.mubr.bf16.vlgmr.msra.gmra.mrb[0].mxu0 %v3053_v60  ;;  %v3578_v49 = vrot.slane %v8145_v40, 7  ;;  %v8175_v3 = vshll.u32 %v8126_v47, 16  ;;  %v3581_v10 = vrot.slane %v8150_v61, 7  ;;  %v3584_v41 = vrot.slane %v8153_v30, 7 }
 0x293   : > { %5999 = vmatpush3.bf16.msra.mxu0 %v6706_v28  ;;  %5982 = vmatprep.mubr.msk.bf16.mxu0 %vm6818_vm3, %v8847_v57  ;;  %v8846_v36 = vrot.slane %v8156_v14, 7  ;;  %v3057_v1 = vsel %vm3050_vm13, %v3054_v59, %v3056_v20  ;;  %v8194_v17 = vshll.u32 %v8128_v58, 16  ;;  %v3921_v59 = vrot.slane %v8171_v45, 1 }
 0x294   : > { %6000 = vmatprep.subr.bf16.mxu0 %v8847_v57  ;;  %v8181_v12 = vor.u32 %v3578_v49, %v8158_v29  ;;  %v3582_v32 = vor.u32 %v3581_v10, %v8168_v25  ;;  %v3585_v35 = vor.u32 %v3584_v41, %v8171_v45  ;;  %v4111_v19 = vrot.slane %v8168_v25, 5 }
 0x295   : > { %v3588_v15 = vor.u32 %v8846_v36, %v8175_v3  ;;  %v4123_v21 = vrot.slane %v8194_v17, 5  ;;  %v4481_v50 = vrot.slane %v8194_v17, 6 }
 0x296   : > { %v8197_v8 = vsel %vm3573_vm2, %v3578_v49, %v3582_v32  ;;  %v8200_v28 = vsel %vm3573_vm2, %v3581_v10, %v3585_v35  ;;  %v3929_v10 = vrot.slane %v8175_v3, 1  ;;  %v3058_v32 = vrot.slane %v8126_v47, 3 }
 0x297   : > { %6001 = vmatpush3.bf16.msra.mxu0 %v6707_v63  ;;  %v8203_v60 = vsel %vm3573_vm2, %v3584_v41, %v3588_v15  ;;  %v3908_v63 = vrot.slane %v8158_v29, 1  ;;  %v3937_v41 = vrot.slane %v8194_v17, 1  ;;  %v3925_v35 = vor.u32 %v3921_v59, %v8153_v30 }
 0x298   : > { %6002 = vmatprep.subr.bf16.mxu0 %v8847_v57  ;;  %v3059_v22 = vsel %vm3050_vm13, %v3056_v20, %v3058_v32 }
 0x299   : > { %v3909_v49 = vor.u32 %v3908_v63, %v8145_v40  ;;  %v3005_v63 = vld [vmem:[#allocation2] sm:$0xfc]  ;;  %v8234_v54 = vsel %vm730_vm0, %v3925_v35, %v3929_v10 }
 0x29a   : > { %5983 = vmatmul.mubr.bf16.gmra.mrb[4].mxu0 %v3055_v55  ;;  %v6711_v55 = vld [vmem:[%s8830_s2 + $0x28] sm:$0xff]   ;;  %v3190_v20 = vshrl.u32 %v3005_v63, 16  ;;  %v3193_v2 = vshll.u32 %v3005_v63, 16 }
 0x29b   : > { %6003 = vmatpush3.bf16.msra.mxu0 %v6708_v38  ;;  %5986 = vmatprep.mubr.msk.bf16.mxu0 %vm6818_vm3, %v8847_v57  ;;  %v3913_v38 = vrot.slane %v8168_v25, 1 }
 0x29c   : > { %6004 = vmatprep.subr.bf16.mxu0 %v8847_v57 }
 0x29d   : > { %v8224_v15 = vsel %vm730_vm0, %v3909_v49, %v3913_v38  ;;  %v4110_v49 = vrot.slane %v8150_v61, 4 }
 0x29f   : > { %6005 = vmatpush3.bf16.msra.mxu0 %v6709_v0  ;;  %v8214_v0 = vshrl.u32 %v8128_v58, 16  ;;  %v8251_v35 = vor.u32 %v4111_v19, %v4110_v49  ;;  %v3203_v58 = vrot.slane %v8158_v29, 3 }
 0x2a0   : > { %6006 = vmatprep.subr.bf16.mxu0 %v8847_v57 }
 0x2a1   : > { %v8228_v42 = vor.u32 %v3937_v41, %v8214_v0  ;;  %v4480_v33 = vrot.slane %v8214_v0, 5 }
 0x2a2   : > { %5987 = vmatmul.mubr.bf16.gmra.mrb[8].mxu0 %v3057_v1  ;;  %v3933_v1 = vor.u32 %v3929_v10, %v8156_v14  ;;  %v4118_v10 = vrot.slane %v8156_v14, 4 }
 0x2a3   : > { %6007 = vmatpush3.bf16.msra.mxu0 %v6710_v56  ;;  %5990 = vmatprep.mubr.msk.bf16.mxu0 %vm6818_vm3, %v8847_v57  ;;  %v3917_v56 = vor.u32 %v3913_v38, %v8150_v61 }
 0x2a4   : > { %6008 = vmatprep.subr.bf16.mxu0 %v8847_v57  ;;  %v8240_v38 = vsel %vm730_vm0, %v3933_v1, %v3937_v41  ;;  %v4119_v41 = vrot.slane %v8175_v3, 5  ;;  %v4122_v1 = vrot.slane %v8214_v0, 4 }
 0x2a5   : > { %v8231_v43 = vsel %vm730_vm0, %v3917_v56, %v3921_v59  ;;  %v4114_v59 = vrot.slane %v8153_v30, 4  ;;  %v8249_v56 = vld [vmem:[#allocation2 + $0x28] sm:$0x7] }
 0x2a6   : > { %v4120_v19 = vor.u32 %v4119_v41, %v4118_v10  ;;  %v8261_v49 = vor.u32 %v4123_v21, %v4122_v1  ;;  %v3060_v36 = vrot.slane %v8249_v56, 3  ;;  %v3200_v21 = vrot.slane %v8145_v40, 2 }
 0x2a7   : > { %6009 = vmatpush3.bf16.msra.mxu0 %v6711_v55  ;;  %v4115_v55 = vrot.slane %v8171_v45, 5  ;;  %v4468_v10 = vrot.slane %v8150_v61, 5  ;;  %v4469_v41 = vrot.slane %v8168_v25, 6  ;;  %v4472_v1 = vrot.slane %v8153_v30, 5 }
 0x2a8   : > { %6010 = vmatprep.subr.bf16.mxu0 %v8847_v57  ;;  %8897 = vst [vmem:[#allocation7_spill] sm:$0xff] %v8261_v49 }
 0x2a9   : > { %v4116_v9 = vor.u32 %v4115_v55, %v4114_v59  ;;  %v3192_v59 = vrot.slane %v3190_v20, 2  ;;  %v3195_v55 = vrot.slane %v3193_v2, 3  ;;  %v4476_v2 = vrot.slane %v8156_v14, 5 }
 0x2aa   : > { %5991 = vmatmul.mubr.bf16.gmra.mrb[12].mxu0 %v3059_v22  ;;  %v4477_v20 = vrot.slane %v8175_v3, 6  ;;  %v8286_v47 = vor.u32 %v4469_v41, %v4468_v10 }
 0x2ab   : > { %5994 = vmatprep.mubr.msk.bf16.mxu0 %vm6818_vm3, %v8847_v57  ;;  %6011 = vmatpush3.bf16.msra.mxu0 %v6712_v11  ;;  %v8267_v22 = vsel %vm4101_vm7, %v8251_v35, %v4116_v9  ;;  %v8270_v63 = vsel %vm4101_vm7, %v4116_v9, %v4120_v19  ;;  %v8274_v11 = vsel %vm4101_vm7, %v4120_v19, %v8261_v49  ;;  %v8899_v19 = vmov 0.0  }
 0x2ac   : > { %6012 = vmatprep.subr.bf16.mxu0 %v8847_v57  ;;  %8898 = vst [vmem:[#allocation8_spill] sm:$0xff] %v8274_v11  ;;  %v4473_v57 = vrot.slane %v8171_v45, 6  ;;  %v3061_v9 = vsel %vm3050_vm13, %v3058_v32, %v3060_v36  ;;  %v4478_v49 = vor.u32 %v4477_v20, %v4476_v2  ;;  %v8296_v32 = vor.u32 %v4481_v50, %v4480_v33  ;;  %v6715_v33 = vld [vmem:[%s8830_s2 + $0x88] sm:$0xff]   ;;  %v6717_v20 = vld [vmem:[%s8830_s2 + $0x98] sm:$0xff]  }
 0x2ad   : > { %v3196_v10 = vor.u32 %v3195_v55, %v3192_v59  ;;  %vm3188_vm13 = vsmask.f32 5376  ;;  %v3209_v2 = vrot.slane %v8150_v61, 2  ;;  %v3212_v50 = vrot.slane %v8168_v25, 3 }
 0x2ae   : > { %v8303_v41 = vsel %vm8854_vm8, %v4478_v49, %v8296_v32  ;;  %v3218_v55 = vrot.slane %v8153_v30, 2 }
 0x2af   : > { %6013 = vmatpush3.bf16.msra.mxu0 %v6713_v26  ;;  %v4474_v26 = vor.u32 %v4473_v57, %v4472_v1  ;;  %v3204_v57 = vor.u32 %v3203_v58, %v3200_v21  ;;  %v6714_v1 = vld [vmem:[%s8830_s2 + $0x80] sm:$0xff]   ;;  %v3213_v58 = vor.u32 %v3212_v50, %v3209_v2  ;;  %v3221_v21 = vrot.slane %v8171_v45, 3  ;;  %v6719_v2 = vld [vmem:[%s8830_s2 + $0xa8] sm:$0xff]  }
 0x2b0   : > { %6034 = vmatprep.subr.bf16.mxu0 %v8899_v19 }
 0x2b1   : > { %v8294_v36 = vsel %vm8854_vm8, %v8286_v47, %v4474_v26  ;;  %v8299_v11 = vsel %vm8854_vm8, %v4474_v26, %v4478_v49  ;;  %v6716_v49 = vld [vmem:[%s8830_s2 + $0x90] sm:$0xff]   ;;  %v3214_v59 = vsel %vm3188_vm13, %v3204_v57, %v3213_v58  ;;  %v3222_v26 = vor.u32 %v3221_v21, %v3218_v55 }
 0x2b2   : > { %5995 = vmatmul.mubr.bf16.gmra.mrb[16].mxu0 %v3061_v9  ;;  %v3205_v9 = vsel %vm3188_vm13, %v3196_v10, %v3204_v57  ;;  %v6718_v10 = vld [vmem:[%s8830_s2 + $0xa0] sm:$0xff]   ;;  %vm3385_vm8 = vsmask.f32 4352 }
 0x2b3   : > { %6014 = vmatprep.mubr.msk.bf16.mxu0 %vm6818_vm3, %v8899_v19  ;;  %v3223_v57 = vsel %vm3188_vm13, %v3213_v58, %v3222_v26  ;;  %v3237_v58 = vshll.u32 %v8249_v56, 16 }
 0x2b5   : > { %v3239_v21 = vrot.slane %v3237_v58, 3 }
 0x2ba   : > { %6015 = vmatmul.mubr.bf16.vlgmr.msra.gmra.mrb[0].mxu0 %v3205_v9  ;;  %v3230_v9 = vrot.slane %v8175_v3, 3 }
 0x2bb   : > { %6035 = vmatpush3.bf16.msra.mxu0 %v6714_v1  ;;  %6018 = vmatprep.mubr.msk.bf16.mxu0 %vm6818_vm3, %v8899_v19  ;;  %v3227_v1 = vrot.slane %v8156_v14, 2 }
 0x2bc   : > { %6036 = vmatprep.subr.bf16.mxu0 %v8899_v19 }
 0x2bd   : > { %v3231_v50 = vor.u32 %v3230_v9, %v3227_v1 }
 0x2bf   : > { %6037 = vmatpush3.bf16.msra.mxu0 %v6715_v33  ;;  %v3234_v33 = vshrl.u32 %v8249_v56, 16  ;;  %v6721_v56 = vld [vmem:[%s8830_s2 + $0xb8] sm:$0xff]  }
 0x2c0   : > { %6038 = vmatprep.subr.bf16.mxu0 %v8899_v19 }
 0x2c1   : > { %v3236_v55 = vrot.slane %v3234_v33, 2  ;;  %v3395_v33 = vrot.slane %v8158_v29, 4 }
 0x2c2   : > { %6019 = vmatmul.mubr.bf16.gmra.mrb[4].mxu0 %v3214_v59  ;;  %v3232_v59 = vsel %vm3188_vm13, %v3222_v26, %v3231_v50 }
 0x2c3   : > { %6039 = vmatpush3.bf16.msra.mxu0 %v6716_v49  ;;  %6022 = vmatprep.mubr.msk.bf16.mxu0 %vm6818_vm3, %v8899_v19  ;;  %v6720_v49 = vld [vmem:[%s8830_s2 + $0xb0] sm:$0xff]  }
 0x2c4   : > { %6040 = vmatprep.subr.bf16.mxu0 %v8899_v19 }
 0x2c7   : > { %6041 = vmatpush3.bf16.msra.mxu0 %v6717_v20  ;;  %v3387_v20 = vshrl.u32 %v8049_v46, 16 }
 0x2c8   : > { %6042 = vmatprep.subr.bf16.mxu0 %v8899_v19 }
 0x2c9   : > { %v3389_v26 = vrot.slane %v3387_v20, 3  ;;  %v6725_v20 = vld [vmem:[%s8830_s2 + $0xd8] sm:$0xff]  }
 0x2ca   : > { %6023 = vmatmul.mubr.bf16.gmra.mrb[8].mxu0 %v3223_v57  ;;  %v3240_v57 = vor.u32 %v3239_v21, %v3236_v55  ;;  %v3398_v55 = vrot.slane %v8150_v61, 3  ;;  %v6724_v21 = vld [vmem:[%s8830_s2 + $0xd0] sm:$0xff]  }
 0x2cb   : > { %6043 = vmatpush3.bf16.msra.mxu0 %v6718_v10  ;;  %6026 = vmatprep.mubr.msk.bf16.mxu0 %vm6818_vm3, %v8899_v19  ;;  %v3390_v10 = vshll.u32 %v8049_v46, 16  ;;  %v6722_v46 = vld [vmem:[%s8830_s2 + $0xc0] sm:$0xff]  }
 0x2cc   : > { %6044 = vmatprep.subr.bf16.mxu0 %v8899_v19  ;;  %v3241_v9 = vsel %vm3188_vm13, %v3231_v50, %v3240_v57  ;;  %v3399_v50 = vrot.slane %v8168_v25, 4  ;;  %v3402_v25 = vrot.slane %v8153_v30, 3  ;;  %v6726_v57 = vld [vmem:[%s8830_s2 + $0xe0] sm:$0xff]   ;;  %vm6799_vm13 = vmpackc.low %vm7958_vm5, %vm7950_vm1 }
 0x2cd   : > { %v3392_v1 = vrot.slane %v3390_v10, 4 }
 0x2ce   : > { %v3400_v29 = vor.u32 %v3399_v50, %v3398_v55  ;;  %v6729_v55 = vld [vmem:[%s8830_s2 + $0xf8] sm:$0xff]  }
 0x2cf   : > { %6045 = vmatpush3.bf16.msra.mxu0 %v6719_v2  ;;  %v3394_v2 = vrot.slane %v8145_v40, 3  ;;  %v3393_v58 = vor.u32 %v3392_v1, %v3389_v26  ;;  %v6723_v40 = vld [vmem:[%s8830_s2 + $0xc8] sm:$0xff]   ;;  %v3407_v26 = vrot.slane %v8175_v3, 4  ;;  %v6728_v3 = vld [vmem:[%s8830_s2 + $0xf0] sm:$0xff]  }
 0x2d0   : > { %6046 = vmatprep.subr.bf16.mxu0 %v8899_v19  ;;  %v3368_v1 = vld [vmem:[#allocation2 + $0x28] sm:$0xf] }
 0x2d2   : > { %6027 = vmatmul.mubr.bf16.gmra.mrb[12].mxu0 %v3232_v59 }
 0x2d3   : > { %6030 = vmatprep.mubr.msk.bf16.mxu0 %vm6818_vm3, %v8899_v19  ;;  %6047 = vmatpush3.bf16.msra.mxu0 %v6720_v49  ;;  %v3396_v49 = vor.u32 %v3395_v33, %v3394_v2  ;;  %v3411_v33 = vshrl.u32 %v3368_v1, 16 }
 0x2d4   : > { %6048 = vmatprep.subr.bf16.mxu0 %v8899_v19 }
 0x2d5   : > { %v3397_v59 = vsel %vm3385_vm8, %v3393_v58, %v3396_v49  ;;  %v3401_v61 = vsel %vm3385_vm8, %v3396_v49, %v3400_v29  ;;  %v3414_v58 = vshll.u32 %v3368_v1, 16  ;;  %v8900_v1 = vrot.slane %v8156_v14, 7 }
 0x2d7   : > { %6049 = vmatpush3.bf16.msra.mxu0 %v6721_v56  ;;  %v3403_v56 = vrot.slane %v8171_v45, 4  ;;  %v3406_v45 = vrot.slane %v8156_v14, 3 }
 0x2d8   : > { %6070 = vmatprep.subr.bf16.mxu0 %v8899_v19 }
 0x2d9   : > { %v3404_v10 = vor.u32 %v3403_v56, %v3402_v25  ;;  %v3408_v2 = vor.u32 %v3407_v26, %v3406_v45  ;;  %v6730_v25 = vld [vmem:[%s8830_s2 + $0x100] sm:$0xff]   ;;  %v3593_v45 = vrot.slane %v8214_v0, 7 }
 0x2da   : > { %6031 = vmatmul.mubr.bf16.gmra.mrb[16].mxu0 %v3241_v9  ;;  %v6727_v9 = vld [vmem:[%s8830_s2 + $0xe8] sm:$0xff]  }
 0x2db   : > { %6050 = vmatprep.mubr.msk.bf16.mxu0 %vm6818_vm3, %v8899_v19  ;;  %v3405_v30 = vsel %vm3385_vm8, %v3400_v29, %v3404_v10  ;;  %v3409_v49 = vsel %vm3385_vm8, %v3404_v10, %v3408_v2  ;;  %v6732_v10 = vld [vmem:[%s8830_s2 + $0x110] sm:$0xff]   ;;  %v3596_v26 = vor.u32 %v8194_v17, %v3593_v45  ;;  %v8901_v17 = vmax.f32 %v8052_v24, 0.0  ;;  %v6751_v45 = vld [vmem:[%s8830_s2 + $0x1a8] sm:$0xff]  }
 0x2dc   : > { %v8903_v24 = vmax.f32 %v8056_v7, 0.0  ;;  %v8905_v7 = vmax.f32 %v8060_v13, 0.0  ;;  %v6744_v13 = vld [vmem:[%s8830_s2 + $0x170] sm:$0xff]  }
 0x2dd   : > { %v3597_v0 = vsel %vm3573_vm2, %v8900_v1, %v3596_v26  ;;  %v3886_v26 = vld [vmem:[#allocation2 + $0x30] sm:$0x1] }
 0x2de   : > { %v6752_v1 = vld [vmem:[%s8830_s2 + $0x1b0] sm:$0xff]  }
 0x2e2   : > { %6051 = vmatmul.mubr.bf16.vlgmr.msra.gmra.mrb[0].mxu0 %v3397_v59  ;;  %v3416_v59 = vrot.slane %v3414_v58, 4 }
 0x2e3   : > { %6071 = vmatpush3.bf16.msra.mxu0 %v6722_v46  ;;  %6054 = vmatprep.mubr.msk.bf16.mxu0 %vm6818_vm3, %v8899_v19  ;;  %v3413_v46 = vrot.slane %v3411_v33, 3  ;;  %v6740_v33 = vld [vmem:[%s8830_s2 + $0x150] sm:$0xff]  }
 0x2e4   : > { %6072 = vmatprep.subr.bf16.mxu0 %v8899_v19 }
 0x2e5   : > { %v3417_v50 = vor.u32 %v3416_v59, %v3413_v46  ;;  %v6743_v59 = vld [vmem:[%s8830_s2 + $0x168] sm:$0xff]  }
 0x2e7   : > { %6073 = vmatpush3.bf16.msra.mxu0 %v6723_v40  ;;  %v3555_v40 = vld [vmem:[#allocation2] sm:$0x80]  ;;  %v3418_v29 = vsel %vm3385_vm8, %v3408_v2, %v3417_v50  ;;  %vm6793_vm8 = vmpackc.low %vm7871_vm15, %vm7867_vm14  ;;  %v6739_v2 = vld [vmem:[%s8830_s2 + $0x148] sm:$0xff]   ;;  %v8908_v50 = vmax.f32 %v8066_v4, 0.0  ;;  %v8909_v4 = vmax.f32 %v8068_v52, 0.0 }
 0x2e8   : > { %6074 = vmatprep.subr.bf16.mxu0 %v8899_v19  ;;  %v6746_v52 = vld [vmem:[%s8830_s2 + $0x180] sm:$0xff]  }
 0x2ea   : > { %6055 = vmatmul.mubr.bf16.gmra.mrb[4].mxu0 %v3401_v61 }
 0x2eb   : > { %6075 = vmatpush3.bf16.msra.mxu0 %v6724_v21  ;;  %6058 = vmatprep.mubr.msk.bf16.mxu0 %vm6818_vm3, %v8899_v19  ;;  %v3575_v21 = vshrl.u32 %v3555_v40, 16 }
 0x2ec   : > { %6076 = vmatprep.subr.bf16.mxu0 %v8899_v19 }
 0x2ed   : > { %v3577_v61 = vrot.slane %v3575_v21, 7  ;;  %v6745_v21 = vld [vmem:[%s8830_s2 + $0x178] sm:$0xff]  }
 0x2ef   : > { %6077 = vmatpush3.bf16.msra.mxu0 %v6725_v20  ;;  %v3580_v56 = vsel %vm3573_vm2, %v3577_v61, %v8181_v12  ;;  %v6731_v20 = vld [vmem:[%s8830_s2 + $0x108] sm:$0xff]   ;;  %v6733_v12 = vld [vmem:[%s8830_s2 + $0x118] sm:$0xff]   ;;  %vm6796_vm2 = vmpackc.low %vm7920_vm9, %vm7912_vm6  ;;  %v8910_v61 = vmax.f32 %v8070_v39, 0.0 }
 0x2f0   : > { %6078 = vmatprep.subr.bf16.mxu0 %v8899_v19  ;;  %v6775_v39 = vld [vmem:[%s8831_s3 + $0x28] sm:$0xff]  }
 0x2f2   : > { %6059 = vmatmul.mubr.bf16.gmra.mrb[8].mxu0 %v3405_v30  ;;  %v6736_v30 = vld [vmem:[%s8830_s2 + $0x130] sm:$0xff]  }
 0x2f3   : > { %6079 = vmatpush3.bf16.msra.mxu0 %v6726_v57  ;;  %6062 = vmatprep.mubr.msk.bf16.mxu0 %vm6818_vm3, %v8899_v19  ;;  %v6734_v57 = vld [vmem:[%s8830_s2 + $0x120] sm:$0xff]  }
 0x2f4   : > { %6080 = vmatprep.subr.bf16.mxu0 %v8899_v19 }
 0x2f7   : > { %6081 = vmatpush3.bf16.msra.mxu0 %v6727_v9  ;;  %v8902_v9 = vmax.f32 %v8054_v53, 0.0  ;;  %v8904_v53 = vmax.f32 %v8058_v31, 0.0  ;;  %v8906_v31 = vmax.f32 %v8062_v6, 0.0  ;;  %v8907_v6 = vmax.f32 %v8064_v34, 0.0  ;;  %v6772_v34 = vld [vmem:[%s8831_s3 + $0x10] sm:$0xff]  }
 0x2f8   : > { %6082 = vmatprep.subr.bf16.mxu0 %v8899_v19 }
 0x2f9   : > { %v6794_v14 = vpack.c.bf16 %v8902_v9, %v8901_v17  ;;  %v6797_v58 = vpack.c.bf16 %v8904_v53, %v8903_v24  ;;  %v6800_v46 = vpack.c.bf16 %v8906_v31, %v8905_v7  ;;  %v6803_v40 = vpack.c.bf16 %v8908_v50, %v8907_v6  ;;  %v6780_v17 = vld [vmem:[%s6900_s26 + $0x4c] ss:$16 sps:$4 sm:$0xff]   ;;  %v6756_v31 = vld [vmem:[%s8830_s2 + $0x1d0] sm:$0xff]  }
 0x2fa   : > { %6063 = vmatmul.mubr.bf16.gmra.mrb[12].mxu0 %v3409_v49  ;;  %v6742_v49 = vld [vmem:[%s8830_s2 + $0x160] sm:$0xff]   ;;  %v6781_v53 = vld [vmem:[%s6900_s26 + $0x6c] ss:$16 sps:$4 sm:$0xff]  }
 0x2fb   : > { %6066 = vmatprep.mubr.msk.bf16.mxu0 %vm6818_vm3, %v8899_v19  ;;  %6083 = vmatpush3.bf16.msra.mxu0 %v6728_v3  ;;  %v6741_v3 = vld [vmem:[%s8830_s2 + $0x158] sm:$0xff]  }
 0x2fc   : > { %6084 = vmatprep.subr.bf16.mxu0 %v8899_v19  ;;  %v6782_v7 = vld [vmem:[%s6900_s26 + $0x8c] ss:$16 sps:$4 sm:$0xff]  }
 0x2ff   : > { %6085 = vmatpush3.bf16.msra.mxu0 %v6729_v55  ;;  %v6769_v55 = vld [vmem:[%s8831_s3] sm:$0xff]  }
 0x300   : > { %6106 = vmatprep.subr.bf16.mxu0 %v8899_v19  ;;  %6287 = vmatpush3.bf16.msra.mxu1 %v6769_v55 }
 0x301   : > { %6288 = vmatprep.subr.bf16.mxu1 %v8899_v19 }
 0x302   : > { %6067 = vmatmul.mubr.bf16.gmra.mrb[16].mxu0 %v3418_v29  ;;  %v6770_v29 = vld [vmem:[%s8831_s3 + $0x8] sm:$0xff]  }
 0x303   : > { %6086 = vmatprep.mubr.msk.bf16.mxu0 %vm6818_vm3, %v8899_v19 }
 0x304   : > { %6289 = vmatpush3.bf16.msra.mxu1 %v6770_v29  ;;  %v6761_v29 = vld [vmem:[%s8830_s2 + $0x1f8] sm:$0xff]  }
 0x305   : > { %6290 = vmatprep.subr.bf16.mxu1 %v8899_v19 }
 0x308   : > { %6291 = vmatpush3.bf16.msra.mxu1 %v6772_v34  ;;  %v8912_v34 = vld [vmem:[#allocation7_spill] sm:$0xff] }
 0x309   : > { %6292 = vmatprep.subr.bf16.mxu1 %v8899_v19 }
 0x30a   : > { %6087 = vmatmul.mubr.bf16.vlgmr.msra.gmra.mrb[0].mxu0 %v3580_v56  ;;  %v6773_v56 = vld [vmem:[%s8831_s3 + $0x18] sm:$0xff]  }
 0x30b   : > { %6107 = vmatpush3.bf16.msra.mxu0 %v6730_v25  ;;  %6090 = vmatprep.mubr.msk.bf16.mxu0 %vm6818_vm3, %v8899_v19  ;;  %v6806_v25 = vpack.c.bf16 %v8910_v61, %v8909_v4  ;;  %v4271_v61 = vld [vmem:[#allocation2 + $0x8] sm:$0xe0] }
 0x30c   : > { %6108 = vmatprep.subr.bf16.mxu0 %v8899_v19  ;;  %6293 = vmatpush3.bf16.msra.mxu1 %v6773_v56  ;;  %v8913_v56 = vld [vmem:[#allocation3_spill] sm:$0xff] }
 0x30d   : > { %6294 = vmatprep.subr.bf16.mxu1 %v8899_v19 }
 0x30f   : > { %6109 = vmatpush3.bf16.msra.mxu0 %v6731_v20  ;;  %v6774_v20 = vld [vmem:[%s8831_s3 + $0x20] sm:$0xff]  }
 0x310   : > { %6110 = vmatprep.subr.bf16.mxu0 %v8899_v19  ;;  %6295 = vmatpush3.bf16.msra.mxu1 %v6774_v20  ;;  %v4296_v20 = vrot.slane %v8913_v56, 5 }
 0x311   : > { %6296 = vmatprep.subr.bf16.mxu1 %v8899_v19 }
 0x312   : > { %6091 = vmatmul.mubr.bf16.gmra.mrb[4].mxu0 %v8197_v8  ;;  %v6735_v8 = vld [vmem:[%s8830_s2 + $0x128] sm:$0xff]  }
 0x313   : > { %6111 = vmatpush3.bf16.msra.mxu0 %v6732_v10  ;;  %6094 = vmatprep.mubr.msk.bf16.mxu0 %vm6818_vm3, %v8899_v19  ;;  %v6747_v10 = vld [vmem:[%s8830_s2 + $0x188] sm:$0xff]  }
 0x314   : > { %6112 = vmatprep.subr.bf16.mxu0 %v8899_v19  ;;  %6297 = vmatpush3.bf16.msra.mxu1 %v6775_v39 }
 0x315   : > { %6298 = vmatprep.subr.bf16.mxu1 %v8899_v19 }
 0x317   : > { %6113 = vmatpush3.bf16.msra.mxu0 %v6733_v12  ;;  %v6748_v12 = vld [vmem:[%s8830_s2 + $0x190] sm:$0xff]  }
 0x318   : > { %6114 = vmatprep.subr.bf16.mxu0 %v8899_v19 }
 0x31a   : > { %6095 = vmatmul.mubr.bf16.gmra.mrb[8].mxu0 %v8200_v28  ;;  %v6737_v28 = vld [vmem:[%s8830_s2 + $0x138] sm:$0xff]  }
 0x31b   : > { %6115 = vmatpush3.bf16.msra.mxu0 %v6734_v57  ;;  %6098 = vmatprep.mubr.msk.bf16.mxu0 %vm6818_vm3, %v8899_v19  ;;  %v6777_v57 = vld [vmem:[%s8831_s3 + $0x38] sm:$0xff]  }
 0x31c   : > { %6116 = vmatprep.subr.bf16.mxu0 %v8899_v19 }
 0x31f   : > { %6117 = vmatpush3.bf16.msra.mxu0 %v6735_v8  ;;  %v6749_v8 = vld [vmem:[%s8830_s2 + $0x198] sm:$0xff]  }
 0x320   : > { %6118 = vmatprep.subr.bf16.mxu0 %v8899_v19 }
 0x322   : > { %6099 = vmatmul.mubr.bf16.gmra.mrb[12].mxu0 %v8203_v60  ;;  %v6738_v60 = vld [vmem:[%s8830_s2 + $0x140] sm:$0xff]  }
 0x323   : > { %6102 = vmatprep.mubr.msk.bf16.mxu0 %vm6818_vm3, %v8899_v19  ;;  %6119 = vmatpush3.bf16.msra.mxu0 %v6736_v30  ;;  %v6778_v30 = vld [vmem:[%s6900_s26 + $0xc] ss:$16 sps:$4 sm:$0xff]  }
 0x324   : > { %6120 = vmatprep.subr.bf16.mxu0 %v8899_v19 }
 0x327   : > { %6121 = vmatpush3.bf16.msra.mxu0 %v6737_v28  ;;  %v6779_v28 = vld [vmem:[%s6900_s26 + $0x2c] ss:$16 sps:$4 sm:$0xff]  }
 0x328   : > { %6142 = vmatprep.subr.bf16.mxu0 %v8899_v19 }
 0x32a   : > { %6103 = vmatmul.mubr.bf16.gmra.mrb[16].mxu0 %v3597_v0  ;;  %v4083_v0 = vld [vmem:[#allocation2 + $0x8] sm:$0xf0] }
 0x32b   : > { %6122 = vmatprep.mubr.msk.bf16.mxu0 %vm6818_vm3, %v8899_v19 }
 0x332   : > { %6795 = vmatmul.mubr.msk.bf16.vlgmr.msra.gmra.mrb[0].mxu0 %vm6793_vm8, %v6794_v14  ;;  %vm6802_vm8 = vmpackc.low %vm7992_vm4, %vm7986_vm12  ;;  %v4103_v14 = vshrl.u32 %v4083_v0, 16 }
 0x333   : > { %6143 = vmatpush3.bf16.msra.mxu0 %v6738_v60  ;;  %6126 = vmatprep.mubr.msk.bf16.mxu0 %vm6818_vm3, %v8899_v19  ;;  %v6753_v60 = vld [vmem:[%s8830_s2 + $0x1b8] sm:$0xff]  }
 0x334   : > { %6144 = vmatprep.subr.bf16.mxu0 %v8899_v19 }
 0x337   : > { %6145 = vmatpush3.bf16.msra.mxu0 %v6739_v2  ;;  %v4106_v2 = vshll.u32 %v4083_v0, 16 }
 0x338   : > { %6146 = vmatprep.subr.bf16.mxu0 %v8899_v19 }
 0x339   : > { %v4108_v24 = vrot.slane %v4106_v2, 5  ;;  %v4461_v2 = vshrl.u32 %v4271_v61, 16 }
 0x33a   : > { %6798 = vmatmul.mubr.msk.bf16.gmra.mrb[4].mxu0 %vm6796_vm2, %v6797_v58  ;;  %vm6805_vm2 = vmpackc.low %vm8014_vm11, %vm8008_vm10 }
 0x33b   : > { %6147 = vmatpush3.bf16.msra.mxu0 %v6740_v33  ;;  %6130 = vmatprep.mubr.msk.bf16.mxu0 %vm6818_vm3, %v8899_v19  ;;  %v4105_v33 = vrot.slane %v4103_v14, 4 }
 0x33c   : > { %6148 = vmatprep.subr.bf16.mxu0 %v8899_v19 }
 0x33d   : > { %v4109_v58 = vor.u32 %v4108_v24, %v4105_v33  ;;  %v4463_v24 = vrot.slane %v4461_v2, 5 }
 0x33f   : > { %6149 = vmatpush3.bf16.msra.mxu0 %v6741_v3  ;;  %v6754_v3 = vld [vmem:[%s8830_s2 + $0x1c0] sm:$0xff]  }
 0x340   : > { %6150 = vmatprep.subr.bf16.mxu0 %v8899_v19 }
 0x342   : > { %6801 = vmatmul.mubr.msk.bf16.gmra.mrb[8].mxu0 %vm6799_vm13, %v6800_v46  ;;  %v6758_v46 = vld [vmem:[%s8830_s2 + $0x1e0] sm:$0xff]  }
 0x343   : > { %6151 = vmatpush3.bf16.msra.mxu0 %v6742_v49  ;;  %6134 = vmatprep.mubr.msk.bf16.mxu0 %vm6818_vm3, %v8899_v19  ;;  %v4113_v49 = vsel %vm4101_vm7, %v4109_v58, %v8251_v35  ;;  %v6757_v35 = vld [vmem:[%s8830_s2 + $0x1d8] sm:$0xff]  }
 0x344   : > { %6152 = vmatprep.subr.bf16.mxu0 %v8899_v19 }
 0x347   : > { %6153 = vmatpush3.bf16.msra.mxu0 %v6743_v59  ;;  %v6759_v59 = vld [vmem:[%s8830_s2 + $0x1e8] sm:$0xff]  }
 0x348   : > { %6154 = vmatprep.subr.bf16.mxu0 %v8899_v19 }
 0x34a   : > { %6804 = vmatmul.mubr.msk.bf16.gmra.mrb[12].mxu0 %vm6802_vm8, %v6803_v40  ;;  %v8911_v40 = vld [vmem:[#allocation8_spill] sm:$0xff] }
 0x34b   : > { %6138 = vmatprep.mubr.msk.bf16.mxu0 %vm6818_vm3, %v8899_v19  ;;  %6155 = vmatpush3.bf16.msra.mxu0 %v6744_v13 }
 0x34c   : > { %6156 = vmatprep.subr.bf16.mxu0 %v8899_v19 }
 0x34f   : > { %6157 = vmatpush3.bf16.msra.mxu0 %v6745_v21 }
 0x350   : > { %6178 = vmatprep.subr.bf16.mxu0 %v8899_v19 }
 0x352   : > { %6807 = vmatmul.mubr.msk.bf16.gmra.mrb[16].mxu0 %vm6805_vm2, %v6806_v25  ;;  %v4295_v25 = vrot.slane %v4271_v61, 5 }
 0x353   : > { %6158 = vmatprep.mubr.msk.bf16.mxu0 %vm6818_vm3, %v8899_v19 }
 0x35a   : > { %6159 = vmatmul.mubr.bf16.vlgmr.msra.gmra.mrb[0].mxu0 %v8224_v15  ;;  %v6776_v15 = vld [vmem:[%s8831_s3 + $0x30] sm:$0xff]  }
 0x35b   : > { %6179 = vmatpush3.bf16.msra.mxu0 %v6746_v52  ;;  %6162 = vmatprep.mubr.msk.bf16.mxu0 %vm6818_vm3, %v8899_v19  ;;  %v6762_v52 = vld [vmem:[%s8830_s2 + $0x200] sm:$0xff]  }
 0x35c   : > { %6180 = vmatprep.subr.bf16.mxu0 %v8899_v19  ;;  %6299 = vmatpush3.bf16.msra.mxu1 %v6776_v15  ;;  %v8914_v15 = vld [vmem:[#allocation4_spill] sm:$0xff] }
 0x35d   : > { %6300 = vmatprep.subr.bf16.mxu1 %v8899_v19 }
 0x35f   : > { %6181 = vmatpush3.bf16.msra.mxu0 %v6747_v10  ;;  %v6763_v10 = vld [vmem:[%s8830_s2 + $0x208] sm:$0xff]  }
 0x360   : > { %6182 = vmatprep.subr.bf16.mxu0 %v8899_v19  ;;  %6301 = vmatpush3.bf16.msra.mxu1 %v6777_v57  ;;  %v6764_v57 = vld [vmem:[%s8830_s2 + $0x210] sm:$0xff]  }
 0x362   : > { %6163 = vmatmul.mubr.bf16.gmra.mrb[4].mxu0 %v8231_v43  ;;  %v6750_v43 = vld [vmem:[%s8830_s2 + $0x1a0] sm:$0xff]  }
 0x363   : > { %6183 = vmatpush3.bf16.msra.mxu0 %v6748_v12  ;;  %6166 = vmatprep.mubr.msk.bf16.mxu0 %vm6818_vm3, %v8899_v19  ;;  %v4298_v12 = vrot.slane %v8914_v15, 5 }
 0x364   : > { %6184 = vmatprep.subr.bf16.mxu0 %v8899_v19  ;;  %6303 = vmatmul.mubr.bf16.vlgmr.msra.gmra.mrb[160].mxu1 %v6778_v30  ;;  %v6765_v30 = vld [vmem:[%s8830_s2 + $0x218] sm:$0xff]  }
 0x365   : > { %6306 = vmatprep.mubr.msk.bf16.mxu1 %vm6818_vm3, %v8899_v19 }
 0x367   : > { %6185 = vmatpush3.bf16.msra.mxu0 %v6749_v8 }
 0x368   : > { %6186 = vmatprep.subr.bf16.mxu0 %v8899_v19 }
 0x36a   : > { %6167 = vmatmul.mubr.bf16.gmra.mrb[8].mxu0 %v8234_v54  ;;  %v3943_v54 = vshll.u32 %v3886_v26, 16 }
 0x36b   : > { %6187 = vmatpush3.bf16.msra.mxu0 %v6750_v43  ;;  %6170 = vmatprep.mubr.msk.bf16.mxu0 %vm6818_vm3, %v8899_v19  ;;  %v8915_v43 = vld [vmem:[#allocation5_spill] sm:$0xff] }
 0x36c   : > { %6188 = vmatprep.subr.bf16.mxu0 %v8899_v19  ;;  %6307 = vmatmul.mubr.bf16.gmra.mrb[164].mxu1 %v6779_v28  ;;  %v3945_v9 = vrot.slane %v3943_v54, 1  ;;  %v6766_v28 = vld [vmem:[%s8830_s2 + $0x220] sm:$0xff]   ;;  %v8916_v54 = vld [vmem:[#allocation6_spill] sm:$0xff] }
 0x36d   : > { %6310 = vmatprep.mubr.msk.bf16.mxu1 %vm6818_vm3, %v8899_v19  ;;  %v4302_v0 = vrot.slane %v8916_v54, 5 }
 0x36f   : > { %6189 = vmatpush3.bf16.msra.mxu0 %v6751_v45  ;;  %v4300_v45 = vrot.slane %v8915_v43, 5 }
 0x370   : > { %6190 = vmatprep.subr.bf16.mxu0 %v8899_v19 }
 0x372   : > { %6171 = vmatmul.mubr.bf16.gmra.mrb[12].mxu0 %v8240_v38  ;;  %v3946_v38 = vsel %vm730_vm0, %v8228_v42, %v3945_v9  ;;  %v6755_v42 = vld [vmem:[%s8830_s2 + $0x1c8] sm:$0xff]   ;;  %vm4294_vm0 = vcmask 1042432   ;;  %v6771_v9 = vld [vmem:[%s8830_s2 + $0x238] sm:$0xff]  }
 0x373   : > { %6174 = vmatprep.mubr.msk.bf16.mxu0 %vm6818_vm3, %v8899_v19  ;;  %6191 = vmatpush3.bf16.msra.mxu0 %v6752_v1  ;;  %v4297_v39 = vsel %vm4294_vm0, %v4295_v25, %v4296_v20  ;;  %v4299_v8 = vsel %vm4294_vm0, %v4296_v20, %v4298_v12  ;;  %v4301_v26 = vsel %vm4294_vm0, %v4298_v12, %v4300_v45  ;;  %v6767_v1 = vld [vmem:[%s8830_s2 + $0x228] sm:$0xff]  }
 0x374   : > { %6192 = vmatprep.subr.bf16.mxu0 %v8899_v19  ;;  %6311 = vmatmul.mubr.bf16.gmra.mrb[168].mxu1 %v6780_v17  ;;  %v4303_v17 = vsel %vm4294_vm0, %v4300_v45, %v4302_v0 }
 0x375   : > { %6314 = vmatprep.mubr.msk.bf16.mxu1 %vm6818_vm3, %v8899_v19 }
 0x377   : > { %6193 = vmatpush3.bf16.msra.mxu0 %v6753_v60  ;;  %v6768_v60 = vld [vmem:[%s8830_s2 + $0x230] sm:$0xff]  }
 0x378   : > { %6214 = vmatprep.subr.bf16.mxu0 %v8899_v19 }
 0x37a   : > { %6175 = vmatmul.mubr.bf16.gmra.mrb[16].mxu0 %v3946_v38  ;;  %v4464_v38 = vshll.u32 %v4271_v61, 16 }
 0x37b   : > { %6194 = vmatprep.mubr.msk.bf16.mxu0 %vm6818_vm3, %v8899_v19 }
 0x37c   : > { %6315 = vmatmul.mubr.bf16.gmra.mrb[172].mxu1 %v6781_v53  ;;  %v4466_v53 = vrot.slane %v4464_v38, 6 }
 0x37d   : > { %6318 = vmatprep.mubr.msk.bf16.mxu1 %vm6818_vm3, %v8899_v19 }
 0x37e   : > { %v4467_v58 = vor.u32 %v4466_v53, %v4463_v24 }
 0x382   : > { %6195 = vmatmul.mubr.bf16.vlgmr.msra.gmra.mrb[0].mxu0 %v4113_v49  ;;  %v4442_v49 = vld [vmem:[#allocation2 + $0x30] sm:$0x3f] }
 0x383   : > { %6215 = vmatpush3.bf16.msra.mxu0 %v6754_v3  ;;  %6198 = vmatprep.mubr.msk.bf16.mxu0 %vm6818_vm3, %v8899_v19 }
 0x384   : > { %6216 = vmatprep.subr.bf16.mxu0 %v8899_v19  ;;  %6319 = vmatmul.mubr.bf16.gmra.mrb[176].mxu1 %v6782_v7  ;;  %v4488_v7 = vshll.u32 %v4442_v49, 16 }
 0x387   : > { %6217 = vmatpush3.bf16.msra.mxu0 %v6755_v42  ;;  %v4485_v42 = vshrl.u32 %v4442_v49, 16 }
 0x388   : > { %6218 = vmatprep.subr.bf16.mxu0 %v8899_v19 }
 0x38a   : > { %6199 = vmatmul.mubr.bf16.gmra.mrb[4].mxu0 %v8267_v22  ;;  %v8670_v22 = vld [vmem:[#allocation2 + $0x30] sm:$0x1f] }
 0x38b   : > { %6219 = vmatpush3.bf16.msra.mxu0 %v6756_v31  ;;  %6202 = vmatprep.mubr.msk.bf16.mxu0 %vm6818_vm3, %v8899_v19  ;;  %v4127_v55 = vshrl.u32 %v8670_v22, 16  ;;  %v4130_v13 = vshll.u32 %v8670_v22, 16  ;;  %v4304_v14 = vrot.slane %v8670_v22, 5  ;;  %v4487_v31 = vrot.slane %v4485_v42, 5 }
 0x38c   : > { %6220 = vmatprep.subr.bf16.mxu0 %v8899_v19 }
 0x38d   : > { %v4129_v6 = vrot.slane %v4127_v55, 4  ;;  %v4132_v50 = vrot.slane %v4130_v13, 5  ;;  %v4305_v33 = vsel %vm4294_vm0, %v4302_v0, %v4304_v14 }
 0x38f   : > { %6221 = vmatpush3.bf16.msra.mxu0 %v6757_v35  ;;  %v4133_v21 = vor.u32 %v4132_v50, %v4129_v6  ;;  %v4490_v35 = vrot.slane %v4488_v7, 6 }
 0x390   : > { %6222 = vmatprep.subr.bf16.mxu0 %v8899_v19 }
 0x391   : > { %v4134_v4 = vsel %vm4101_vm7, %v8912_v34, %v4133_v21  ;;  %vm8917_vm7 = vsmask.f32 2304 }
 0x392   : > { %6203 = vmatmul.mubr.bf16.gmra.mrb[8].mxu0 %v8270_v63  ;;  %v6760_v63 = vld [vmem:[%s8830_s2 + $0x1f0] sm:$0xff]   ;;  %v4471_v3 = vsel %vm8917_vm7, %v4467_v58, %v8286_v47  ;;  %v4491_v47 = vor.u32 %v4490_v35, %v4487_v31  ;;  %vm8918_vm13 = vmmov %vm8917_vm7 }
 0x393   : > { %6223 = vmatpush3.bf16.msra.mxu0 %v6758_v46  ;;  %6206 = vmatprep.mubr.msk.bf16.mxu0 %vm6818_vm3, %v8899_v19 }
 0x394   : > { %6224 = vmatprep.subr.bf16.mxu0 %v8899_v19 }
 0x397   : > { %6225 = vmatpush3.bf16.msra.mxu0 %v6759_v59 }
 0x398   : > { %6226 = vmatprep.subr.bf16.mxu0 %v8899_v19 }
 0x39a   : > { %6207 = vmatmul.mubr.bf16.gmra.mrb[12].mxu0 %v8911_v40 }
 0x39b   : > { %6210 = vmatprep.mubr.msk.bf16.mxu0 %vm6818_vm3, %v8899_v19  ;;  %6227 = vmatpush3.bf16.msra.mxu0 %v6760_v63 }
 0x39c   : > { %6228 = vmatprep.subr.bf16.mxu0 %v8899_v19 }
 0x39f   : > { %6229 = vmatpush3.bf16.msra.mxu0 %v6761_v29 }
 0x3a0   : > { %6250 = vmatprep.subr.bf16.mxu0 %v8899_v19 }
 0x3a2   : > { %6211 = vmatmul.mubr.bf16.gmra.mrb[16].mxu0 %v4134_v4 }
 0x3a3   : > { %6230 = vmatprep.mubr.msk.bf16.mxu0 %vm6818_vm3, %v8899_v19 }
 0x3aa   : > { %6231 = vmatmul.mubr.bf16.vlgmr.msra.gmra.mrb[0].mxu0 %v4297_v39 }
 0x3ab   : > { %6251 = vmatpush3.bf16.msra.mxu0 %v6762_v52  ;;  %6234 = vmatprep.mubr.msk.bf16.mxu0 %vm6818_vm3, %v8899_v19 }
 0x3ac   : > { %6252 = vmatprep.subr.bf16.mxu0 %v8899_v19 }
 0x3af   : > { %6253 = vmatpush3.bf16.msra.mxu0 %v6763_v10 }
 0x3b0   : > { %6254 = vmatprep.subr.bf16.mxu0 %v8899_v19 }
 0x3b2   : > { %6235 = vmatmul.mubr.bf16.gmra.mrb[4].mxu0 %v4299_v8 }
 0x3b3   : > { %6255 = vmatpush3.bf16.msra.mxu0 %v6764_v57  ;;  %6238 = vmatprep.mubr.msk.bf16.mxu0 %vm6818_vm3, %v8899_v19 }
 0x3b4   : > { %6256 = vmatprep.subr.bf16.mxu0 %v8899_v19 }
 0x3b7   : > { %6257 = vmatpush3.bf16.msra.mxu0 %v6765_v30 }
 0x3b8   : > { %6258 = vmatprep.subr.bf16.mxu0 %v8899_v19 }
 0x3ba   : > { %6239 = vmatmul.mubr.bf16.gmra.mrb[8].mxu0 %v4301_v26 }
 0x3bb   : > { %6259 = vmatpush3.bf16.msra.mxu0 %v6766_v28  ;;  %6242 = vmatprep.mubr.msk.bf16.mxu0 %vm6818_vm3, %v8899_v19 }
 0x3bc   : > { %6260 = vmatprep.subr.bf16.mxu0 %v8899_v19 }
 0x3bf   : > { %6261 = vmatpush3.bf16.msra.mxu0 %v6767_v1 }
 0x3c0   : > { %6262 = vmatprep.subr.bf16.mxu0 %v8899_v19 }
 0x3c2   : > { %6243 = vmatmul.mubr.bf16.gmra.mrb[12].mxu0 %v4303_v17 }
 0x3c3   : > { %6246 = vmatprep.mubr.msk.bf16.mxu0 %vm6818_vm3, %v8899_v19  ;;  %6263 = vmatpush3.bf16.msra.mxu0 %v6768_v60 }
 0x3c4   : > { %6264 = vmatprep.subr.bf16.mxu0 %v8899_v19 }
 0x3c7   : > { %6265 = vmatpush3.bf16.msra.mxu0 %v6771_v9 }
 0x3ca   : > { %6247 = vmatmul.mubr.bf16.gmra.mrb[16].mxu0 %v4305_v33 }
 0x3cb   : > { %6266 = vmatprep.mubr.msk.bf16.mxu0 %vm6818_vm3, %v8899_v19 }
 0x3d2   : > { %6267 = vmatmul.mubr.bf16.vlgmr.msra.gmra.mrb[0].mxu0 %v4471_v3 }
 0x3d3   : > { %6270 = vmatprep.mubr.msk.bf16.mxu0 %vm6818_vm3, %v8899_v19 }
 0x3da   : > { %6271 = vmatmul.mubr.bf16.gmra.mrb[4].mxu0 %v8294_v36  ;;  %v4492_v36 = vsel %vm8918_vm13, %v8296_v32, %v4491_v47 }
 0x3db   : > { %6274 = vmatprep.mubr.msk.bf16.mxu0 %vm6818_vm3, %v8899_v19 }
 0x3e2   : > { %6275 = vmatmul.mubr.bf16.gmra.mrb[8].mxu0 %v8299_v11 }
 0x3e3   : > { %6278 = vmatprep.mubr.msk.bf16.mxu0 %vm6818_vm3, %v8899_v19 }
 0x3ea   : > { %6279 = vmatmul.mubr.bf16.gmra.mrb[12].mxu0 %v8303_v41 }
 0x3eb   : > { %6282 = vmatprep.mubr.msk.bf16.mxu0 %vm6818_vm3, %v8899_v19 }
 0x3f2   : > { %6283 = vmatmul.mubr.bf16.gmra.mrb[16].mxu0 %v4492_v36 }
 0x437   : > { %v4861_v46 = vpop.f32.mrb[160].mxu1 }
 0x438   : > { %v6304_v11 = vpop.f32.mrb[161].mxu1 }
 0x439   : > { %v4864_v22 = vpop.f32.mrb[162].mxu1 }
 0x43a   : > { %v6305_v59 = vpop.f32.mrb[163].mxu1  ;;  %v4900_v13 = vpack.c.bf16 %v4864_v22, %v4861_v46 }
 0x43c   : > { %v4950_v50 = vunpack.c.l.bf16 %v4900_v13  ;;  %v4951_v40 = vunpack.c.h.bf16 %v4900_v13  ;;  %5439 = vst [vmem:[%s8766_s23] sm:$0xff] %v4900_v13  }
 0x43e   : > { %v4960_v19 = vadd.f32 %v4951_v40, %v4950_v50  ;;  %v4976_v34 = vmul.f32 %v4950_v50, %v4950_v50  ;;  %v4977_v4 = vmul.f32 %v4951_v40, %v4951_v40 }
 0x43f   : > { %v4869_v55 = vpop.f32.mrb[164].mxu1 }
 0x440   : > { %v6308_v63 = vpop.f32.mrb[165].mxu1  ;;  %v4986_v56 = vadd.f32 %v4977_v4, %v4976_v34 }
 0x441   : > { %v4872_v6 = vpop.f32.mrb[166].mxu1 }
 0x442   : > { %v4901_v41 = vpack.c.bf16 %v4872_v6, %v4869_v55  ;;  %v6309_v29 = vpop.f32.mrb[167].mxu1 }
 0x444   : > { %v4952_v61 = vunpack.c.l.bf16 %v4901_v41  ;;  %v4953_v20 = vunpack.c.h.bf16 %v4901_v41  ;;  %5460 = vst [vmem:[%s8766_s23 + $0x8] sm:$0xff] %v4901_v41  }
 0x446   : > { %v4961_v52 = vadd.f32 %v4960_v19, %v4952_v61  ;;  %v4978_v39 = vmul.f32 %v4952_v61, %v4952_v61  ;;  %v4979_v8 = vmul.f32 %v4953_v20, %v4953_v20 }
 0x447   : > { %v4877_v21 = vpop.f32.mrb[168].mxu1 }
 0x448   : > { %v6312_v32 = vpop.f32.mrb[169].mxu1  ;;  %v4962_v57 = vadd.f32 %v4961_v52, %v4953_v20  ;;  %v4987_v30 = vadd.f32 %v4986_v56, %v4978_v39 }
 0x449   : > { %v4880_v25 = vpop.f32.mrb[170].mxu1 }
 0x44a   : > { %v6313_v10 = vpop.f32.mrb[171].mxu1  ;;  %v4902_v15 = vpack.c.bf16 %v4880_v25, %v4877_v21  ;;  %v4988_v26 = vadd.f32 %v4987_v30, %v4979_v8 }
 0x44c   : > { %5461 = vst [vmem:[%s8766_s23 + $0x10] sm:$0xff] %v4902_v15   ;;  %v4954_v45 = vunpack.c.l.bf16 %v4902_v15  ;;  %v4955_v1 = vunpack.c.h.bf16 %v4902_v15 }
 0x44e   : > { %v4963_v60 = vadd.f32 %v4962_v57, %v4954_v45  ;;  %v4980_v17 = vmul.f32 %v4954_v45, %v4954_v45  ;;  %v4981_v14 = vmul.f32 %v4955_v1, %v4955_v1 }
 0x44f   : > { %v4885_v12 = vpop.f32.mrb[172].mxu1 }
 0x450   : > { %v6316_v43 = vpop.f32.mrb[173].mxu1  ;;  %v4964_v33 = vadd.f32 %v4963_v60, %v4955_v1  ;;  %v4989_v24 = vadd.f32 %v4988_v26, %v4980_v17 }
 0x451   : > { %v4888_v28 = vpop.f32.mrb[174].mxu1 }
 0x452   : > { %v4903_v54 = vpack.c.bf16 %v4888_v28, %v4885_v12  ;;  %v6317_v0 = vpop.f32.mrb[175].mxu1  ;;  %v4990_v7 = vadd.f32 %v4989_v24, %v4981_v14 }
 0x454   : > { %5462 = vst [vmem:[%s8766_s23 + $0x18] sm:$0xff] %v4903_v54   ;;  %v4956_v2 = vunpack.c.l.bf16 %v4903_v54  ;;  %v4957_v58 = vunpack.c.h.bf16 %v4903_v54 }
 0x456   : > { %v4982_v3 = vmul.f32 %v4956_v2, %v4956_v2  ;;  %v4965_v31 = vadd.f32 %v4964_v33, %v4956_v2  ;;  %v4983_v35 = vmul.f32 %v4957_v58, %v4957_v58 }
 0x457   : > { %v4893_v9 = vpop.f32.mrb[176].mxu1 }
 0x458   : > { %v6320_v38 = vpop.f32.mrb[177].mxu1  ;;  %v4966_v36 = vadd.f32 %v4965_v31, %v4957_v58  ;;  %v4991_v46 = vadd.f32 %v4990_v7, %v4982_v3 }
 0x459   : > { %v4896_v53 = vpop.f32.mrb[178].mxu1 }
 0x45a   : > { %v4904_v49 = vpack.c.bf16 %v4896_v53, %v4893_v9  ;;  %v6321_v42 = vpop.f32.mrb[179].mxu1  ;;  %v4992_v59 = vadd.f32 %v4991_v46, %v4983_v35 }
 0x45c   : > { %5463 = vst [vmem:[%s8766_s23 + $0x20] sm:$0xff] %v4904_v49   ;;  %v4958_v47 = vunpack.c.l.bf16 %v4904_v49  ;;  %v4959_v11 = vunpack.c.h.bf16 %v4904_v49 }
 0x45e   : > { %v4984_v22 = vmul.f32 %v4958_v47, %v4958_v47  ;;  %v4967_v55 = vadd.f32 %v4966_v36, %v4958_v47  ;;  %v4985_v13 = vmul.f32 %v4959_v11, %v4959_v11 }
 0x460   : > { %v4968_v63 = vadd.f32 %v4967_v55, %v4959_v11  ;;  %v4993_v6 = vadd.f32 %v4992_v59, %v4984_v22 }
 0x462   : > { %v4969_v50 = vrot.slane %v4968_v63, 4  ;;  %v4994_v40 = vadd.f32 %v4993_v6, %v4985_v13 }
 0x464   : > { %v4970_v41 = vadd.f32 %v4969_v50, %v4968_v63  ;;  %v4995_v29 = vrot.slane %v4994_v40, 4 }
 0x466   : > { %v4971_v21 = vrot.slane %v4970_v41, 2  ;;  %v4996_v19 = vadd.f32 %v4995_v29, %v4994_v40 }
 0x468   : > { %v4972_v34 = vadd.f32 %v4971_v21, %v4970_v41  ;;  %v4997_v4 = vrot.slane %v4996_v19, 2 }
 0x46a   : > { %v4973_v61 = vrot.slane %v4972_v34, 1  ;;  %v4998_v32 = vadd.f32 %v4997_v4, %v4996_v19 }
 0x46c   : > { %v4974_v25 = vadd.f32 %v4973_v61, %v4972_v34  ;;  %v4999_v56 = vrot.slane %v4998_v32, 1 }
 0x46e   : > { %4975 = vst [vmem:[%s304_s29] sm:$0x1] %v4974_v25  ;;  %v5000_v20 = vadd.f32 %v4999_v56, %v4998_v32 }
 0x470   : > { %5001 = vst [vmem:[%s307_s9] sm:$0x1] %v5000_v20 }
 0x4a5   : > { %v4580_v52 = vpop.f32.mrb[0].mxu0 }
 0x4a6   : > { %v6268_v39 = vpop.f32.mrb[1].mxu0  ;;  %v4629_v15 = vsel %vm7867_vm14, %v4580_v52, 0.0 }
 0x4a7   : > { %v4583_v10 = vpop.f32.mrb[2].mxu0 }
 0x4a8   : > { %v4630_v12 = vsel %vm7871_vm15, %v4583_v10, 0.0  ;;  %v6269_v57 = vpop.f32.mrb[3].mxu0 }
 0x4a9   : > { %v4639_v8 = vadd.f32 %v4630_v12, %v4629_v15 }
 0x4ad   : > { %v4588_v30 = vpop.f32.mrb[4].mxu0 }
 0x4ae   : > { %v4631_v43 = vsel %vm7912_vm6, %v4588_v30, 0.0  ;;  %v6272_v45 = vpop.f32.mrb[5].mxu0 }
 0x4af   : > { %v4640_v28 = vadd.f32 %v4639_v8, %v4631_v43  ;;  %v4591_v26 = vpop.f32.mrb[6].mxu0 }
 0x4b0   : > { %v4632_v1 = vsel %vm7920_vm9, %v4591_v26, 0.0  ;;  %v6273_v54 = vpop.f32.mrb[7].mxu0 }
 0x4b1   : > { %v4641_v0 = vadd.f32 %v4640_v28, %v4632_v1 }
 0x4b5   : > { %v4596_v60 = vpop.f32.mrb[8].mxu0 }
 0x4b6   : > { %v4633_v17 = vsel %vm7950_vm1, %v4596_v60, 0.0  ;;  %v6276_v9 = vpop.f32.mrb[9].mxu0 }
 0x4b7   : > { %v4642_v14 = vadd.f32 %v4641_v0, %v4633_v17  ;;  %v4599_v2 = vpop.f32.mrb[10].mxu0 }
 0x4b8   : > { %v4634_v38 = vsel %vm7958_vm5, %v4599_v2, 0.0  ;;  %v6277_v33 = vpop.f32.mrb[11].mxu0 }
 0x4b9   : > { %v4643_v24 = vadd.f32 %v4642_v14, %v4634_v38 }
 0x4bd   : > { %v4604_v53 = vpop.f32.mrb[12].mxu0 }
 0x4be   : > { %v4635_v58 = vsel %vm7986_vm12, %v4604_v53, 0.0  ;;  %v6280_v3 = vpop.f32.mrb[13].mxu0 }
 0x4bf   : > { %v4644_v49 = vadd.f32 %v4643_v24, %v4635_v58  ;;  %v4607_v42 = vpop.f32.mrb[14].mxu0 }
 0x4c0   : > { %v4636_v7 = vsel %vm7992_vm4, %v4607_v42, 0.0  ;;  %v6281_v31 = vpop.f32.mrb[15].mxu0 }
 0x4c1   : > { %v4645_v35 = vadd.f32 %v4644_v49, %v4636_v7 }
 0x4c5   : > { %v4612_v47 = vpop.f32.mrb[16].mxu0 }
 0x4c6   : > { %v4637_v36 = vsel %vm8008_vm10, %v4612_v47, 0.0  ;;  %v6284_v46 = vpop.f32.mrb[17].mxu0 }
 0x4c7   : > { %v4646_v11 = vadd.f32 %v4645_v35, %v4637_v36  ;;  %v4615_v22 = vpop.f32.mrb[18].mxu0 }
 0x4c8   : > { %v4638_v59 = vsel %vm8014_vm11, %v4615_v22, 0.0  ;;  %v6285_v55 = vpop.f32.mrb[19].mxu0 }
 0x4c9   : > { %v4647_v13 = vadd.f32 %v4646_v11, %v4638_v59 }
 0x4cb   : > { %v4648_v63 = vrot.slane %v4647_v13, 4 }
 0x4cd   : > { %v4649_v6 = vadd.f32 %v4648_v63, %v4647_v13 }
 0x4cf   : > { %v4650_v50 = vrot.slane %v4649_v6, 2 }
 0x4d1   : > { %v4651_v40 = vadd.f32 %v4650_v50, %v4649_v6 }
 0x4d3   : > { %v4652_v41 = vrot.slane %v4651_v40, 1 }
 0x4d5   : > { %v4653_v29 = vadd.f32 %v4652_v41, %v4651_v40 }
 0x4d7   : > { %v4654_v21 = vmul.f32 0.015625, %v4653_v29 }
 0x4d9   : > { %v4655_v19 = vsub.f32 %v4580_v52, %v4654_v21  ;;  %v4656_v34 = vsub.f32 %v4583_v10, %v4654_v21  ;;  %v4657_v4 = vsub.f32 %v4588_v30, %v4654_v21  ;;  %v4658_v61 = vsub.f32 %v4591_v26, %v4654_v21 }
 0x4da   : > { %v4659_v32 = vsub.f32 %v4596_v60, %v4654_v21  ;;  %v4660_v25 = vsub.f32 %v4599_v2, %v4654_v21  ;;  %v4661_v56 = vsub.f32 %v4604_v53, %v4654_v21  ;;  %v4662_v20 = vsub.f32 %v4607_v42, %v4654_v21 }
 0x4db   : > { %v4663_v39 = vsub.f32 %v4612_v47, %v4654_v21  ;;  %v4664_v15 = vsub.f32 %v4615_v22, %v4654_v21  ;;  %v4665_v12 = vmul.f32 %v4655_v19, %v4655_v19  ;;  %v4666_v57 = vmul.f32 %v4656_v34, %v4656_v34 }
 0x4dc   : > { %v4667_v8 = vmul.f32 %v4657_v4, %v4657_v4  ;;  %v4668_v28 = vmul.f32 %v4658_v61, %v4658_v61  ;;  %v4669_v10 = vmul.f32 %v4659_v32, %v4659_v32  ;;  %v4670_v1 = vmul.f32 %v4660_v25, %v4660_v25 }
 0x4dd   : > { %v4675_v43 = vsel %vm7867_vm14, %v4665_v12, 0.0  ;;  %v4676_v45 = vsel %vm7871_vm15, %v4666_v57, 0.0  ;;  %v4671_v60 = vmul.f32 %v4661_v56, %v4661_v56  ;;  %v4672_v9 = vmul.f32 %v4662_v20, %v4662_v20 }
 0x4de   : > { %v4685_v52 = vadd.f32 %v4676_v45, %v4675_v43  ;;  %v4677_v30 = vsel %vm7912_vm6, %v4667_v8, 0.0  ;;  %v4678_v54 = vsel %vm7920_vm9, %v4668_v28, 0.0  ;;  %v4679_v48 = vsel %vm7950_vm1, %v4669_v10, 0.0 }
 0x4df   : > { %v4680_v18 = vsel %vm7958_vm5, %v4670_v1, 0.0  ;;  %v4673_v2 = vmul.f32 %v4663_v39, %v4663_v39  ;;  %v4681_v44 = vsel %vm7986_vm12, %v4671_v60, 0.0  ;;  %v4674_v33 = vmul.f32 %v4664_v15, %v4664_v15 }
 0x4e0   : > { %v4686_v26 = vadd.f32 %v4685_v52, %v4677_v30  ;;  %v4682_v27 = vsel %vm7992_vm4, %v4672_v9, 0.0 }
 0x4e1   : > { %v4683_v16 = vsel %vm8008_vm10, %v4673_v2, 0.0  ;;  %v4684_v23 = vsel %vm8014_vm11, %v4674_v33, 0.0 }
 0x4e2   : > { %v4687_v0 = vadd.f32 %v4686_v26, %v4678_v54 }
 0x4e4   : > { %v4688_v17 = vadd.f32 %v4687_v0, %v4679_v48 }
 0x4e6   : > { %v4689_v14 = vadd.f32 %v4688_v17, %v4680_v18 }
 0x4e8   : > { %v4690_v38 = vadd.f32 %v4689_v14, %v4681_v44 }
 0x4ea   : > { %v4691_v24 = vadd.f32 %v4690_v38, %v4682_v27 }
 0x4ec   : > { %v4692_v53 = vadd.f32 %v4691_v24, %v4683_v16 }
 0x4ee   : > { %v4693_v58 = vadd.f32 %v4692_v53, %v4684_v23 }
 0x4f0   : > { %v4694_v3 = vrot.slane %v4693_v58, 4 }
 0x4f2   : > { %v4695_v49 = vadd.f32 %v4694_v3, %v4693_v58 }
 0x4f4   : > { %v4696_v42 = vrot.slane %v4695_v49, 2 }
 0x4f6   : > { %v4697_v62 = vadd.f32 %v4696_v42, %v4695_v49 }
 0x4f8   : > { %v4698_v7 = vrot.slane %v4697_v62, 1 }
 0x4fa   : > { %v4699_v31 = vadd.f32 %v4698_v7, %v4697_v62 }
 0x4fc   : > { %v4700_v35 = vmul.f32 0.015625, %v4699_v31 }
 0x4fe   : > { %v4701_v47 = vadd.f32 1e-05, %v4700_v35 }
 0x500   : > { %6785 = vrsqrt.f32 %v4701_v47 }
 0x50a   : > { %v6786_v37 = vpop.eup %6785 }
 0x50b   : > { %v4703_v51 = vmul.f32 %v6786_v37, %v4655_v19  ;;  %v4704_v36 = vmul.f32 %v6786_v37, %v4656_v34  ;;  %v4705_v5 = vmul.f32 %v6786_v37, %v4657_v4  ;;  %v4706_v46 = vmul.f32 %v6786_v37, %v4658_v61 }
 0x50c   : > { %v4707_v11 = vmul.f32 %v6786_v37, %v4659_v32  ;;  %v4708_v22 = vmul.f32 %v6786_v37, %v4660_v25  ;;  %v4709_v59 = vmul.f32 %v6786_v37, %v4661_v56  ;;  %v4710_v55 = vmul.f32 %v6786_v37, %v4662_v20 }
 0x50d   : > { %v4711_v13 = vmul.f32 %v6786_v37, %v4663_v39  ;;  %v4712_v63 = vmul.f32 %v6786_v37, %v4664_v15  ;;  %4713 = vst [vmem:[%s296_s13] sm:$0xff] %v4703_v51  ;;  %4714 = vst [vmem:[%s296_s13 + $0x8] sm:$0xff] %v4704_v36 }
 0x50e   : > { %4715 = vst [vmem:[%s296_s13 + $0x10] sm:$0xff] %v4705_v5  ;;  %4716 = vst [vmem:[%s296_s13 + $0x18] sm:$0xff] %v4706_v46 }
 0x50f   : > { %4717 = vst [vmem:[%s296_s13 + $0x20] sm:$0xff] %v4707_v11  ;;  %4718 = vst [vmem:[%s296_s13 + $0x28] sm:$0xff] %v4708_v22 }
 0x510   : > { %4719 = vst [vmem:[%s296_s13 + $0x30] sm:$0xff] %v4709_v59  ;;  %4720 = vst [vmem:[%s296_s13 + $0x38] sm:$0xff] %v4710_v55 }
 0x511   : > { %4721 = vst [vmem:[%s296_s13 + $0x40] sm:$0xff] %v4711_v13  ;;  %4722 = vst [vmem:[%s296_s13 + $0x48] sm:$0xff] %v4712_v63 }
 0x512 PF: > { %s18_s24 = sadd.s32 1, %s6814_s24  }
 0x513   : > { %p15_p4 = scmp.ge.s32.totalorder %s18_s24, 4  }
 0x515   :  { %17 = sbr.rel (!%p15_p4) target bundleno = 1 (0x1), region = 102 }

</bundles_post_ra>
